<compile_context>
chip_gen: v6e
topology: v6e:2x2x1
jax: 0.10.0
libtpu: 0.0.40
codegen_flags: <defaults>
</compile_context>

<pallas_src>
import functools

import jax
import jax.numpy as jnp
from jax.experimental import pallas as pl
from jax.experimental.pallas import tpu as pltpu


# ----------------------------------------------------------------------------
# Fused Pallas kernel: conv-as-matmul + bias [+ InstanceNorm2d] [+ LeakyReLU]
#
# Grid = (B, Cout_tiles).  Block shapes:
#   p_ref: (1, S, K)   bf16   im2col patches of one batch element (S = OH*OW)
#   w_ref: (K, TN)     bf16   weight slice
#   b_ref: (1, TN)     f32    bias slice
#   o_ref: (1, S, TN)         output slice
# ----------------------------------------------------------------------------
def _conv_fused_kernel(p_ref, w_ref, b_ref, o_ref, *, norm, leaky, eps):
    acc = jnp.dot(p_ref[0], w_ref[...], preferred_element_type=jnp.float32)
    acc = acc + b_ref[...]                                   # (S, TN) + (1, TN)
    if norm:
        # InstanceNorm2d(affine=False, eps=1e-5): per-channel stats over space.
        mean = jnp.mean(acc, axis=0, keepdims=True)
        cen = acc - mean
        var = jnp.mean(cen * cen, axis=0, keepdims=True)     # biased, like torch
        acc = cen * jax.lax.rsqrt(var + eps)
    if leaky:
        acc = jnp.where(acc > 0, acc, 0.2 * acc)
    o_ref[0] = acc.astype(o_ref.dtype)


# ----------------------------------------------------------------------------
# Glue: im2col (3x3 kernel, pad 1, arbitrary stride) producing bf16 patches.
# ----------------------------------------------------------------------------
def _im2col(x_nhwc, stride):
    B, H, W, C = x_nhwc.shape
    xp = jnp.pad(x_nhwc, ((0, 0), (1, 1), (1, 1), (0, 0)))
    OH = (H + 2 - 3) // stride + 1
    OW = (W + 2 - 3) // stride + 1
    cols = []
    for ky in range(3):
        for kx in range(3):
            cols.append(xp[:, ky: ky + stride * (OH - 1) + 1: stride,
                              kx: kx + stride * (OW - 1) + 1: stride, :])
    patches = jnp.concatenate(cols, axis=-1).astype(jnp.bfloat16)   # (B,OH,OW,9C)
    return patches.reshape(B, OH * OW, 9 * C), OH, OW


def _fused_conv_layer(x_nhwc, w, b, *, stride, norm, leaky,
                      out_dtype=jnp.bfloat16, eps=1e-5):
    """w: (Cout, Cin, 3, 3) PyTorch layout; b: (Cout,)."""
    B = x_nhwc.shape[0]
    Cout, Cin = int(w.shape[0]), int(w.shape[1])
    patches, OH, OW = _im2col(x_nhwc, stride)                # (B, S, K) bf16
    S = OH * OW
    K = 9 * Cin

    # (ky, kx, cin, cout) ordering matches the patch concat order above.
    wmat = jnp.transpose(w, (2, 3, 1, 0)).reshape(K, Cout).astype(jnp.bfloat16)
    bias = b.reshape(1, Cout).astype(jnp.float32)

    # Channel tile: 128 lanes when Cout is a multiple of 128, else full Cout
    # (full-extent blocks are always legal for the (8,128) rule).
    tn = 128 if Cout % 128 == 0 else Cout
    n_tiles = Cout // tn
    grid = (B, n_tiles)

    out_itemsize = jnp.dtype(out_dtype).itemsize
    cost = pl.CostEstimate(
        flops=int(2 * B * S * K * Cout),
        transcendentals=int(B * Cout) if norm else 0,
        bytes_accessed=int(B * S * K * 2 + K * Cout * 2 + Cout * 4
                           + B * S * Cout * out_itemsize),
    )

    # VMEM budget: 2x double-buffering on every block, sized so it also fits
    # v7x's 64 MiB physical / 32 MiB scoped default.
    block_bytes = S * K * 2 + K * tn * 2 + tn * 4 + S * tn * out_itemsize
    vmem_limit = int(min(max(4 * block_bytes, 16 * 2**20), 48 * 2**20))

    kern = functools.partial(_conv_fused_kernel, norm=norm, leaky=leaky, eps=eps)
    out = pl.pallas_call(
        kern,
        out_shape=jax.ShapeDtypeStruct((B, S, Cout), out_dtype),
        grid_spec=pltpu.PrefetchScalarGridSpec(
            num_scalar_prefetch=0,
            grid=grid,
            in_specs=[
                pl.BlockSpec((1, S, K), lambda bi, j: (bi, 0, 0)),
                pl.BlockSpec((K, tn), lambda bi, j: (0, j)),
                pl.BlockSpec((1, tn), lambda bi, j: (0, j)),
            ],
            out_specs=pl.BlockSpec((1, S, tn), lambda bi, j: (bi, 0, j)),
        ),
        compiler_params=pltpu.CompilerParams(
            dimension_semantics=("parallel", "parallel"),
            vmem_limit_bytes=vmem_limit),
        cost_estimate=cost,
    )(patches, wmat, bias)
    return out.reshape(B, OH, OW, Cout)


# ----------------------------------------------------------------------------
# Discriminator forward
# ----------------------------------------------------------------------------
_LAYER_CFG = [
    # (out_filters, stride, normalize)
    (64, 2, False),
    (128, 2, True),
    (256, 2, True),
    (512, 1, True),
]


def init_params(key, channels=3):
    params = {}
    in_f = channels
    for i, (out_f, _, _) in enumerate(_LAYER_CFG, start=1):
        key, kw, kb = jax.random.split(key, 3)
        params[f"w{i}"] = 0.05 * jax.random.normal(kw, (out_f, in_f, 3, 3), jnp.float32)
        params[f"b{i}"] = 0.01 * jax.random.normal(kb, (out_f,), jnp.float32)
        in_f = out_f
    key, kw, kb = jax.random.split(key, 3)
    params["w5"] = 0.05 * jax.random.normal(kw, (1, in_f, 3, 3), jnp.float32)
    params["b5"] = 0.01 * jax.random.normal(kb, (1,), jnp.float32)
    return params


def discriminator_forward(img_nchw, params):
    x = jnp.transpose(img_nchw, (0, 2, 3, 1)).astype(jnp.float32)   # NCHW -> NHWC
    for i, (_, stride, normalize) in enumerate(_LAYER_CFG, start=1):
        # Conv + bias (+ InstanceNorm) + LeakyReLU(0.2), all fused in one kernel.
        x = _fused_conv_layer(x, params[f"w{i}"], params[f"b{i}"],
                              stride=stride, norm=normalize, leaky=True,
                              out_dtype=jnp.bfloat16)
    # Final conv to 1 channel: no norm, no activation, f32 logits.
    x = _fused_conv_layer(x, params["w5"], params["b5"],
                          stride=1, norm=False, leaky=False,
                          out_dtype=jnp.float32)
    return jnp.transpose(x, (0, 3, 1, 2))                           # NHWC -> NCHW


if __name__ == "__main__":
    key = jax.random.PRNGKey(0)
    key, k_img = jax.random.split(key)
    img = jax.random.normal(k_img, (2, 3, 16, 16), jnp.float32)     # NCHW

    params = init_params(key, channels=3)

    fwd = jax.jit(discriminator_forward)
    out = fwd(img, params)
    jax.block_until_ready(out)

    # sanity: 16 -> 8 -> 4 -> 2 -> 2 -> 2 spatial, 1 output channel
    assert out.shape == (2, 1, 2, 2), out.shape
    assert bool(jnp.all(jnp.isfinite(out)))
    print("KERNEL_OK")
</pallas_src>

<mosaic_0001>
module attributes {stable_mosaic.version = 11 : i64} {
  func.func @_conv_fused_kernel(%arg0: i32, %arg1: i32, %arg2: memref<1x64x27xbf16, #tpu.memory_space<vmem>>, %arg3: memref<27x64xbf16, #tpu.memory_space<vmem>>, %arg4: memref<1x64xf32, #tpu.memory_space<vmem>>, %arg5: memref<1x64x64xbf16, #tpu.memory_space<vmem>>) attributes {dimension_semantics = [#tpu.dimension_semantics<parallel>, #tpu.dimension_semantics<parallel>], iteration_bounds = array<i64: 2, 1>, scalar_prefetch = 0 : i64, scratch_operands = 0 : i64, tpu.core_type = #tpu.core_type<tc>, window_params = [{transform_indices = @transform_0, window_bounds = array<i64: 1, 64, 27>}, {transform_indices = @transform_1, window_bounds = array<i64: 27, 64>}, {transform_indices = @transform_2, window_bounds = array<i64: 1, 64>}, {transform_indices = @transform_3, window_bounds = array<i64: 1, 64, 64>}]} {
    %c0 = arith.constant 0 : index
    %c0_0 = arith.constant 0 : index
    %c0_1 = arith.constant 0 : index
    %0 = vector.load %arg2[%c0, %c0_0, %c0_1] : memref<1x64x27xbf16, #tpu.memory_space<vmem>>, vector<1x64x27xbf16>
    %1 = vector.shape_cast %0 : vector<1x64x27xbf16> to vector<64x27xbf16>
    %c0_2 = arith.constant 0 : index
    %c0_3 = arith.constant 0 : index
    %2 = vector.load %arg3[%c0_2, %c0_3] : memref<27x64xbf16, #tpu.memory_space<vmem>>, vector<27x64xbf16>
    %cst = arith.constant dense<0.000000e+00> : vector<64x64xf32>
    %3 = tpu.matmul %1, %2, %cst {dimension_numbers = #tpu.dot_dimension_numbers<[1], [0], [0], [1], [0, 0, 1, 1], [], []>} : vector<64x27xbf16>, vector<27x64xbf16>, vector<64x64xf32> -> vector<64x64xf32>
    %c0_4 = arith.constant 0 : index
    %c0_5 = arith.constant 0 : index
    %4 = vector.load %arg4[%c0_4, %c0_5] : memref<1x64xf32, #tpu.memory_space<vmem>>, vector<1x64xf32>
    %5 = vector.broadcast %4 : vector<1x64xf32> to vector<64x64xf32>
    %6 = arith.addf %3, %5 : vector<64x64xf32>
    %cst_6 = arith.constant 0.000000e+00 : f32
    %7 = vector.broadcast %cst_6 : f32 to vector<64x64xf32>
    %8 = arith.cmpf ogt, %6, %7 : vector<64x64xf32>
    %cst_7 = arith.constant 2.000000e-01 : f32
    %9 = vector.broadcast %cst_7 : f32 to vector<64x64xf32>
    %10 = arith.mulf %9, %6 : vector<64x64xf32>
    %11 = arith.select %8, %6, %10 : vector<64x64xi1>, vector<64x64xf32>
    %12 = arith.truncf %11 : vector<64x64xf32> to vector<64x64xbf16>
    %c0_8 = arith.constant 0 : index
    %c0_9 = arith.constant 0 : index
    %c0_10 = arith.constant 0 : index
    %13 = vector.load %arg5[%c0_8, %c0_9, %c0_10] : memref<1x64x64xbf16, #tpu.memory_space<vmem>>, vector<1x64x64xbf16>
    %14 = vector.shape_cast %13 : vector<1x64x64xbf16> to vector<64x64xbf16>
    %15 = vector.shape_cast %12 : vector<64x64xbf16> to vector<1x64x64xbf16>
    tpu.vector_store %arg5[%c0_8, %c0_9, %c0_10], %15 {strides = array<i32>} : memref<1x64x64xbf16, #tpu.memory_space<vmem>>, vector<1x64x64xbf16>,
    return
  }
  func.func @transform_0(%arg0: i32, %arg1: i32) -> (i32, i32, i32) {
    %c0_i32 = arith.constant 0 : i32
    %c0_i32_0 = arith.constant 0 : i32
    %c0_i32_1 = arith.constant 0 : i32
    return %arg0, %c0_i32, %c0_i32_0 : i32, i32, i32
  }
  func.func @transform_1(%arg0: i32, %arg1: i32) -> (i32, i32) {
    %c0_i32 = arith.constant 0 : i32
    %c0_i32_0 = arith.constant 0 : i32
    return %c0_i32, %arg1 : i32, i32
  }
  func.func @transform_2(%arg0: i32, %arg1: i32) -> (i32, i32) {
    %c0_i32 = arith.constant 0 : i32
    %c0_i32_0 = arith.constant 0 : i32
    return %c0_i32, %arg1 : i32, i32
  }
  func.func @transform_3(%arg0: i32, %arg1: i32) -> (i32, i32, i32) {
    %c0_i32 = arith.constant 0 : i32
    %c0_i32_0 = arith.constant 0 : i32
    return %arg0, %c0_i32, %arg1 : i32, i32, i32
  }
}

module attributes {stable_mosaic.version = 11 : i64} {
  func.func @_conv_fused_kernel(%arg0: i32, %arg1: i32, %arg2: memref<1x16x576xbf16, #tpu.memory_space<vmem>>, %arg3: memref<576x128xbf16, #tpu.memory_space<vmem>>, %arg4: memref<1x128xf32, #tpu.memory_space<vmem>>, %arg5: memref<1x16x128xbf16, #tpu.memory_space<vmem>>) attributes {dimension_semantics = [#tpu.dimension_semantics<parallel>, #tpu.dimension_semantics<parallel>], iteration_bounds = array<i64: 2, 1>, scalar_prefetch = 0 : i64, scratch_operands = 0 : i64, tpu.core_type = #tpu.core_type<tc>, window_params = [{transform_indices = @transform_0, window_bounds = array<i64: 1, 16, 576>}, {transform_indices = @transform_1, window_bounds = array<i64: 576, 128>}, {transform_indices = @transform_2, window_bounds = array<i64: 1, 128>}, {transform_indices = @transform_3, window_bounds = array<i64: 1, 16, 128>}]} {
    %c0 = arith.constant 0 : index
    %c0_0 = arith.constant 0 : index
    %c0_1 = arith.constant 0 : index
    %0 = vector.load %arg2[%c0, %c0_0, %c0_1] : memref<1x16x576xbf16, #tpu.memory_space<vmem>>, vector<1x16x576xbf16>
    %1 = vector.shape_cast %0 : vector<1x16x576xbf16> to vector<16x576xbf16>
    %c0_2 = arith.constant 0 : index
    %c0_3 = arith.constant 0 : index
    %2 = vector.load %arg3[%c0_2, %c0_3] : memref<576x128xbf16, #tpu.memory_space<vmem>>, vector<576x128xbf16>
    %cst = arith.constant dense<0.000000e+00> : vector<16x128xf32>
    %3 = tpu.matmul %1, %2, %cst {dimension_numbers = #tpu.dot_dimension_numbers<[1], [0], [0], [1], [0, 0, 1, 1], [], []>} : vector<16x576xbf16>, vector<576x128xbf16>, vector<16x128xf32> -> vector<16x128xf32>
    %c0_4 = arith.constant 0 : index
    %c0_5 = arith.constant 0 : index
    %4 = vector.load %arg4[%c0_4, %c0_5] : memref<1x128xf32, #tpu.memory_space<vmem>>, vector<1x128xf32>
    %5 = vector.broadcast %4 : vector<1x128xf32> to vector<16x128xf32>
    %6 = arith.addf %3, %5 : vector<16x128xf32>
    %cst_6 = arith.constant dense<0.000000e+00> : vector<128xf32>
    %7 = vector.multi_reduction <add>, %6, %cst_6 [0] : vector<16x128xf32> to vector<128xf32>
    %8 = vector.shape_cast %7 : vector<128xf32> to vector<1x128xf32>
    %cst_7 = arith.constant 1.600000e+01 : f32
    %9 = vector.broadcast %cst_7 : f32 to vector<1x128xf32>
    %10 = arith.divf %8, %9 : vector<1x128xf32>
    %11 = vector.broadcast %10 : vector<1x128xf32> to vector<16x128xf32>
    %12 = arith.subf %6, %11 : vector<16x128xf32>
    %13 = arith.mulf %12, %12 : vector<16x128xf32>
    %cst_8 = arith.constant dense<0.000000e+00> : vector<128xf32>
    %14 = vector.multi_reduction <add>, %13, %cst_8 [0] : vector<16x128xf32> to vector<128xf32>
    %15 = vector.shape_cast %14 : vector<128xf32> to vector<1x128xf32>
    %cst_9 = arith.constant 1.600000e+01 : f32
    %16 = vector.broadcast %cst_9 : f32 to vector<1x128xf32>
    %17 = arith.divf %15, %16 : vector<1x128xf32>
    %cst_10 = arith.constant 9.99999974E-6 : f32
    %18 = vector.broadcast %cst_10 : f32 to vector<1x128xf32>
    %19 = arith.addf %17, %18 : vector<1x128xf32>
    %20 = math.rsqrt %19 : vector<1x128xf32>
    %21 = vector.broadcast %20 : vector<1x128xf32> to vector<16x128xf32>
    %22 = arith.mulf %12, %21 : vector<16x128xf32>
    %cst_11 = arith.constant 0.000000e+00 : f32
    %23 = vector.broadcast %cst_11 : f32 to vector<16x128xf32>
    %24 = arith.cmpf ogt, %22, %23 : vector<16x128xf32>
    %cst_12 = arith.constant 2.000000e-01 : f32
    %25 = vector.broadcast %cst_12 : f32 to vector<16x128xf32>
    %26 = arith.mulf %25, %22 : vector<16x128xf32>
    %27 = arith.select %24, %22, %26 : vector<16x128xi1>, vector<16x128xf32>
    %28 = arith.truncf %27 : vector<16x128xf32> to vector<16x128xbf16>
    %c0_13 = arith.constant 0 : index
    %c0_14 = arith.constant 0 : index
    %c0_15 = arith.constant 0 : index
    %29 = vector.load %arg5[%c0_13, %c0_14, %c0_15] : memref<1x16x128xbf16, #tpu.memory_space<vmem>>, vector<1x16x128xbf16>
    %30 = vector.shape_cast %29 : vector<1x16x128xbf16> to vector<16x128xbf16>
    %31 = vector.shape_cast %28 : vector<16x128xbf16> to vector<1x16x128xbf16>
    tpu.vector_store %arg5[%c0_13, %c0_14, %c0_15], %31 {strides = array<i32>} : memref<1x16x128xbf16, #tpu.memory_space<vmem>>, vector<1x16x128xbf16>,
    return
  }
  func.func @transform_0(%arg0: i32, %arg1: i32) -> (i32, i32, i32) {
    %c0_i32 = arith.constant 0 : i32
    %c0_i32_0 = arith.constant 0 : i32
    %c0_i32_1 = arith.constant 0 : i32
    return %arg0, %c0_i32, %c0_i32_0 : i32, i32, i32
  }
  func.func @transform_1(%arg0: i32, %arg1: i32) -> (i32, i32) {
    %c0_i32 = arith.constant 0 : i32
    %c0_i32_0 = arith.constant 0 : i32
    return %c0_i32, %arg1 : i32, i32
  }
  func.func @transform_2(%arg0: i32, %arg1: i32) -> (i32, i32) {
    %c0_i32 = arith.constant 0 : i32
    %c0_i32_0 = arith.constant 0 : i32
    return %c0_i32, %arg1 : i32, i32
  }
  func.func @transform_3(%arg0: i32, %arg1: i32) -> (i32, i32, i32) {
    %c0_i32 = arith.constant 0 : i32
    %c0_i32_0 = arith.constant 0 : i32
    return %arg0, %c0_i32, %arg1 : i32, i32, i32
  }
}

module attributes {stable_mosaic.version = 11 : i64} {
  func.func @_conv_fused_kernel(%arg0: i32, %arg1: i32, %arg2: memref<1x4x1152xbf16, #tpu.memory_space<vmem>>, %arg3: memref<1152x128xbf16, #tpu.memory_space<vmem>>, %arg4: memref<1x128xf32, #tpu.memory_space<vmem>>, %arg5: memref<1x4x128xbf16, #tpu.memory_space<vmem>>) attributes {dimension_semantics = [#tpu.dimension_semantics<parallel>, #tpu.dimension_semantics<parallel>], iteration_bounds = array<i64: 2, 2>, scalar_prefetch = 0 : i64, scratch_operands = 0 : i64, tpu.core_type = #tpu.core_type<tc>, window_params = [{transform_indices = @transform_0, window_bounds = array<i64: 1, 4, 1152>}, {transform_indices = @transform_1, window_bounds = array<i64: 1152, 128>}, {transform_indices = @transform_2, window_bounds = array<i64: 1, 128>}, {transform_indices = @transform_3, window_bounds = array<i64: 1, 4, 128>}]} {
    %c0 = arith.constant 0 : index
    %c0_0 = arith.constant 0 : index
    %c0_1 = arith.constant 0 : index
    %0 = vector.load %arg2[%c0, %c0_0, %c0_1] : memref<1x4x1152xbf16, #tpu.memory_space<vmem>>, vector<1x4x1152xbf16>
    %1 = vector.shape_cast %0 : vector<1x4x1152xbf16> to vector<4x1152xbf16>
    %c0_2 = arith.constant 0 : index
    %c0_3 = arith.constant 0 : index
    %2 = vector.load %arg3[%c0_2, %c0_3] : memref<1152x128xbf16, #tpu.memory_space<vmem>>, vector<1152x128xbf16>
    %cst = arith.constant dense<0.000000e+00> : vector<4x128xf32>
    %3 = tpu.matmul %1, %2, %cst {dimension_numbers = #tpu.dot_dimension_numbers<[1], [0], [0], [1], [0, 0, 1, 1], [], []>} : vector<4x1152xbf16>, vector<1152x128xbf16>, vector<4x128xf32> -> vector<4x128xf32>
    %c0_4 = arith.constant 0 : index
    %c0_5 = arith.constant 0 : index
    %4 = vector.load %arg4[%c0_4, %c0_5] : memref<1x128xf32, #tpu.memory_space<vmem>>, vector<1x128xf32>
    %5 = vector.broadcast %4 : vector<1x128xf32> to vector<4x128xf32>
    %6 = arith.addf %3, %5 : vector<4x128xf32>
    %cst_6 = arith.constant dense<0.000000e+00> : vector<128xf32>
    %7 = vector.multi_reduction <add>, %6, %cst_6 [0] : vector<4x128xf32> to vector<128xf32>
    %8 = vector.shape_cast %7 : vector<128xf32> to vector<1x128xf32>
    %cst_7 = arith.constant 4.000000e+00 : f32
    %9 = vector.broadcast %cst_7 : f32 to vector<1x128xf32>
    %10 = arith.divf %8, %9 : vector<1x128xf32>
    %11 = vector.broadcast %10 : vector<1x128xf32> to vector<4x128xf32>
    %12 = arith.subf %6, %11 : vector<4x128xf32>
    %13 = arith.mulf %12, %12 : vector<4x128xf32>
    %cst_8 = arith.constant dense<0.000000e+00> : vector<128xf32>
    %14 = vector.multi_reduction <add>, %13, %cst_8 [0] : vector<4x128xf32> to vector<128xf32>
    %15 = vector.shape_cast %14 : vector<128xf32> to vector<1x128xf32>
    %cst_9 = arith.constant 4.000000e+00 : f32
    %16 = vector.broadcast %cst_9 : f32 to vector<1x128xf32>
    %17 = arith.divf %15, %16 : vector<1x128xf32>
    %cst_10 = arith.constant 9.99999974E-6 : f32
    %18 = vector.broadcast %cst_10 : f32 to vector<1x128xf32>
    %19 = arith.addf %17, %18 : vector<1x128xf32>
    %20 = math.rsqrt %19 : vector<1x128xf32>
    %21 = vector.broadcast %20 : vector<1x128xf32> to vector<4x128xf32>
    %22 = arith.mulf %12, %21 : vector<4x128xf32>
    %cst_11 = arith.constant 0.000000e+00 : f32
    %23 = vector.broadcast %cst_11 : f32 to vector<4x128xf32>
    %24 = arith.cmpf ogt, %22, %23 : vector<4x128xf32>
    %cst_12 = arith.constant 2.000000e-01 : f32
    %25 = vector.broadcast %cst_12 : f32 to vector<4x128xf32>
    %26 = arith.mulf %25, %22 : vector<4x128xf32>
    %27 = arith.select %24, %22, %26 : vector<4x128xi1>, vector<4x128xf32>
    %28 = arith.truncf %27 : vector<4x128xf32> to vector<4x128xbf16>
    %c0_13 = arith.constant 0 : index
    %c0_14 = arith.constant 0 : index
    %c0_15 = arith.constant 0 : index
    %29 = vector.load %arg5[%c0_13, %c0_14, %c0_15] : memref<1x4x128xbf16, #tpu.memory_space<vmem>>, vector<1x4x128xbf16>
    %30 = vector.shape_cast %29 : vector<1x4x128xbf16> to vector<4x128xbf16>
    %31 = vector.shape_cast %28 : vector<4x128xbf16> to vector<1x4x128xbf16>
    tpu.vector_store %arg5[%c0_13, %c0_14, %c0_15], %31 {strides = array<i32>} : memref<1x4x128xbf16, #tpu.memory_space<vmem>>, vector<1x4x128xbf16>,
    return
  }
  func.func @transform_0(%arg0: i32, %arg1: i32) -> (i32, i32, i32) {
    %c0_i32 = arith.constant 0 : i32
    %c0_i32_0 = arith.constant 0 : i32
    %c0_i32_1 = arith.constant 0 : i32
    return %arg0, %c0_i32, %c0_i32_0 : i32, i32, i32
  }
  func.func @transform_1(%arg0: i32, %arg1: i32) -> (i32, i32) {
    %c0_i32 = arith.constant 0 : i32
    %c0_i32_0 = arith.constant 0 : i32
    return %c0_i32, %arg1 : i32, i32
  }
  func.func @transform_2(%arg0: i32, %arg1: i32) -> (i32, i32) {
    %c0_i32 = arith.constant 0 : i32
    %c0_i32_0 = arith.constant 0 : i32
    return %c0_i32, %arg1 : i32, i32
  }
  func.func @transform_3(%arg0: i32, %arg1: i32) -> (i32, i32, i32) {
    %c0_i32 = arith.constant 0 : i32
    %c0_i32_0 = arith.constant 0 : i32
    return %arg0, %c0_i32, %arg1 : i32, i32, i32
  }
}

module attributes {stable_mosaic.version = 11 : i64} {
  func.func @_conv_fused_kernel(%arg0: i32, %arg1: i32, %arg2: memref<1x4x2304xbf16, #tpu.memory_space<vmem>>, %arg3: memref<2304x128xbf16, #tpu.memory_space<vmem>>, %arg4: memref<1x128xf32, #tpu.memory_space<vmem>>, %arg5: memref<1x4x128xbf16, #tpu.memory_space<vmem>>) attributes {dimension_semantics = [#tpu.dimension_semantics<parallel>, #tpu.dimension_semantics<parallel>], iteration_bounds = array<i64: 2, 4>, scalar_prefetch = 0 : i64, scratch_operands = 0 : i64, tpu.core_type = #tpu.core_type<tc>, window_params = [{transform_indices = @transform_0, window_bounds = array<i64: 1, 4, 2304>}, {transform_indices = @transform_1, window_bounds = array<i64: 2304, 128>}, {transform_indices = @transform_2, window_bounds = array<i64: 1, 128>}, {transform_indices = @transform_3, window_bounds = array<i64: 1, 4, 128>}]} {
    %c0 = arith.constant 0 : index
    %c0_0 = arith.constant 0 : index
    %c0_1 = arith.constant 0 : index
    %0 = vector.load %arg2[%c0, %c0_0, %c0_1] : memref<1x4x2304xbf16, #tpu.memory_space<vmem>>, vector<1x4x2304xbf16>
    %1 = vector.shape_cast %0 : vector<1x4x2304xbf16> to vector<4x2304xbf16>
    %c0_2 = arith.constant 0 : index
    %c0_3 = arith.constant 0 : index
    %2 = vector.load %arg3[%c0_2, %c0_3] : memref<2304x128xbf16, #tpu.memory_space<vmem>>, vector<2304x128xbf16>
    %cst = arith.constant dense<0.000000e+00> : vector<4x128xf32>
    %3 = tpu.matmul %1, %2, %cst {dimension_numbers = #tpu.dot_dimension_numbers<[1], [0], [0], [1], [0, 0, 1, 1], [], []>} : vector<4x2304xbf16>, vector<2304x128xbf16>, vector<4x128xf32> -> vector<4x128xf32>
    %c0_4 = arith.constant 0 : index
    %c0_5 = arith.constant 0 : index
    %4 = vector.load %arg4[%c0_4, %c0_5] : memref<1x128xf32, #tpu.memory_space<vmem>>, vector<1x128xf32>
    %5 = vector.broadcast %4 : vector<1x128xf32> to vector<4x128xf32>
    %6 = arith.addf %3, %5 : vector<4x128xf32>
    %cst_6 = arith.constant dense<0.000000e+00> : vector<128xf32>
    %7 = vector.multi_reduction <add>, %6, %cst_6 [0] : vector<4x128xf32> to vector<128xf32>
    %8 = vector.shape_cast %7 : vector<128xf32> to vector<1x128xf32>
    %cst_7 = arith.constant 4.000000e+00 : f32
    %9 = vector.broadcast %cst_7 : f32 to vector<1x128xf32>
    %10 = arith.divf %8, %9 : vector<1x128xf32>
    %11 = vector.broadcast %10 : vector<1x128xf32> to vector<4x128xf32>
    %12 = arith.subf %6, %11 : vector<4x128xf32>
    %13 = arith.mulf %12, %12 : vector<4x128xf32>
    %cst_8 = arith.constant dense<0.000000e+00> : vector<128xf32>
    %14 = vector.multi_reduction <add>, %13, %cst_8 [0] : vector<4x128xf32> to vector<128xf32>
    %15 = vector.shape_cast %14 : vector<128xf32> to vector<1x128xf32>
    %cst_9 = arith.constant 4.000000e+00 : f32
    %16 = vector.broadcast %cst_9 : f32 to vector<1x128xf32>
    %17 = arith.divf %15, %16 : vector<1x128xf32>
    %cst_10 = arith.constant 9.99999974E-6 : f32
    %18 = vector.broadcast %cst_10 : f32 to vector<1x128xf32>
    %19 = arith.addf %17, %18 : vector<1x128xf32>
    %20 = math.rsqrt %19 : vector<1x128xf32>
    %21 = vector.broadcast %20 : vector<1x128xf32> to vector<4x128xf32>
    %22 = arith.mulf %12, %21 : vector<4x128xf32>
    %cst_11 = arith.constant 0.000000e+00 : f32
    %23 = vector.broadcast %cst_11 : f32 to vector<4x128xf32>
    %24 = arith.cmpf ogt, %22, %23 : vector<4x128xf32>
    %cst_12 = arith.constant 2.000000e-01 : f32
    %25 = vector.broadcast %cst_12 : f32 to vector<4x128xf32>
    %26 = arith.mulf %25, %22 : vector<4x128xf32>
    %27 = arith.select %24, %22, %26 : vector<4x128xi1>, vector<4x128xf32>
    %28 = arith.truncf %27 : vector<4x128xf32> to vector<4x128xbf16>
    %c0_13 = arith.constant 0 : index
    %c0_14 = arith.constant 0 : index
    %c0_15 = arith.constant 0 : index
    %29 = vector.load %arg5[%c0_13, %c0_14, %c0_15] : memref<1x4x128xbf16, #tpu.memory_space<vmem>>, vector<1x4x128xbf16>
    %30 = vector.shape_cast %29 : vector<1x4x128xbf16> to vector<4x128xbf16>
    %31 = vector.shape_cast %28 : vector<4x128xbf16> to vector<1x4x128xbf16>
    tpu.vector_store %arg5[%c0_13, %c0_14, %c0_15], %31 {strides = array<i32>} : memref<1x4x128xbf16, #tpu.memory_space<vmem>>, vector<1x4x128xbf16>,
    return
  }
  func.func @transform_0(%arg0: i32, %arg1: i32) -> (i32, i32, i32) {
    %c0_i32 = arith.constant 0 : i32
    %c0_i32_0 = arith.constant 0 : i32
    %c0_i32_1 = arith.constant 0 : i32
    return %arg0, %c0_i32, %c0_i32_0 : i32, i32, i32
  }
  func.func @transform_1(%arg0: i32, %arg1: i32) -> (i32, i32) {
    %c0_i32 = arith.constant 0 : i32
    %c0_i32_0 = arith.constant 0 : i32
    return %c0_i32, %arg1 : i32, i32
  }
  func.func @transform_2(%arg0: i32, %arg1: i32) -> (i32, i32) {
    %c0_i32 = arith.constant 0 : i32
    %c0_i32_0 = arith.constant 0 : i32
    return %c0_i32, %arg1 : i32, i32
  }
  func.func @transform_3(%arg0: i32, %arg1: i32) -> (i32, i32, i32) {
    %c0_i32 = arith.constant 0 : i32
    %c0_i32_0 = arith.constant 0 : i32
    return %arg0, %c0_i32, %arg1 : i32, i32, i32
  }
}

module attributes {stable_mosaic.version = 11 : i64} {
  func.func @_conv_fused_kernel(%arg0: i32, %arg1: i32, %arg2: memref<1x4x4608xbf16, #tpu.memory_space<vmem>>, %arg3: memref<4608x1xbf16, #tpu.memory_space<vmem>>, %arg4: memref<1x1xf32, #tpu.memory_space<vmem>>, %arg5: memref<1x4x1xf32, #tpu.memory_space<vmem>>) attributes {dimension_semantics = [#tpu.dimension_semantics<parallel>, #tpu.dimension_semantics<parallel>], iteration_bounds = array<i64: 2, 1>, scalar_prefetch = 0 : i64, scratch_operands = 0 : i64, tpu.core_type = #tpu.core_type<tc>, window_params = [{transform_indices = @transform_0, window_bounds = array<i64: 1, 4, 4608>}, {transform_indices = @transform_1, window_bounds = array<i64: 4608, 1>}, {transform_indices = @transform_2, window_bounds = array<i64: 1, 1>}, {transform_indices = @transform_3, window_bounds = array<i64: 1, 4, 1>}]} {
    %c0 = arith.constant 0 : index
    %c0_0 = arith.constant 0 : index
    %c0_1 = arith.constant 0 : index
    %0 = vector.load %arg2[%c0, %c0_0, %c0_1] : memref<1x4x4608xbf16, #tpu.memory_space<vmem>>, vector<1x4x4608xbf16>
    %1 = vector.shape_cast %0 : vector<1x4x4608xbf16> to vector<4x4608xbf16>
    %c0_2 = arith.constant 0 : index
    %c0_3 = arith.constant 0 : index
    %2 = vector.load %arg3[%c0_2, %c0_3] : memref<4608x1xbf16, #tpu.memory_space<vmem>>, vector<4608x1xbf16>
    %cst = arith.constant dense<0.000000e+00> : vector<4x1xf32>
    %3 = tpu.matmul %1, %2, %cst {dimension_numbers = #tpu.dot_dimension_numbers<[1], [0], [0], [1], [0, 0, 1, 1], [], []>} : vector<4x4608xbf16>, vector<4608x1xbf16>, vector<4x1xf32> -> vector<4x1xf32>
    %c0_4 = arith.constant 0 : index
    %c0_5 = arith.constant 0 : index
    %4 = vector.load %arg4[%c0_4, %c0_5] : memref<1x1xf32, #tpu.memory_space<vmem>>, vector<1x1xf32>
    %5 = vector.broadcast %4 : vector<1x1xf32> to vector<4x1xf32>
    %6 = arith.addf %3, %5 : vector<4x1xf32>
    %c0_6 = arith.constant 0 : index
    %c0_7 = arith.constant 0 : index
    %c0_8 = arith.constant 0 : index
    %7 = vector.load %arg5[%c0_6, %c0_7, %c0_8] : memref<1x4x1xf32, #tpu.memory_space<vmem>>, vector<1x4x1xf32>
    %8 = vector.shape_cast %7 : vector<1x4x1xf32> to vector<4x1xf32>
    %9 = vector.shape_cast %6 : vector<4x1xf32> to vector<1x4x1xf32>
    tpu.vector_store %arg5[%c0_6, %c0_7, %c0_8], %9 {strides = array<i32>} : memref<1x4x1xf32, #tpu.memory_space<vmem>>, vector<1x4x1xf32>,
    return
  }
  func.func @transform_0(%arg0: i32, %arg1: i32) -> (i32, i32, i32) {
    %c0_i32 = arith.constant 0 : i32
    %c0_i32_0 = arith.constant 0 : i32
    %c0_i32_1 = arith.constant 0 : i32
    return %arg0, %c0_i32, %c0_i32_0 : i32, i32, i32
  }
  func.func @transform_1(%arg0: i32, %arg1: i32) -> (i32, i32) {
    %c0_i32 = arith.constant 0 : i32
    %c0_i32_0 = arith.constant 0 : i32
    return %c0_i32, %arg1 : i32, i32
  }
  func.func @transform_2(%arg0: i32, %arg1: i32) -> (i32, i32) {
    %c0_i32 = arith.constant 0 : i32
    %c0_i32_0 = arith.constant 0 : i32
    return %c0_i32, %arg1 : i32, i32
  }
  func.func @transform_3(%arg0: i32, %arg1: i32) -> (i32, i32, i32) {
    %c0_i32 = arith.constant 0 : i32
    %c0_i32_0 = arith.constant 0 : i32
    return %arg0, %c0_i32, %arg1 : i32, i32, i32
  }
}

</mosaic_0001>

<bundles_post_ra>
// kernel: discriminator_forward.5
= control target key start
LH: loop header
LB: loop body
LE: loop exit
PB: predicated region body
PF: predicated region fallthrough
CT: control target
= control target key end

     0   :  { %8 = vsyncpa [#allocation3], 0  ;;  %s719_s12 = smov 0   ;;  %s721_s13 = smov 0   ;;  %s809_s0 = inlined_call_operand.vmem [shape: bf16[2,64,27], index: 0, kind: input, shape index: {}]   ;;  %s810_s1 = inlined_call_operand.vmem [shape: bf16[27,64], index: 1, kind: input, shape index: {}]   ;;  %s811_s2 = inlined_call_operand.hbm [shape: f32[1,64], index: 2, kind: input, shape index: {}]   ;;  %s812_s3 = inlined_call_operand.vmem [shape: bf16[2,64,64], index: 3, kind: output, shape index: {}]  }
   0x1   :  { %s723_s14 = smov 0  }
   0x2 LB: > { %s536_s15 = sadd.s32 4294967295, %s695_s14   ;;  %s26_s16 = sadd.s32 1, %s691_s13  ;;  %s695_s14 = sphi %s723_s14, %s14_s14   ;;  %s691_s13 = sphi %s721_s13, %s816_s13   ;;  %s687_s12 = sphi %s719_s12, %s815_s12  }
   0x3   : > { %p28_p0 = scmp.ge.s32.totalorder %s26_s16, 2  ;;  %p538_p1 = scmp.ge.s32.totalorder %s695_s14, 1 }
   0x4   : > { %p137_p2 = scmp.lt.s32.totalorder %s695_s14, 3  ;;  %p744_p4 = scmp.eq.s32.totalorder %s536_s15, 0 }
   0x5   : > { %s818_s16 = smov (%p28_p0, %s26_s16), 0  ;;  %s697_s19 = smov [#allocation2]  }
   0x6   : > { %p740_p3 = pnand %p538_p1, %p137_p2  ;;  %s159_s20 = sshll.u32 %s697_s19, 4  ;;  %s160_s20 = int_to_ptr.vmem [resolvable:$true] %s159_s20 }
   0x7   : > { %s654_s21 = scalar_lea.vmem %s160_s20, 16  ;;  %s661_s22 = scalar_lea.vmem %s160_s20, 32 }
   0x8   : > { %p605_p5 = pneg %p740_p3  ;;  %p655_p8 = scmp.ne.s32.totalorder %s160_s20, %s654_s21 }
   0x9   : > { %p662_p11 = scmp.lt.s32.totalorder %s160_s20, %s160_s20  ;;  %p663_p12 = scmp.lt.s32.totalorder %s661_s22, %s654_s21 }
   0xa   : > { %p606_p6 = pnand %p744_p4, %p605_p5 }
   0xb   : > { %p664_p13 = por %p663_p12, %p662_p11 }
   0xc   : > { %p645_p7 = pneg %p606_p6 }
   0xe   : > { %p657_p9 = pnand %p655_p8, %p645_p7 }
  0x10   : > { %p658_p10 = pneg %p657_p9 }
  0x12   : > { %p665_p0 = pnand %p664_p13, %p658_p10 }
  0x14   : > { %668 = shalt.err (!%p665_p0)
}
  0x15   : > { %608 = dma.hbm_to_vmem [thread:$0]  (!%p606_p6), %s811_s2, 16, %s160_s20, [#allocation3]  }
  0x16   : > { %180 = sbr.rel (%p740_p3) target bundleno = 250 (0xfa), region = 32 }
  0x1b   : > { %682 = dma.done.wait (%p744_p4), [#allocation3], 16  }
  0x1c   : > { %684 = vsyncadd (%p744_p4), [#allocation3], 4294967280  ;;  %vm292_vm0 = vcmask 1044480   ;;  %p211_p1 = scmp.lt.s32.totalorder %s687_s12, 1  ;;  %vm293_vm1 = vcmask 1045504   ;;  %v698_v0 = vmov 65535  }
  0x1d   : > { %v294_v1 = vsel %vm292_vm0, 4294967295, %v698_v0  ;;  %v637_v3 = vld [vmem:[%s810_s1 + $0x8] sm:$0x3f]   ;;  %v638_v4 = vld [vmem:[%s810_s1] sm:$0xff]   ;;  %vm279_vm2 = vcmask 220160   ;;  %vm420_vm5 = vcmask 519168  }
  0x1e   : > { %s820_s12 = smov (!%p211_p1, %s687_s12), 1  ;;  %v295_v2 = vsel %vm293_vm1, %v294_v1, 0  ;;  %v548_v10 = vld [vmem:[#allocation2] ss:$0 sm:$0xff] }
  0x1f   : > { %s569_s25 = sshll.u32 %s820_s12, 5  ;;  %v297_v5 = vand.u32 %v637_v3, %v295_v2 }
  0x20   : > { %s215_s28 = scalar_lea.vmem %s809_s0, %s569_s25  ;;  %s782_s8 = scalar_lea.vmem %s812_s3, %s569_s25 }
  0x21   : > { %v639_v6 = vld [vmem:[%s215_s28] sm:$0xff]   ;;  %v640_v7 = vld [vmem:[%s215_s28 + $0x10] sm:$0xff]   ;;  %585 = vmatprep.subr.bf16.mxu0 %v297_v5  ;;  %597 = vmatprep.subr.bf16.mxu1 %v297_v5  ;;  %v641_v8 = vld [vmem:[%s215_s28 + $0x8] sm:$0xff]  }
  0x22   : > { %586 = vmatpush3.bf16.msra.mxu0 %v297_v5  ;;  %599 = vmatpush3.bf16.msra.mxu1 %v297_v5  ;;  %v642_v9 = vld [vmem:[%s215_s28 + $0x18] sm:$0xff]  }
  0x23   : > { %587 = vmatprep.subr.bf16.mxu0 %v638_v4  ;;  %598 = vmatprep.subr.bf16.mxu1 %v638_v4 }
  0x24   : > { %589 = vmatprep.mubr.msk.bf16.mxu0 %vm279_vm2, %v639_v6  ;;  %593 = vmatprep.mubr.msk.bf16.mxu1 %vm279_vm2, %v640_v7 }
  0x26   : > { %588 = vmatpush3.bf16.msra.mxu0 %v638_v4  ;;  %600 = vmatpush3.bf16.msra.mxu1 %v638_v4 }
  0x29   : > { %590 = vmatmul.mubr.msk.bf16.vlgmr.msra.gmra.mxu0 %vm279_vm2, %v641_v8  ;;  %594 = vmatmul.mubr.msk.bf16.vlgmr.msra.gmra.mxu1 %vm279_vm2, %v642_v9 }
  0xe9   : > { %v591_v11 = vpop.f32.mrf.mxu0  ;;  %v595_v12 = vpop.f32.mrf.mxu1 }
  0xea   : > { %v342_v13 = vadd.f32 %v591_v11, %v548_v10  ;;  %v358_v14 = vadd.f32 %v595_v12, %v548_v10 }
  0xeb   : > { %v333_v15 = vpop.f32.mrf.mxu0  ;;  %v349_v16 = vpop.f32.mrf.mxu1 }
  0xec   : > { %vm366_vm3 = vcmp.gt.f32.partialorder %v342_v13, 0.0  ;;  %v374_v17 = vmul.f32 0.2, %v342_v13  ;;  %vm370_vm4 = vcmp.gt.f32.partialorder %v358_v14, 0.0  ;;  %v378_v18 = vmul.f32 0.2, %v358_v14 }
  0xed   : > { %v334_v19 = vadd.f32 %v548_v10, %v333_v15  ;;  %v350_v20 = vadd.f32 %v548_v10, %v349_v16  ;;  %v592_v21 = vpop.f32.mrf.mxu0  ;;  %v596_v22 = vpop.f32.mrf.mxu1 }
  0xee   : > { %v382_v23 = vsel %vm366_vm3, %v342_v13, %v374_v17  ;;  %v386_v24 = vsel %vm370_vm4, %v358_v14, %v378_v18  ;;  %v345_v25 = vadd.f32 %v592_v21, %v548_v10  ;;  %v361_v26 = vadd.f32 %v596_v22, %v548_v10 }
  0xef   : > { %v573_v27 = vpack.c.bf16 %v382_v23, %v382_v23  ;;  %v577_v28 = vpack.c.bf16 %v386_v24, %v386_v24  ;;  %vm364_vm6 = vcmp.gt.f32.partialorder %v334_v19, 0.0  ;;  %v372_v29 = vmul.f32 0.2, %v334_v19  ;;  %v336_v30 = vpop.f32.mrf.mxu0  ;;  %v352_v31 = vpop.f32.mrf.mxu1 }
  0xf0   : > { %vm368_vm7 = vcmp.gt.f32.partialorder %v350_v20, 0.0  ;;  %v376_v32 = vmul.f32 0.2, %v350_v20  ;;  %vm367_vm8 = vcmp.gt.f32.partialorder %v345_v25, 0.0  ;;  %v375_v33 = vmul.f32 0.2, %v345_v25 }
  0xf1   : > { %423 = vst.msk [vmem:[%s782_s8 + $0x8] sm:$0xf] %vm420_vm5, %v573_v27  ;;  %427 = vst.msk [vmem:[%s782_s8 + $0x18] sm:$0xf] %vm420_vm5, %v577_v28  ;;  %v380_v34 = vsel %vm364_vm6, %v334_v19, %v372_v29  ;;  %vm371_vm9 = vcmp.gt.f32.partialorder %v361_v26, 0.0  ;;  %v337_v36 = vadd.f32 %v548_v10, %v336_v30  ;;  %v353_v40 = vadd.f32 %v548_v10, %v352_v31 }
  0xf2   : > { %v379_v35 = vmul.f32 0.2, %v361_v26  ;;  %v571_v37 = vpack.c.bf16 %v380_v34, %v380_v34  ;;  %v384_v38 = vsel %vm368_vm7, %v350_v20, %v376_v32  ;;  %v383_v39 = vsel %vm367_vm8, %v345_v25, %v375_v33 }
  0xf3   : > { %v575_v41 = vpack.c.bf16 %v384_v38, %v384_v38  ;;  %v574_v42 = vpack.c.bf16 %v383_v39, %v383_v39  ;;  %vm365_vm10 = vcmp.gt.f32.partialorder %v337_v36, 0.0  ;;  %v373_v45 = vmul.f32 0.2, %v337_v36 }
  0xf4   : > { %v387_v43 = vsel %vm371_vm9, %v361_v26, %v379_v35  ;;  %421 = vst.msk [vmem:[%s782_s8] sm:$0xf] %vm420_vm5, %v571_v37  ;;  %vm369_vm11 = vcmp.gt.f32.partialorder %v353_v40, 0.0  ;;  %v377_v46 = vmul.f32 0.2, %v353_v40 }
  0xf5   : > { %v578_v44 = vpack.c.bf16 %v387_v43, %v387_v43  ;;  %425 = vst.msk [vmem:[%s782_s8 + $0x10] sm:$0xf] %vm420_vm5, %v575_v41  ;;  %424 = vst.msk [vmem:[%s782_s8 + $0xc] sm:$0xf] %vm420_vm5, %v574_v42  ;;  %v381_v47 = vsel %vm365_vm10, %v337_v36, %v373_v45 }
  0xf6   : > { %v385_v48 = vsel %vm369_vm11, %v353_v40, %v377_v46  ;;  %v572_v49 = vpack.c.bf16 %v381_v47, %v381_v47 }
  0xf7   : > { %428 = vst.msk [vmem:[%s782_s8 + $0x1c] sm:$0xf] %vm420_vm5, %v578_v44  ;;  %v576_v50 = vpack.c.bf16 %v385_v48, %v385_v48 }
  0xf8   : > { %422 = vst.msk [vmem:[%s782_s8 + $0x4] sm:$0xf] %vm420_vm5, %v572_v49 }
  0xf9   : > { %426 = vst.msk [vmem:[%s782_s8 + $0x14] sm:$0xf] %vm420_vm5, %v576_v50 }
  0xfa PF: > { %s14_s14 = sadd.s32 1, %s695_s14   ;;  %s815_s12 = smov %s691_s13 }
  0xfb   : > { %p11_p2 = scmp.ge.s32.totalorder %s14_s14, 4   ;;  %s816_s13 = smov %s818_s16 }
  0xfd   :  { %13 = sbr.rel (!%p11_p2) target bundleno = 2 (0x2), region = 71 }
 0x102   :  { %456 = vsyncpa [#allocation3], 1 }
 0x103   :  { %458 = vsyncpa [#allocation3 + $0x1], 1 }

// kernel: discriminator_forward.6
= control target key start
LH: loop header
LB: loop body
LE: loop exit
PB: predicated region body
PF: predicated region fallthrough
CT: control target
= control target key end

     0   :  { %8 = vsyncpa [#allocation3], 0  ;;  %s1117_s12 = smov 0   ;;  %s1119_s13 = smov 0   ;;  %s1295_s0 = inlined_call_operand.vmem [shape: bf16[2,16,576], index: 0, kind: input, shape index: {}]   ;;  %s1296_s1 = inlined_call_operand.vmem [shape: bf16[576,128], index: 1, kind: input, shape index: {}]   ;;  %s1297_s2 = inlined_call_operand.hbm [shape: f32[1,128], index: 2, kind: input, shape index: {}]   ;;  %s1298_s3 = inlined_call_operand.vmem [shape: bf16[2,16,128], index: 3, kind: output, shape index: {}]  }
   0x1   :  { %s1121_s14 = smov 0  }
   0x2 LB: > { %s830_s15 = sadd.s32 4294967295, %s1092_s14   ;;  %s26_s16 = sadd.s32 1, %s1088_s13  ;;  %s1092_s14 = sphi %s1121_s14, %s14_s14   ;;  %s1088_s13 = sphi %s1119_s13, %s1302_s13   ;;  %s1084_s12 = sphi %s1117_s12, %s1301_s12  }
   0x3   : > { %p28_p0 = scmp.ge.s32.totalorder %s26_s16, 2  ;;  %p832_p1 = scmp.ge.s32.totalorder %s1092_s14, 1 }
   0x4   : > { %p137_p2 = scmp.lt.s32.totalorder %s1092_s14, 3  ;;  %p1142_p4 = scmp.eq.s32.totalorder %s830_s15, 0 }
   0x5   : > { %s1304_s16 = smov (%p28_p0, %s26_s16), 0  ;;  %s1094_s19 = smov [#allocation2]  }
   0x6   : > { %p1138_p3 = pnand %p832_p1, %p137_p2  ;;  %s159_s20 = sshll.u32 %s1094_s19, 4  ;;  %s160_s20 = int_to_ptr.vmem [resolvable:$true] %s159_s20 }
   0x7   : > { %s1051_s21 = scalar_lea.vmem %s160_s20, 16  ;;  %s1058_s22 = scalar_lea.vmem %s160_s20, 32 }
   0x8   : > { %p962_p5 = pneg %p1138_p3  ;;  %p1052_p8 = scmp.ne.s32.totalorder %s160_s20, %s1051_s21 }
   0x9   : > { %p1059_p11 = scmp.lt.s32.totalorder %s160_s20, %s160_s20  ;;  %p1060_p12 = scmp.lt.s32.totalorder %s1058_s22, %s1051_s21 }
   0xa   : > { %p963_p6 = pnand %p1142_p4, %p962_p5 }
   0xb   : > { %p1061_p13 = por %p1060_p12, %p1059_p11 }
   0xc   : > { %p1042_p7 = pneg %p963_p6 }
   0xe   : > { %p1054_p9 = pnand %p1052_p8, %p1042_p7 }
  0x10   : > { %p1055_p10 = pneg %p1054_p9 }
  0x12   : > { %p1062_p0 = pnand %p1061_p13, %p1055_p10 }
  0x14   : > { %1065 = shalt.err (!%p1062_p0)
}
  0x15   : > { %965 = dma.hbm_to_vmem [thread:$0]  (!%p963_p6), %s1297_s2, 16, %s160_s20, [#allocation3]  }
  0x16   : > { %180 = sbr.rel (%p1138_p3) target bundleno = 336 (0x150), region = 32 }
  0x1b   : > { %1079 = dma.done.wait (%p1142_p4), [#allocation3], 16  }
  0x1c   : > { %1081 = vsyncadd (%p1142_p4), [#allocation3], 4294967280  ;;  %v995_v0 = vld [vmem:[%s1296_s1 + $0x78] sm:$0xff]   ;;  %v999_v4 = vld [vmem:[%s1296_s1 + $0x70] sm:$0xff]   ;;  %p211_p1 = scmp.lt.s32.totalorder %s1084_s12, 1  ;;  %v1095_v33 = vmov 0.0  }
  0x1d   : > { %v996_v1 = vld [vmem:[%s1296_s1 + $0x38] sm:$0xff]   ;;  %896 = vmatprep.subr.bf16.mxu0 %v995_v0  ;;  %v1000_v5 = vld [vmem:[%s1296_s1 + $0x30] sm:$0xff]   ;;  %v1003_v8 = vld [vmem:[%s1296_s1 + $0x68] sm:$0xff]   ;;  %vm1096_vm0 = vmmov 0   ;;  %vm555_vm1 = vcmask 523264  }
  0x1e   : > { %v997_v2 = vld [vmem:[%s1296_s1 + $0xf8] sm:$0xff]   ;;  %897 = vmatpush3.bf16.msra.mxu0 %v996_v1  ;;  %v1001_v6 = vld [vmem:[%s1296_s1 + $0xf0] sm:$0xff]   ;;  %v1004_v9 = vld [vmem:[%s1296_s1 + $0x28] sm:$0xff]   ;;  %s1306_s12 = smov (!%p211_p1, %s1084_s12), 1 }
  0x1f   : > { %v998_v3 = vld [vmem:[%s1296_s1 + $0xb8] sm:$0xff]   ;;  %918 = vmatprep.subr.bf16.mxu1 %v997_v2  ;;  %898 = vmatprep.subr.bf16.mxu0 %v999_v4  ;;  %v1002_v7 = vld [vmem:[%s1296_s1 + $0xb0] sm:$0xff]   ;;  %v1005_v10 = vld [vmem:[%s1296_s1 + $0xe8] sm:$0xff]   ;;  %s957_s29 = smul.u32 40, %s1306_s12  ;;  %s888_s5 = sshll.u32 %s1306_s12, 3 }
  0x20   : > { %919 = vmatpush3.bf16.msra.mxu1 %v998_v3  ;;  %v1006_v11 = vld [vmem:[%s1296_s1 + $0xa8] sm:$0xff]   ;;  %v1007_v12 = vld [vmem:[%s1296_s1 + $0x60] sm:$0xff]   ;;  %v1011_v16 = vld [vmem:[%s1296_s1 + $0x58] sm:$0xff]   ;;  %s227_s8 = scalar_lea.vmem %s1298_s3, %s888_s5 }
  0x21   : > { %920 = vmatprep.subr.bf16.mxu1 %v1001_v6  ;;  %v1008_v13 = vld [vmem:[%s1296_s1 + $0x20] sm:$0xff]   ;;  %v1012_v17 = vld [vmem:[%s1296_s1 + $0x18] sm:$0xff]   ;;  %v1015_v20 = vld [vmem:[%s1296_s1 + $0x50] sm:$0xff]   ;;  %s1254_s17 = scalar_lea.vmem %s1295_s0, %s957_s29 }
  0x22   : > { %899 = vmatpush3.bf16.msra.mxu0 %v1000_v5  ;;  %v1009_v14 = vld [vmem:[%s1296_s1 + $0xe0] sm:$0xff]   ;;  %v1013_v18 = vld [vmem:[%s1296_s1 + $0xd8] sm:$0xff]   ;;  %v1016_v21 = vld [vmem:[%s1296_s1 + $0x10] sm:$0xff]  }
  0x23   : > { %900 = vmatprep.subr.bf16.mxu0 %v1003_v8  ;;  %v1010_v15 = vld [vmem:[%s1296_s1 + $0xa0] sm:$0xff]   ;;  %v1014_v19 = vld [vmem:[%s1296_s1 + $0x98] sm:$0xff]   ;;  %v1017_v22 = vld [vmem:[%s1296_s1 + $0xd0] sm:$0xff]  }
  0x24   : > { %921 = vmatpush3.bf16.msra.mxu1 %v1002_v7  ;;  %v1018_v23 = vld [vmem:[%s1296_s1 + $0x90] sm:$0xff]   ;;  %v1019_v24 = vld [vmem:[%s1296_s1 + $0x48] sm:$0xff]   ;;  %v1023_v28 = vld [vmem:[%s1296_s1 + $0x40] sm:$0xff]  }
  0x25   : > { %922 = vmatprep.subr.bf16.mxu1 %v1005_v10  ;;  %v1020_v25 = vld [vmem:[%s1296_s1 + $0x8] sm:$0xff]   ;;  %v1024_v29 = vld [vmem:[%s1296_s1] sm:$0xff]   ;;  %v1033_v37 = vld [vmem:[%s1296_s1 + $0x118] sm:$0xff]  }
  0x26   : > { %901 = vmatpush3.bf16.msra.mxu0 %v1004_v9  ;;  %v1021_v26 = vld [vmem:[%s1296_s1 + $0xc8] sm:$0xff]   ;;  %v1025_v30 = vld [vmem:[%s1296_s1 + $0xc0] sm:$0xff]   ;;  %v1034_v38 = vld [vmem:[%s1296_s1 + $0x110] sm:$0xff]  }
  0x27   : > { %902 = vmatprep.subr.bf16.mxu0 %v1007_v12  ;;  %v1022_v27 = vld [vmem:[%s1296_s1 + $0x88] sm:$0xff]   ;;  %v1026_v31 = vld [vmem:[%s1254_s17] ss:$20 sps:$4 sm:$0xff]   ;;  %v1028_v32 = vld [vmem:[%s1254_s17 + $0x4] ss:$20 sps:$4 sm:$0xff]  }
  0x28   : > { %923 = vmatpush3.bf16.msra.mxu1 %v1006_v11  ;;  %v1029_v34 = vld [vmem:[%s1296_s1 + $0x80] sm:$0xff]   ;;  %591 = vmatprep.mubr.bf16.mxu0 %v1028_v32  ;;  %v1030_v35 = vld [vmem:[%s1254_s17 + $0x8] ss:$20 sps:$4 sm:$0xff]  }
  0x29   : > { %924 = vmatprep.subr.bf16.mxu1 %v1009_v14  ;;  %v1032_v36 = vld [vmem:[%s1254_s17 + $0xc] ss:$20 sps:$4 sm:$0xff]   ;;  %v1037_v41 = vld [vmem:[%s1254_s17 + $0x10] ss:$20 sps:$4 sm:$0xff]  }
  0x2a   : > { %903 = vmatpush3.bf16.msra.mxu0 %v1008_v13  ;;  %632 = vmatprep.mubr.bf16.mxu1 %v1032_v36  ;;  %v1035_v39 = vld [vmem:[%s1296_s1 + $0x108] sm:$0xff]   ;;  %v1036_v40 = vld [vmem:[%s1296_s1 + $0x100] sm:$0xff]  }
  0x2b   : > { %904 = vmatprep.subr.bf16.mxu0 %v1011_v16  ;;  %v841_v51 = vld [vmem:[#allocation2] ss:$0 sm:$0xff] }
  0x2c   : > { %925 = vmatpush3.bf16.msra.mxu1 %v1010_v15 }
  0x2d   : > { %926 = vmatprep.subr.bf16.mxu1 %v1013_v18 }
  0x2e   : > { %905 = vmatpush3.bf16.msra.mxu0 %v1012_v17 }
  0x2f   : > { %906 = vmatprep.subr.bf16.mxu0 %v1015_v20 }
  0x30   : > { %927 = vmatpush3.bf16.msra.mxu1 %v1014_v19 }
  0x31   : > { %928 = vmatprep.subr.bf16.mxu1 %v1017_v22 }
  0x32   : > { %907 = vmatpush3.bf16.msra.mxu0 %v1016_v21 }
  0x33   : > { %908 = vmatprep.subr.bf16.mxu0 %v1019_v24 }
  0x34   : > { %929 = vmatpush3.bf16.msra.mxu1 %v1018_v23 }
  0x35   : > { %930 = vmatprep.subr.bf16.mxu1 %v1021_v26 }
  0x36   : > { %909 = vmatpush3.bf16.msra.mxu0 %v1020_v25 }
  0x37   : > { %910 = vmatprep.subr.bf16.mxu0 %v1023_v28 }
  0x38   : > { %931 = vmatpush3.bf16.msra.mxu1 %v1022_v27 }
  0x39   : > { %932 = vmatprep.subr.bf16.mxu1 %v1025_v30 }
  0x3a   : > { %911 = vmatpush3.bf16.msra.mxu0 %v1024_v29 }
  0x3b   : > { %945 = vmatprep.subr.bf16.mxu0 %v1095_v33 }
  0x3c   : > { %933 = vmatpush3.bf16.msra.mxu1 %v1029_v34 }
  0x3d   : > { %592 = vmatmul.mubr.bf16.vlgmr.msra.gmra.mxu0 %v1026_v31 }
  0x3e   : > { %953 = vmatprep.mubr.msk.bf16.mxu0 %vm1096_vm0, %v1095_v33  ;;  %946 = vmatpush3.bf16.msra.mxu0 %v1033_v37 }
  0x3f   : > { %633 = vmatmul.mubr.bf16.vlgmr.msra.gmra.mxu1 %v1030_v35  ;;  %947 = vmatprep.subr.bf16.mxu0 %v1095_v33 }
  0x42   : > { %948 = vmatpush3.bf16.msra.mxu0 %v1034_v38 }
  0x43   : > { %949 = vmatprep.subr.bf16.mxu0 %v1095_v33 }
  0x46   : > { %950 = vmatpush3.bf16.msra.mxu0 %v1035_v39 }
  0x47   : > { %951 = vmatprep.subr.bf16.mxu0 %v1095_v33 }
  0x4a   : > { %952 = vmatpush3.bf16.msra.mxu0 %v1036_v40 }
  0x4d   : > { %954 = vmatmul.mubr.msk.bf16.vlgmr.msra.gmra.mxu0 %vm555_vm1, %v1037_v41 }
  0xfd   : > { %v912_v42 = vpop.f32.mrf.mxu0 }
  0xff   : > { %v913_v43 = vpop.f32.mrf.mxu0  ;;  %v934_v44 = vpop.f32.mrf.mxu1 }
 0x100   : > { %v914_v49 = vadd.f32 %v913_v43, %v912_v42 }
 0x101   : > { %v915_v45 = vpop.f32.mrf.mxu0  ;;  %v935_v46 = vpop.f32.mrf.mxu1 }
 0x102   : > { %v594_v53 = vadd.f32 %v914_v49, %v841_v51  ;;  %v936_v54 = vadd.f32 %v935_v46, %v934_v44 }
 0x103   : > { %v916_v47 = vpop.f32.mrf.mxu0  ;;  %v937_v48 = vpop.f32.mrf.mxu1 }
 0x104   : > { %v917_v50 = vadd.f32 %v916_v47, %v915_v45  ;;  %v635_v59 = vadd.f32 %v936_v54, %v594_v53 }
 0x105   : > { %v938_v52 = vpop.f32.mrf.mxu1 }
 0x106   : > { %v597_v55 = vadd.f32 %v917_v50, %v841_v51  ;;  %v939_v56 = vadd.f32 %v938_v52, %v937_v48 }
 0x108   : > { %v638_v60 = vadd.f32 %v939_v56, %v597_v55 }
 0x10d   : > { %v675_v57 = vpop.f32.mrf.mxu0 }
 0x10e   : > { %v676_v62 = vadd.f32 %v675_v57, %v635_v59 }
 0x10f   : > { %v955_v58 = vpop.f32.mrf.mxu0 }
 0x111   : > { %v678_v61 = vpop.f32.mrf.mxu0 }
 0x112   : > { %v679_v63 = vadd.f32 %v678_v61, %v638_v60 }
 0x113   : > { %v956_v0 = vpop.f32.mrf.mxu0 }
 0x114   : > { %v682_v1 = vadd.f32 %v679_v63, %v676_v62 }
 0x116   : > { %v683_v2 = vrot.slane %v682_v1, 4 }
 0x118   : > { %v684_v3 = vadd.f32 %v683_v2, %v682_v1 }
 0x11a   : > { %v685_v4 = vrot.slane %v684_v3, 2 }
 0x11c   : > { %v686_v5 = vadd.f32 %v685_v4, %v684_v3 }
 0x11e   : > { %v687_v6 = vrot.slane %v686_v5, 1 }
 0x120   : > { %v688_v7 = vadd.f32 %v687_v6, %v686_v5 }
 0x122   : > { %v690_v8 = vmul.f32 0.0625, %v688_v7 }
 0x124   : > { %v691_v9 = vsub.f32 %v676_v62, %v690_v8  ;;  %v692_v10 = vsub.f32 %v679_v63, %v690_v8 }
 0x126   : > { %v693_v11 = vmul.f32 %v691_v9, %v691_v9  ;;  %v694_v12 = vmul.f32 %v692_v10, %v692_v10 }
 0x128   : > { %v695_v13 = vadd.f32 %v694_v12, %v693_v11 }
 0x12a   : > { %v696_v14 = vrot.slane %v695_v13, 4 }
 0x12c   : > { %v697_v15 = vadd.f32 %v696_v14, %v695_v13 }
 0x12e   : > { %v698_v16 = vrot.slane %v697_v15, 2 }
 0x130   : > { %v699_v17 = vadd.f32 %v698_v16, %v697_v15 }
 0x132   : > { %v700_v18 = vrot.slane %v699_v17, 1 }
 0x134   : > { %v701_v19 = vadd.f32 %v700_v18, %v699_v17 }
 0x136   : > { %v702_v20 = vmul.f32 0.0625, %v701_v19 }
 0x138   : > { %v703_v21 = vadd.f32 1e-05, %v702_v20 }
 0x13a   : > { %1038 = vrsqrt.f32 %v703_v21 }
 0x147   : > { %v1039_v22 = vpop.eup %1038 }
 0x148   : > { %v705_v23 = vmul.f32 %v1039_v22, %v691_v9  ;;  %v706_v24 = vmul.f32 %v1039_v22, %v692_v10 }
 0x14a   : > { %vm707_vm2 = vcmp.gt.f32.partialorder %v705_v23, 0.0  ;;  %vm708_vm3 = vcmp.gt.f32.partialorder %v706_v24, 0.0  ;;  %v709_v25 = vmul.f32 0.2, %v705_v23  ;;  %v710_v26 = vmul.f32 0.2, %v706_v24 }
 0x14c   : > { %v711_v27 = vsel %vm707_vm2, %v705_v23, %v709_v25  ;;  %v712_v28 = vsel %vm708_vm3, %v706_v24, %v710_v26 }
 0x14d   : > { %v894_v29 = vpack.c.bf16 %v712_v28, %v711_v27 }
 0x14f   : > { %895 = vst [vmem:[%s227_s8] sm:$0xff] %v894_v29  }
 0x150 PF: > { %s14_s14 = sadd.s32 1, %s1092_s14   ;;  %s1301_s12 = smov %s1088_s13 }
 0x151   : > { %p11_p2 = scmp.ge.s32.totalorder %s14_s14, 4   ;;  %s1302_s13 = smov %s1304_s16 }
 0x153   :  { %13 = sbr.rel (!%p11_p2) target bundleno = 2 (0x2), region = 71 }
 0x158   :  { %750 = vsyncpa [#allocation3], 1 }
 0x159   :  { %752 = vsyncpa [#allocation3 + $0x1], 1 }

// kernel: discriminator_forward.7
= control target key start
LH: loop header
LB: loop body
LE: loop exit
PB: predicated region body
PF: predicated region fallthrough
CT: control target
= control target key end

     0   :  { %s2234_s12 = smov 0   ;;  %s2236_s13 = smov 0   ;;  %s2713_s0 = inlined_call_operand.vmem [shape: bf16[2,4,1152], index: 0, kind: input, shape index: {}]   ;;  %s2714_s1 = inlined_call_operand.vmem [shape: bf16[1152,256], index: 1, kind: input, shape index: {}]   ;;  %s2715_s2 = inlined_call_operand.vmem [shape: f32[1,256], index: 2, kind: input, shape index: {}]   ;;  %s2716_s3 = inlined_call_operand.vmem [shape: bf16[2,4,256], index: 3, kind: output, shape index: {}]  }
   0x1   :  { %s2238_s14 = smov 0   ;;  %s2240_s15 = smov 0  }
   0x2   :  { %s2242_s16 = smov 0   ;;  %s2244_s17 = smov 0  }
   0x3   :  { %s2246_s18 = smov 0  }
   0x4 LB: > { %s22_s19 = sadd.s32 1, %s2201_s16  ;;  %s25_s20 = sadd.s32 1, %s2205_s17  ;;  %s2209_s18 = sphi %s2246_s18, %s13_s18   ;;  %s2205_s17 = sphi %s2244_s17, %s2722_s17   ;;  %s2201_s16 = sphi %s2242_s16, %s2721_s16   ;;  %s2197_s15 = sphi %s2240_s15, %s2720_s15   ;;  %s2193_s14 = sphi %s2238_s14, %s2719_s14   ;;  %s2189_s13 = sphi %s2236_s13, %s2718_s13   ;;  %s2185_s12 = sphi %s2234_s12, %s2717_s12  }
   0x5   : > { %p23_p0 = scmp.ge.s32.totalorder %s22_s19, 2  ;;  %s58_s21 = sadd.s32 1, %s2189_s13 }
   0x6   : > { %p65_p1 = scmp.ne.s32.totalorder %s2189_s13, %s2185_s12  ;;  %p66_p2 = scmp.eq.s32.totalorder %s2209_s18, 0 }
   0x7   : > { %s2724_s19 = smov (%p23_p0, %s22_s19), 0  ;;  %s2726_s20 = smov (!%p23_p0, %s25_s20), %s2205_s17 }
   0x8   : > { %s55_s22 = ssub.s32 %s2201_s16, %s2724_s19  ;;  %p67_p3 = por %p66_p2, %p65_p1 }
   0x9   : > { %p27_p4 = scmp.ge.s32.totalorder %s2726_s20, 2  ;;  %p56_p5 = scmp.eq.s32.totalorder %s55_s22, 0 }
   0xa   : > { %p1818_p6 = scmp.ge.s32.totalorder %s2209_s18, 4 }
   0xb   : > { %s2728_s20 = smov (%p27_p4, %s2726_s20), 0 }
   0xc   : > { %s2283_s23 = scalar_select %p56_p5, %s2189_s13, %s58_s21  }
   0xd   : > { %145 = sbr.rel (%p1818_p6) target bundleno = 118 (0x76), region = 16 }
  0x12   : > { %156 = sbr.rel (!%p67_p3) target bundleno = 118 (0x76), region = 24  ;;  %s158_s24 = sand.u32 (%p67_p3), 1, %s2189_s13  }
  0x13   : > { %s1819_s25 = sshll.u32 (%p67_p3), %s2201_s16, 2  ;;  %s2017_s26 = smul.u32 (%p67_p3), 576, %s158_s24 }
  0x14   : > { %s2291_s29 = scalar_lea.vmem (%p67_p3), %s2714_s1, %s1819_s25 }
  0x15   : > { %v179_v0 = vld [vmem:[%s2291_s29] sm:$0xf] (%p67_p3)  ;;  %v181_v1 = vld [vmem:[%s2291_s29 + $0x8] sm:$0xf] (%p67_p3)  ;;  %v183_v2 = vld [vmem:[%s2291_s29 + $0x10] sm:$0xf] (%p67_p3) }
  0x16   : > { %v185_v3 = vld [vmem:[%s2291_s29 + $0x18] sm:$0xf] (%p67_p3)  ;;  %v187_v4 = vld [vmem:[%s2291_s29 + $0x20] sm:$0xf] (%p67_p3)  ;;  %s2298_s30 = scalar_lea.vmem (%p67_p3), [#allocation2], %s2017_s26 }
  0x17   : > { %180 = vst [vmem:[%s2298_s30] sm:$0xf] %v179_v0  ;;  %182 = vst [vmem:[%s2298_s30 + $0x4] sm:$0xf] %v181_v1  ;;  %v189_v5 = vld [vmem:[%s2291_s29 + $0x28] sm:$0xf] }
  0x18   : > { %184 = vst [vmem:[%s2298_s30 + $0x8] sm:$0xf] %v183_v2  ;;  %186 = vst [vmem:[%s2298_s30 + $0xc] sm:$0xf] %v185_v3  ;;  %v191_v6 = vld [vmem:[%s2291_s29 + $0x30] sm:$0xf] }
  0x19   : > { %188 = vst [vmem:[%s2298_s30 + $0x10] sm:$0xf] %v187_v4  ;;  %v193_v7 = vld [vmem:[%s2291_s29 + $0x38] sm:$0xf]  ;;  %190 = vst [vmem:[%s2298_s30 + $0x14] sm:$0xf] %v189_v5 }
  0x1a   : > { %192 = vst [vmem:[%s2298_s30 + $0x18] sm:$0xf] %v191_v6  ;;  %194 = vst [vmem:[%s2298_s30 + $0x1c] sm:$0xf] %v193_v7  ;;  %v195_v8 = vld [vmem:[%s2291_s29 + $0x40] sm:$0xf] }
  0x1b   : > { %v197_v9 = vld [vmem:[%s2291_s29 + $0x48] sm:$0xf]  ;;  %v199_v10 = vld [vmem:[%s2291_s29 + $0x50] sm:$0xf]  ;;  %196 = vst [vmem:[%s2298_s30 + $0x20] sm:$0xf] %v195_v8 }
  0x1c   : > { %198 = vst [vmem:[%s2298_s30 + $0x24] sm:$0xf] %v197_v9  ;;  %200 = vst [vmem:[%s2298_s30 + $0x28] sm:$0xf] %v199_v10  ;;  %v201_v11 = vld [vmem:[%s2291_s29 + $0x58] sm:$0xf] }
  0x1d   : > { %v203_v12 = vld [vmem:[%s2291_s29 + $0x60] sm:$0xf]  ;;  %v205_v13 = vld [vmem:[%s2291_s29 + $0x68] sm:$0xf]  ;;  %202 = vst [vmem:[%s2298_s30 + $0x2c] sm:$0xf] %v201_v11 }
  0x1e   : > { %204 = vst [vmem:[%s2298_s30 + $0x30] sm:$0xf] %v203_v12  ;;  %206 = vst [vmem:[%s2298_s30 + $0x34] sm:$0xf] %v205_v13  ;;  %v207_v14 = vld [vmem:[%s2291_s29 + $0x70] sm:$0xf] }
  0x1f   : > { %v209_v15 = vld [vmem:[%s2291_s29 + $0x78] sm:$0xf]  ;;  %v211_v16 = vld [vmem:[%s2291_s29 + $0x80] sm:$0xf]  ;;  %208 = vst [vmem:[%s2298_s30 + $0x38] sm:$0xf] %v207_v14 }
  0x20   : > { %210 = vst [vmem:[%s2298_s30 + $0x3c] sm:$0xf] %v209_v15  ;;  %212 = vst [vmem:[%s2298_s30 + $0x40] sm:$0xf] %v211_v16  ;;  %v213_v17 = vld [vmem:[%s2291_s29 + $0x88] sm:$0xf] }
  0x21   : > { %v215_v18 = vld [vmem:[%s2291_s29 + $0x90] sm:$0xf]  ;;  %v217_v19 = vld [vmem:[%s2291_s29 + $0x98] sm:$0xf]  ;;  %214 = vst [vmem:[%s2298_s30 + $0x44] sm:$0xf] %v213_v17 }
  0x22   : > { %216 = vst [vmem:[%s2298_s30 + $0x48] sm:$0xf] %v215_v18  ;;  %218 = vst [vmem:[%s2298_s30 + $0x4c] sm:$0xf] %v217_v19  ;;  %v219_v20 = vld [vmem:[%s2291_s29 + $0xa0] sm:$0xf] }
  0x23   : > { %v221_v21 = vld [vmem:[%s2291_s29 + $0xa8] sm:$0xf]  ;;  %v223_v22 = vld [vmem:[%s2291_s29 + $0xb0] sm:$0xf]  ;;  %220 = vst [vmem:[%s2298_s30 + $0x50] sm:$0xf] %v219_v20 }
  0x24   : > { %222 = vst [vmem:[%s2298_s30 + $0x54] sm:$0xf] %v221_v21  ;;  %224 = vst [vmem:[%s2298_s30 + $0x58] sm:$0xf] %v223_v22  ;;  %v225_v23 = vld [vmem:[%s2291_s29 + $0xb8] sm:$0xf] }
  0x25   : > { %v227_v24 = vld [vmem:[%s2291_s29 + $0xc0] sm:$0xf]  ;;  %v229_v25 = vld [vmem:[%s2291_s29 + $0xc8] sm:$0xf]  ;;  %226 = vst [vmem:[%s2298_s30 + $0x5c] sm:$0xf] %v225_v23 }
  0x26   : > { %228 = vst [vmem:[%s2298_s30 + $0x60] sm:$0xf] %v227_v24  ;;  %230 = vst [vmem:[%s2298_s30 + $0x64] sm:$0xf] %v229_v25  ;;  %v231_v26 = vld [vmem:[%s2291_s29 + $0xd0] sm:$0xf] }
  0x27   : > { %v233_v27 = vld [vmem:[%s2291_s29 + $0xd8] sm:$0xf]  ;;  %v235_v28 = vld [vmem:[%s2291_s29 + $0xe0] sm:$0xf]  ;;  %232 = vst [vmem:[%s2298_s30 + $0x68] sm:$0xf] %v231_v26 }
  0x28   : > { %234 = vst [vmem:[%s2298_s30 + $0x6c] sm:$0xf] %v233_v27  ;;  %236 = vst [vmem:[%s2298_s30 + $0x70] sm:$0xf] %v235_v28  ;;  %v237_v29 = vld [vmem:[%s2291_s29 + $0xe8] sm:$0xf] }
  0x29   : > { %v239_v30 = vld [vmem:[%s2291_s29 + $0xf0] sm:$0xf]  ;;  %v241_v31 = vld [vmem:[%s2291_s29 + $0xf8] sm:$0xf]  ;;  %238 = vst [vmem:[%s2298_s30 + $0x74] sm:$0xf] %v237_v29 }
  0x2a   : > { %240 = vst [vmem:[%s2298_s30 + $0x78] sm:$0xf] %v239_v30  ;;  %242 = vst [vmem:[%s2298_s30 + $0x7c] sm:$0xf] %v241_v31  ;;  %v243_v32 = vld [vmem:[%s2291_s29 + $0x100] sm:$0xf] }
  0x2b   : > { %v245_v33 = vld [vmem:[%s2291_s29 + $0x108] sm:$0xf]  ;;  %v247_v34 = vld [vmem:[%s2291_s29 + $0x110] sm:$0xf]  ;;  %244 = vst [vmem:[%s2298_s30 + $0x80] sm:$0xf] %v243_v32 }
  0x2c   : > { %246 = vst [vmem:[%s2298_s30 + $0x84] sm:$0xf] %v245_v33  ;;  %248 = vst [vmem:[%s2298_s30 + $0x88] sm:$0xf] %v247_v34  ;;  %v249_v35 = vld [vmem:[%s2291_s29 + $0x118] sm:$0xf] }
  0x2d   : > { %v251_v36 = vld [vmem:[%s2291_s29 + $0x120] sm:$0xf]  ;;  %v253_v37 = vld [vmem:[%s2291_s29 + $0x128] sm:$0xf]  ;;  %250 = vst [vmem:[%s2298_s30 + $0x8c] sm:$0xf] %v249_v35 }
  0x2e   : > { %252 = vst [vmem:[%s2298_s30 + $0x90] sm:$0xf] %v251_v36  ;;  %254 = vst [vmem:[%s2298_s30 + $0x94] sm:$0xf] %v253_v37  ;;  %v255_v38 = vld [vmem:[%s2291_s29 + $0x130] sm:$0xf] }
  0x2f   : > { %v257_v39 = vld [vmem:[%s2291_s29 + $0x138] sm:$0xf]  ;;  %v259_v40 = vld [vmem:[%s2291_s29 + $0x140] sm:$0xf]  ;;  %256 = vst [vmem:[%s2298_s30 + $0x98] sm:$0xf] %v255_v38 }
  0x30   : > { %258 = vst [vmem:[%s2298_s30 + $0x9c] sm:$0xf] %v257_v39  ;;  %260 = vst [vmem:[%s2298_s30 + $0xa0] sm:$0xf] %v259_v40  ;;  %v261_v41 = vld [vmem:[%s2291_s29 + $0x148] sm:$0xf] }
  0x31   : > { %v263_v42 = vld [vmem:[%s2291_s29 + $0x150] sm:$0xf]  ;;  %v265_v43 = vld [vmem:[%s2291_s29 + $0x158] sm:$0xf]  ;;  %262 = vst [vmem:[%s2298_s30 + $0xa4] sm:$0xf] %v261_v41 }
  0x32   : > { %264 = vst [vmem:[%s2298_s30 + $0xa8] sm:$0xf] %v263_v42  ;;  %266 = vst [vmem:[%s2298_s30 + $0xac] sm:$0xf] %v265_v43  ;;  %v267_v44 = vld [vmem:[%s2291_s29 + $0x160] sm:$0xf] }
  0x33   : > { %v269_v45 = vld [vmem:[%s2291_s29 + $0x168] sm:$0xf]  ;;  %v271_v46 = vld [vmem:[%s2291_s29 + $0x170] sm:$0xf]  ;;  %268 = vst [vmem:[%s2298_s30 + $0xb0] sm:$0xf] %v267_v44 }
  0x34   : > { %270 = vst [vmem:[%s2298_s30 + $0xb4] sm:$0xf] %v269_v45  ;;  %272 = vst [vmem:[%s2298_s30 + $0xb8] sm:$0xf] %v271_v46  ;;  %v273_v47 = vld [vmem:[%s2291_s29 + $0x178] sm:$0xf] }
  0x35   : > { %v275_v48 = vld [vmem:[%s2291_s29 + $0x180] sm:$0xf]  ;;  %v277_v49 = vld [vmem:[%s2291_s29 + $0x188] sm:$0xf]  ;;  %274 = vst [vmem:[%s2298_s30 + $0xbc] sm:$0xf] %v273_v47 }
  0x36   : > { %276 = vst [vmem:[%s2298_s30 + $0xc0] sm:$0xf] %v275_v48  ;;  %278 = vst [vmem:[%s2298_s30 + $0xc4] sm:$0xf] %v277_v49  ;;  %v279_v50 = vld [vmem:[%s2291_s29 + $0x190] sm:$0xf] }
  0x37   : > { %v281_v51 = vld [vmem:[%s2291_s29 + $0x198] sm:$0xf]  ;;  %v283_v52 = vld [vmem:[%s2291_s29 + $0x1a0] sm:$0xf]  ;;  %280 = vst [vmem:[%s2298_s30 + $0xc8] sm:$0xf] %v279_v50 }
  0x38   : > { %282 = vst [vmem:[%s2298_s30 + $0xcc] sm:$0xf] %v281_v51  ;;  %284 = vst [vmem:[%s2298_s30 + $0xd0] sm:$0xf] %v283_v52  ;;  %v285_v53 = vld [vmem:[%s2291_s29 + $0x1a8] sm:$0xf] }
  0x39   : > { %v287_v54 = vld [vmem:[%s2291_s29 + $0x1b0] sm:$0xf]  ;;  %v289_v55 = vld [vmem:[%s2291_s29 + $0x1b8] sm:$0xf]  ;;  %286 = vst [vmem:[%s2298_s30 + $0xd4] sm:$0xf] %v285_v53 }
  0x3a   : > { %288 = vst [vmem:[%s2298_s30 + $0xd8] sm:$0xf] %v287_v54  ;;  %290 = vst [vmem:[%s2298_s30 + $0xdc] sm:$0xf] %v289_v55  ;;  %v291_v56 = vld [vmem:[%s2291_s29 + $0x1c0] sm:$0xf] }
  0x3b   : > { %v293_v57 = vld [vmem:[%s2291_s29 + $0x1c8] sm:$0xf]  ;;  %v295_v58 = vld [vmem:[%s2291_s29 + $0x1d0] sm:$0xf]  ;;  %292 = vst [vmem:[%s2298_s30 + $0xe0] sm:$0xf] %v291_v56 }
  0x3c   : > { %294 = vst [vmem:[%s2298_s30 + $0xe4] sm:$0xf] %v293_v57  ;;  %296 = vst [vmem:[%s2298_s30 + $0xe8] sm:$0xf] %v295_v58  ;;  %v297_v59 = vld [vmem:[%s2291_s29 + $0x1d8] sm:$0xf] }
  0x3d   : > { %v299_v60 = vld [vmem:[%s2291_s29 + $0x1e0] sm:$0xf]  ;;  %v301_v61 = vld [vmem:[%s2291_s29 + $0x1e8] sm:$0xf]  ;;  %298 = vst [vmem:[%s2298_s30 + $0xec] sm:$0xf] %v297_v59 }
  0x3e   : > { %300 = vst [vmem:[%s2298_s30 + $0xf0] sm:$0xf] %v299_v60  ;;  %302 = vst [vmem:[%s2298_s30 + $0xf4] sm:$0xf] %v301_v61  ;;  %v303_v62 = vld [vmem:[%s2291_s29 + $0x1f0] sm:$0xf] }
  0x3f   : > { %v305_v63 = vld [vmem:[%s2291_s29 + $0x1f8] sm:$0xf]  ;;  %v307_v0 = vld [vmem:[%s2291_s29 + $0x200] sm:$0xf]  ;;  %304 = vst [vmem:[%s2298_s30 + $0xf8] sm:$0xf] %v303_v62 }
  0x40   : > { %306 = vst [vmem:[%s2298_s30 + $0xfc] sm:$0xf] %v305_v63  ;;  %308 = vst [vmem:[%s2298_s30 + $0x100] sm:$0xf] %v307_v0  ;;  %v309_v1 = vld [vmem:[%s2291_s29 + $0x208] sm:$0xf] }
  0x41   : > { %v311_v2 = vld [vmem:[%s2291_s29 + $0x210] sm:$0xf]  ;;  %v313_v3 = vld [vmem:[%s2291_s29 + $0x218] sm:$0xf]  ;;  %310 = vst [vmem:[%s2298_s30 + $0x104] sm:$0xf] %v309_v1 }
  0x42   : > { %312 = vst [vmem:[%s2298_s30 + $0x108] sm:$0xf] %v311_v2  ;;  %314 = vst [vmem:[%s2298_s30 + $0x10c] sm:$0xf] %v313_v3  ;;  %v315_v4 = vld [vmem:[%s2291_s29 + $0x220] sm:$0xf] }
  0x43   : > { %v317_v5 = vld [vmem:[%s2291_s29 + $0x228] sm:$0xf]  ;;  %v319_v6 = vld [vmem:[%s2291_s29 + $0x230] sm:$0xf]  ;;  %316 = vst [vmem:[%s2298_s30 + $0x110] sm:$0xf] %v315_v4 }
  0x44   : > { %318 = vst [vmem:[%s2298_s30 + $0x114] sm:$0xf] %v317_v5  ;;  %320 = vst [vmem:[%s2298_s30 + $0x118] sm:$0xf] %v319_v6  ;;  %v321_v7 = vld [vmem:[%s2291_s29 + $0x238] sm:$0xf] }
  0x45   : > { %v323_v8 = vld [vmem:[%s2291_s29 + $0x240] sm:$0xf]  ;;  %v325_v9 = vld [vmem:[%s2291_s29 + $0x248] sm:$0xf]  ;;  %322 = vst [vmem:[%s2298_s30 + $0x11c] sm:$0xf] %v321_v7 }
  0x46   : > { %324 = vst [vmem:[%s2298_s30 + $0x120] sm:$0xf] %v323_v8  ;;  %326 = vst [vmem:[%s2298_s30 + $0x124] sm:$0xf] %v325_v9  ;;  %v327_v10 = vld [vmem:[%s2291_s29 + $0x250] sm:$0xf] }
  0x47   : > { %v329_v11 = vld [vmem:[%s2291_s29 + $0x258] sm:$0xf]  ;;  %v331_v12 = vld [vmem:[%s2291_s29 + $0x260] sm:$0xf]  ;;  %328 = vst [vmem:[%s2298_s30 + $0x128] sm:$0xf] %v327_v10 }
  0x48   : > { %330 = vst [vmem:[%s2298_s30 + $0x12c] sm:$0xf] %v329_v11  ;;  %332 = vst [vmem:[%s2298_s30 + $0x130] sm:$0xf] %v331_v12  ;;  %v333_v13 = vld [vmem:[%s2291_s29 + $0x268] sm:$0xf] }
  0x49   : > { %v335_v14 = vld [vmem:[%s2291_s29 + $0x270] sm:$0xf]  ;;  %v337_v15 = vld [vmem:[%s2291_s29 + $0x278] sm:$0xf]  ;;  %334 = vst [vmem:[%s2298_s30 + $0x134] sm:$0xf] %v333_v13 }
  0x4a   : > { %336 = vst [vmem:[%s2298_s30 + $0x138] sm:$0xf] %v335_v14  ;;  %338 = vst [vmem:[%s2298_s30 + $0x13c] sm:$0xf] %v337_v15  ;;  %v339_v16 = vld [vmem:[%s2291_s29 + $0x280] sm:$0xf] }
  0x4b   : > { %v341_v17 = vld [vmem:[%s2291_s29 + $0x288] sm:$0xf]  ;;  %v343_v18 = vld [vmem:[%s2291_s29 + $0x290] sm:$0xf]  ;;  %340 = vst [vmem:[%s2298_s30 + $0x140] sm:$0xf] %v339_v16 }
  0x4c   : > { %342 = vst [vmem:[%s2298_s30 + $0x144] sm:$0xf] %v341_v17  ;;  %344 = vst [vmem:[%s2298_s30 + $0x148] sm:$0xf] %v343_v18  ;;  %v345_v19 = vld [vmem:[%s2291_s29 + $0x298] sm:$0xf] }
  0x4d   : > { %v347_v20 = vld [vmem:[%s2291_s29 + $0x2a0] sm:$0xf]  ;;  %v349_v21 = vld [vmem:[%s2291_s29 + $0x2a8] sm:$0xf]  ;;  %346 = vst [vmem:[%s2298_s30 + $0x14c] sm:$0xf] %v345_v19 }
  0x4e   : > { %348 = vst [vmem:[%s2298_s30 + $0x150] sm:$0xf] %v347_v20  ;;  %350 = vst [vmem:[%s2298_s30 + $0x154] sm:$0xf] %v349_v21  ;;  %v351_v22 = vld [vmem:[%s2291_s29 + $0x2b0] sm:$0xf] }
  0x4f   : > { %v353_v23 = vld [vmem:[%s2291_s29 + $0x2b8] sm:$0xf]  ;;  %v355_v24 = vld [vmem:[%s2291_s29 + $0x2c0] sm:$0xf]  ;;  %352 = vst [vmem:[%s2298_s30 + $0x158] sm:$0xf] %v351_v22 }
  0x50   : > { %354 = vst [vmem:[%s2298_s30 + $0x15c] sm:$0xf] %v353_v23  ;;  %356 = vst [vmem:[%s2298_s30 + $0x160] sm:$0xf] %v355_v24  ;;  %v357_v25 = vld [vmem:[%s2291_s29 + $0x2c8] sm:$0xf] }
  0x51   : > { %v359_v26 = vld [vmem:[%s2291_s29 + $0x2d0] sm:$0xf]  ;;  %v361_v27 = vld [vmem:[%s2291_s29 + $0x2d8] sm:$0xf]  ;;  %358 = vst [vmem:[%s2298_s30 + $0x164] sm:$0xf] %v357_v25 }
  0x52   : > { %360 = vst [vmem:[%s2298_s30 + $0x168] sm:$0xf] %v359_v26  ;;  %362 = vst [vmem:[%s2298_s30 + $0x16c] sm:$0xf] %v361_v27  ;;  %v363_v28 = vld [vmem:[%s2291_s29 + $0x2e0] sm:$0xf] }
  0x53   : > { %v365_v29 = vld [vmem:[%s2291_s29 + $0x2e8] sm:$0xf]  ;;  %v367_v30 = vld [vmem:[%s2291_s29 + $0x2f0] sm:$0xf]  ;;  %364 = vst [vmem:[%s2298_s30 + $0x170] sm:$0xf] %v363_v28 }
  0x54   : > { %366 = vst [vmem:[%s2298_s30 + $0x174] sm:$0xf] %v365_v29  ;;  %368 = vst [vmem:[%s2298_s30 + $0x178] sm:$0xf] %v367_v30  ;;  %v369_v31 = vld [vmem:[%s2291_s29 + $0x2f8] sm:$0xf] }
  0x55   : > { %v371_v32 = vld [vmem:[%s2291_s29 + $0x300] sm:$0xf]  ;;  %v373_v33 = vld [vmem:[%s2291_s29 + $0x308] sm:$0xf]  ;;  %370 = vst [vmem:[%s2298_s30 + $0x17c] sm:$0xf] %v369_v31 }
  0x56   : > { %372 = vst [vmem:[%s2298_s30 + $0x180] sm:$0xf] %v371_v32  ;;  %374 = vst [vmem:[%s2298_s30 + $0x184] sm:$0xf] %v373_v33  ;;  %v375_v34 = vld [vmem:[%s2291_s29 + $0x310] sm:$0xf] }
  0x57   : > { %v377_v35 = vld [vmem:[%s2291_s29 + $0x318] sm:$0xf]  ;;  %v379_v36 = vld [vmem:[%s2291_s29 + $0x320] sm:$0xf]  ;;  %376 = vst [vmem:[%s2298_s30 + $0x188] sm:$0xf] %v375_v34 }
  0x58   : > { %378 = vst [vmem:[%s2298_s30 + $0x18c] sm:$0xf] %v377_v35  ;;  %380 = vst [vmem:[%s2298_s30 + $0x190] sm:$0xf] %v379_v36  ;;  %v381_v37 = vld [vmem:[%s2291_s29 + $0x328] sm:$0xf] }
  0x59   : > { %v383_v38 = vld [vmem:[%s2291_s29 + $0x330] sm:$0xf]  ;;  %v385_v39 = vld [vmem:[%s2291_s29 + $0x338] sm:$0xf]  ;;  %382 = vst [vmem:[%s2298_s30 + $0x194] sm:$0xf] %v381_v37 }
  0x5a   : > { %384 = vst [vmem:[%s2298_s30 + $0x198] sm:$0xf] %v383_v38  ;;  %386 = vst [vmem:[%s2298_s30 + $0x19c] sm:$0xf] %v385_v39  ;;  %v387_v40 = vld [vmem:[%s2291_s29 + $0x340] sm:$0xf] }
  0x5b   : > { %v389_v41 = vld [vmem:[%s2291_s29 + $0x348] sm:$0xf]  ;;  %v391_v42 = vld [vmem:[%s2291_s29 + $0x350] sm:$0xf]  ;;  %388 = vst [vmem:[%s2298_s30 + $0x1a0] sm:$0xf] %v387_v40 }
  0x5c   : > { %390 = vst [vmem:[%s2298_s30 + $0x1a4] sm:$0xf] %v389_v41  ;;  %392 = vst [vmem:[%s2298_s30 + $0x1a8] sm:$0xf] %v391_v42  ;;  %v393_v43 = vld [vmem:[%s2291_s29 + $0x358] sm:$0xf] }
  0x5d   : > { %v395_v44 = vld [vmem:[%s2291_s29 + $0x360] sm:$0xf]  ;;  %v397_v45 = vld [vmem:[%s2291_s29 + $0x368] sm:$0xf]  ;;  %394 = vst [vmem:[%s2298_s30 + $0x1ac] sm:$0xf] %v393_v43 }
  0x5e   : > { %396 = vst [vmem:[%s2298_s30 + $0x1b0] sm:$0xf] %v395_v44  ;;  %398 = vst [vmem:[%s2298_s30 + $0x1b4] sm:$0xf] %v397_v45  ;;  %v399_v46 = vld [vmem:[%s2291_s29 + $0x370] sm:$0xf] }
  0x5f   : > { %v401_v47 = vld [vmem:[%s2291_s29 + $0x378] sm:$0xf]  ;;  %v403_v48 = vld [vmem:[%s2291_s29 + $0x380] sm:$0xf]  ;;  %400 = vst [vmem:[%s2298_s30 + $0x1b8] sm:$0xf] %v399_v46 }
  0x60   : > { %402 = vst [vmem:[%s2298_s30 + $0x1bc] sm:$0xf] %v401_v47  ;;  %404 = vst [vmem:[%s2298_s30 + $0x1c0] sm:$0xf] %v403_v48  ;;  %v405_v49 = vld [vmem:[%s2291_s29 + $0x388] sm:$0xf] }
  0x61   : > { %v407_v50 = vld [vmem:[%s2291_s29 + $0x390] sm:$0xf]  ;;  %v409_v51 = vld [vmem:[%s2291_s29 + $0x398] sm:$0xf]  ;;  %406 = vst [vmem:[%s2298_s30 + $0x1c4] sm:$0xf] %v405_v49 }
  0x62   : > { %408 = vst [vmem:[%s2298_s30 + $0x1c8] sm:$0xf] %v407_v50  ;;  %410 = vst [vmem:[%s2298_s30 + $0x1cc] sm:$0xf] %v409_v51  ;;  %v411_v52 = vld [vmem:[%s2291_s29 + $0x3a0] sm:$0xf] }
  0x63   : > { %v413_v53 = vld [vmem:[%s2291_s29 + $0x3a8] sm:$0xf]  ;;  %v415_v54 = vld [vmem:[%s2291_s29 + $0x3b0] sm:$0xf]  ;;  %412 = vst [vmem:[%s2298_s30 + $0x1d0] sm:$0xf] %v411_v52 }
  0x64   : > { %414 = vst [vmem:[%s2298_s30 + $0x1d4] sm:$0xf] %v413_v53  ;;  %416 = vst [vmem:[%s2298_s30 + $0x1d8] sm:$0xf] %v415_v54  ;;  %v417_v55 = vld [vmem:[%s2291_s29 + $0x3b8] sm:$0xf] }
  0x65   : > { %v419_v56 = vld [vmem:[%s2291_s29 + $0x3c0] sm:$0xf]  ;;  %v421_v57 = vld [vmem:[%s2291_s29 + $0x3c8] sm:$0xf]  ;;  %418 = vst [vmem:[%s2298_s30 + $0x1dc] sm:$0xf] %v417_v55 }
  0x66   : > { %420 = vst [vmem:[%s2298_s30 + $0x1e0] sm:$0xf] %v419_v56  ;;  %422 = vst [vmem:[%s2298_s30 + $0x1e4] sm:$0xf] %v421_v57  ;;  %v423_v58 = vld [vmem:[%s2291_s29 + $0x3d0] sm:$0xf] }
  0x67   : > { %v425_v59 = vld [vmem:[%s2291_s29 + $0x3d8] sm:$0xf]  ;;  %v427_v60 = vld [vmem:[%s2291_s29 + $0x3e0] sm:$0xf]  ;;  %424 = vst [vmem:[%s2298_s30 + $0x1e8] sm:$0xf] %v423_v58 }
  0x68   : > { %426 = vst [vmem:[%s2298_s30 + $0x1ec] sm:$0xf] %v425_v59  ;;  %428 = vst [vmem:[%s2298_s30 + $0x1f0] sm:$0xf] %v427_v60  ;;  %v429_v61 = vld [vmem:[%s2291_s29 + $0x3e8] sm:$0xf] }
  0x69   : > { %v431_v62 = vld [vmem:[%s2291_s29 + $0x3f0] sm:$0xf]  ;;  %v433_v63 = vld [vmem:[%s2291_s29 + $0x3f8] sm:$0xf]  ;;  %430 = vst [vmem:[%s2298_s30 + $0x1f4] sm:$0xf] %v429_v61 }
  0x6a   : > { %432 = vst [vmem:[%s2298_s30 + $0x1f8] sm:$0xf] %v431_v62  ;;  %434 = vst [vmem:[%s2298_s30 + $0x1fc] sm:$0xf] %v433_v63  ;;  %v435_v0 = vld [vmem:[%s2291_s29 + $0x400] sm:$0xf] }
  0x6b   : > { %v437_v1 = vld [vmem:[%s2291_s29 + $0x408] sm:$0xf]  ;;  %v439_v2 = vld [vmem:[%s2291_s29 + $0x410] sm:$0xf]  ;;  %436 = vst [vmem:[%s2298_s30 + $0x200] sm:$0xf] %v435_v0 }
  0x6c   : > { %438 = vst [vmem:[%s2298_s30 + $0x204] sm:$0xf] %v437_v1  ;;  %440 = vst [vmem:[%s2298_s30 + $0x208] sm:$0xf] %v439_v2  ;;  %v441_v3 = vld [vmem:[%s2291_s29 + $0x418] sm:$0xf] }
  0x6d   : > { %v443_v4 = vld [vmem:[%s2291_s29 + $0x420] sm:$0xf]  ;;  %v445_v5 = vld [vmem:[%s2291_s29 + $0x428] sm:$0xf]  ;;  %442 = vst [vmem:[%s2298_s30 + $0x20c] sm:$0xf] %v441_v3 }
  0x6e   : > { %444 = vst [vmem:[%s2298_s30 + $0x210] sm:$0xf] %v443_v4  ;;  %446 = vst [vmem:[%s2298_s30 + $0x214] sm:$0xf] %v445_v5  ;;  %v447_v6 = vld [vmem:[%s2291_s29 + $0x430] sm:$0xf] }
  0x6f   : > { %v449_v7 = vld [vmem:[%s2291_s29 + $0x438] sm:$0xf]  ;;  %v451_v8 = vld [vmem:[%s2291_s29 + $0x440] sm:$0xf]  ;;  %448 = vst [vmem:[%s2298_s30 + $0x218] sm:$0xf] %v447_v6 }
  0x70   : > { %450 = vst [vmem:[%s2298_s30 + $0x21c] sm:$0xf] %v449_v7  ;;  %452 = vst [vmem:[%s2298_s30 + $0x220] sm:$0xf] %v451_v8  ;;  %v453_v9 = vld [vmem:[%s2291_s29 + $0x448] sm:$0xf] }
  0x71   : > { %v455_v10 = vld [vmem:[%s2291_s29 + $0x450] sm:$0xf]  ;;  %v457_v11 = vld [vmem:[%s2291_s29 + $0x458] sm:$0xf]  ;;  %454 = vst [vmem:[%s2298_s30 + $0x224] sm:$0xf] %v453_v9 }
  0x72   : > { %456 = vst [vmem:[%s2298_s30 + $0x228] sm:$0xf] %v455_v10  ;;  %458 = vst [vmem:[%s2298_s30 + $0x22c] sm:$0xf] %v457_v11  ;;  %v459_v12 = vld [vmem:[%s2291_s29 + $0x460] sm:$0xf] }
  0x73   : > { %v461_v13 = vld [vmem:[%s2291_s29 + $0x468] sm:$0xf]  ;;  %v463_v14 = vld [vmem:[%s2291_s29 + $0x470] sm:$0xf]  ;;  %460 = vst [vmem:[%s2298_s30 + $0x230] sm:$0xf] %v459_v12 }
  0x74   : > { %462 = vst [vmem:[%s2298_s30 + $0x234] sm:$0xf] %v461_v13  ;;  %464 = vst [vmem:[%s2298_s30 + $0x238] sm:$0xf] %v463_v14  ;;  %v465_v15 = vld [vmem:[%s2291_s29 + $0x478] sm:$0xf] }
  0x75   : > { %466 = vst [vmem:[%s2298_s30 + $0x23c] sm:$0xf] %v465_v15 }
  0x76 PF: > { %p1820_p7 = scmp.ge.s32.totalorder %s2209_s18, 1  ;;  %p783_p8 = scmp.lt.s32.totalorder %s2209_s18, 5 }
  0x78   : > { %p784_p9 = pnand %p1820_p7, %p783_p8 }
  0x79   : > { %s790_s4 = sand.u32 (!%p784_p9), 1, %s2185_s12   ;;  %p824_p10 = scmp.lt.s32.totalorder (!%p784_p9), %s2197_s15, 1 }
  0x7a   : > { %787 = sbr.rel (%p784_p9) target bundleno = 477 (0x1dd), region = 69  ;;  %p829_p11 = scmp.lt.s32.totalorder (!%p784_p9), %s2193_s14, 1 }
  0x7b   : > { %s2018_s5 = smul.u32 (!%p784_p9), 576, %s790_s4 }
  0x7d   : > { %s2586_s6 = scalar_lea.vmem (!%p784_p9), [#allocation2], %s2018_s5 }
  0x7f   : > { %v2079_v16 = vld [vmem:[%s2586_s6 + $0x78] sm:$0xff]   ;;  %v2083_v20 = vld [vmem:[%s2586_s6 + $0x70] sm:$0xff]   ;;  %v2087_v24 = vld [vmem:[%s2586_s6 + $0x68] sm:$0xff]   ;;  %v1002_v36 = vlaneseq  ;;  %s2730_s15 = smov (!%p824_p10, %s2197_s15), 1  ;;  %v2211_v38 = vmov 1983009808  }
  0x80   : > { %v2080_v17 = vld [vmem:[%s2586_s6 + $0x38] sm:$0xff]   ;;  %1900 = vmatprep.subr.bf16.mxu0 %v2079_v16  ;;  %v2084_v21 = vld [vmem:[%s2586_s6 + $0x30] sm:$0xff]   ;;  %v2088_v25 = vld [vmem:[%s2586_s6 + $0x28] sm:$0xff]   ;;  %v1000_v39 = vunpack.c.l.s4 %v2211_v38  ;;  %s2019_s7 = smul.u32 18, %s2730_s15  ;;  %vm2213_vm0 = vmmov 0   ;;  %s2732_s14 = smov (!%p829_p11, %s2193_s14), 1 }
  0x81   : > { %v2081_v18 = vld [vmem:[%s2586_s6 + $0xf8] sm:$0xff]   ;;  %1901 = vmatpush3.bf16.msra.mxu0 %v2080_v17  ;;  %v2085_v22 = vld [vmem:[%s2586_s6 + $0xf0] sm:$0xff]   ;;  %v2089_v26 = vld [vmem:[%s2586_s6 + $0xe8] sm:$0xff]   ;;  %v1003_v43 = vshrl.u32 %v1002_v36, 7  ;;  %s831_s21 = scalar_lea.vmem %s2715_s2, %s2732_s14  ;;  %vm1680_vm1 = vcmask 1043456   ;;  %s1822_s22 = sshll.u32 %s2730_s15, 1 }
  0x82   : > { %v2082_v19 = vld [vmem:[%s2586_s6 + $0xb8] sm:$0xff]   ;;  %1922 = vmatprep.subr.bf16.mxu1 %v2081_v18  ;;  %1902 = vmatprep.subr.bf16.mxu0 %v2083_v20  ;;  %v2086_v23 = vld [vmem:[%s2586_s6 + $0xb0] sm:$0xff]   ;;  %v2090_v27 = vld [vmem:[%s2586_s6 + $0xa8] sm:$0xff]   ;;  %v1001_v45 = vunpack.c.0.s8 %v1000_v39  ;;  %s2625_s10 = scalar_lea.vmem %s2713_s0, %s2019_s7  ;;  %s837_s24 = sadd.s32 %s1822_s22, %s2732_s14 }
  0x83   : > { %1923 = vmatpush3.bf16.msra.mxu1 %v2082_v19  ;;  %v2091_v28 = vld [vmem:[%s2586_s6 + $0x60] sm:$0xff]   ;;  %v2095_v32 = vld [vmem:[%s2586_s6 + $0x58] sm:$0xff]   ;;  %v2099_v37 = vld [vmem:[%s2586_s6 + $0x50] sm:$0xff]   ;;  %s1823_s25 = sshll.u32 %s837_s24, 1 }
  0x84   : > { %1924 = vmatprep.subr.bf16.mxu1 %v2085_v22  ;;  %v2092_v29 = vld [vmem:[%s2586_s6 + $0x20] sm:$0xff]   ;;  %v2096_v33 = vld [vmem:[%s2586_s6 + $0x18] sm:$0xff]   ;;  %v2100_v40 = vld [vmem:[%s2586_s6 + $0x10] sm:$0xff]   ;;  %v2627_v50 = vsub.s32 %v1001_v45, %v1003_v43  ;;  %s839_s28 = scalar_lea.vmem %s2716_s3, %s1823_s25 }
  0x85   : > { %1903 = vmatpush3.bf16.msra.mxu0 %v2084_v21  ;;  %v2093_v30 = vld [vmem:[%s2586_s6 + $0xe0] sm:$0xff]   ;;  %v2097_v34 = vld [vmem:[%s2586_s6 + $0xd8] sm:$0xff]   ;;  %v2101_v41 = vld [vmem:[%s2586_s6 + $0xd0] sm:$0xff]  }
  0x86   : > { %1904 = vmatprep.subr.bf16.mxu0 %v2087_v24  ;;  %v2094_v31 = vld [vmem:[%s2586_s6 + $0xa0] sm:$0xff]   ;;  %v2098_v35 = vld [vmem:[%s2586_s6 + $0x98] sm:$0xff]   ;;  %v2102_v42 = vld [vmem:[%s2586_s6 + $0x90] sm:$0xff]  }
  0x87   : > { %1925 = vmatpush3.bf16.msra.mxu1 %v2086_v23  ;;  %v2103_v44 = vld [vmem:[%s2586_s6 + $0x48] sm:$0xff]   ;;  %v2107_v49 = vld [vmem:[%s2586_s6 + $0x40] sm:$0xff]   ;;  %v2111_v57 = vld [vmem:[%s2586_s6 + $0x178] sm:$0xff]  }
  0x88   : > { %1926 = vmatprep.subr.bf16.mxu1 %v2089_v26  ;;  %v2104_v46 = vld [vmem:[%s2586_s6 + $0x8] sm:$0xff]   ;;  %v2108_v51 = vld [vmem:[%s2586_s6] sm:$0xff]   ;;  %v2113_v60 = vld [vmem:[%s2586_s6 + $0x138] sm:$0xff]  }
  0x89   : > { %1905 = vmatpush3.bf16.msra.mxu0 %v2088_v25  ;;  %v2105_v47 = vld [vmem:[%s2586_s6 + $0xc8] sm:$0xff]   ;;  %v2109_v52 = vld [vmem:[%s2586_s6 + $0xc0] sm:$0xff]   ;;  %v2114_v61 = vld [vmem:[%s2586_s6 + $0x1f8] sm:$0xff]  }
  0x8a   : > { %1906 = vmatprep.subr.bf16.mxu0 %v2091_v28  ;;  %v2106_v48 = vld [vmem:[%s2586_s6 + $0x88] sm:$0xff]   ;;  %v841_v53 = vld [vmem:[%s2625_s10] sm:$0xff]  ;;  %v2115_v63 = vld [vmem:[%s2586_s6 + $0x1b8] sm:$0xff]  }
  0x8b   : > { %1927 = vmatpush3.bf16.msra.mxu1 %v2090_v27  ;;  %v1005_v54 = vrot.slane %v841_v53, %v2627_v50  ;;  %v2110_v55 = vld [vmem:[%s2586_s6 + $0x80] sm:$0xff]   ;;  %v998_v56 = vcombine.high %v841_v53, %v841_v53  ;;  %v2116_v0 = vld [vmem:[%s2586_s6 + $0x170] sm:$0xff]   ;;  %v2120_v4 = vld [vmem:[%s2586_s6 + $0x168] sm:$0xff]  }
  0x8c   : > { %1928 = vmatprep.subr.bf16.mxu1 %v2093_v30  ;;  %v2117_v1 = vld [vmem:[%s2586_s6 + $0x130] sm:$0xff]   ;;  %v2121_v5 = vld [vmem:[%s2586_s6 + $0x128] sm:$0xff]   ;;  %v2124_v8 = vld [vmem:[%s2586_s6 + $0x160] sm:$0xff]  }
  0x8d   : > { %1907 = vmatpush3.bf16.msra.mxu0 %v2092_v29  ;;  %v1013_v58 = vcombine.high %v1005_v54, %v1005_v54  ;;  %v1012_v59 = vrot.slane %v998_v56, %v2627_v50  ;;  %v2118_v2 = vld [vmem:[%s2586_s6 + $0x1f0] sm:$0xff]   ;;  %v2122_v6 = vld [vmem:[%s2586_s6 + $0x1e8] sm:$0xff]   ;;  %v2125_v9 = vld [vmem:[%s2586_s6 + $0x120] sm:$0xff]  }
  0x8e   : > { %1908 = vmatprep.subr.bf16.mxu0 %v2095_v32  ;;  %v2119_v3 = vld [vmem:[%s2586_s6 + $0x1b0] sm:$0xff]   ;;  %v2123_v7 = vld [vmem:[%s2586_s6 + $0x1a8] sm:$0xff]   ;;  %v2126_v10 = vld [vmem:[%s2586_s6 + $0x1e0] sm:$0xff]  }
  0x8f   : > { %1929 = vmatpush3.bf16.msra.mxu1 %v2094_v31  ;;  %1512 = vmatprep.mubr.bf16.mxu0 %v1013_v58  ;;  %v1014_v62 = vcombine.high %v1012_v59, %v1012_v59  ;;  %v2127_v11 = vld [vmem:[%s2586_s6 + $0x1a0] sm:$0xff]   ;;  %v2128_v12 = vld [vmem:[%s2586_s6 + $0x158] sm:$0xff]   ;;  %v2132_v16 = vld [vmem:[%s2586_s6 + $0x150] sm:$0xff]  }
  0x90   : > { %1930 = vmatprep.subr.bf16.mxu1 %v2097_v34  ;;  %v2129_v13 = vld [vmem:[%s2586_s6 + $0x118] sm:$0xff]   ;;  %v2133_v17 = vld [vmem:[%s2586_s6 + $0x110] sm:$0xff]   ;;  %v2136_v20 = vld [vmem:[%s2586_s6 + $0x148] sm:$0xff]   ;;  %v2212_v34 = vmov 0.0  }
  0x91   : > { %1909 = vmatpush3.bf16.msra.mxu0 %v2096_v33  ;;  %1552 = vmatprep.mubr.bf16.mxu1 %v1014_v62  ;;  %v2130_v14 = vld [vmem:[%s2586_s6 + $0x1d8] sm:$0xff]   ;;  %v2134_v18 = vld [vmem:[%s2586_s6 + $0x1d0] sm:$0xff]   ;;  %v2137_v21 = vld [vmem:[%s2586_s6 + $0x108] sm:$0xff]  }
  0x92   : > { %1910 = vmatprep.subr.bf16.mxu0 %v2099_v37  ;;  %v2131_v15 = vld [vmem:[%s2586_s6 + $0x198] sm:$0xff]   ;;  %v2135_v19 = vld [vmem:[%s2586_s6 + $0x190] sm:$0xff]   ;;  %v2138_v22 = vld [vmem:[%s2586_s6 + $0x1c8] sm:$0xff]  }
  0x93   : > { %1931 = vmatpush3.bf16.msra.mxu1 %v2098_v35  ;;  %v2139_v23 = vld [vmem:[%s2586_s6 + $0x188] sm:$0xff]   ;;  %v2140_v24 = vld [vmem:[%s2586_s6 + $0x140] sm:$0xff]   ;;  %v2145_v33 = vld [vmem:[%s2586_s6 + $0x238] sm:$0xff]  }
  0x94   : > { %1932 = vmatprep.subr.bf16.mxu1 %v2101_v41  ;;  %v2141_v25 = vld [vmem:[%s2586_s6 + $0x100] sm:$0xff]   ;;  %v842_v27 = vld [vmem:[%s2625_s10 + $0x8] sm:$0xff]  ;;  %v2146_v36 = vld [vmem:[%s2586_s6 + $0x230] sm:$0xff]  }
  0x95   : > { %1911 = vmatpush3.bf16.msra.mxu0 %v2100_v40  ;;  %v2142_v26 = vld [vmem:[%s2586_s6 + $0x1c0] sm:$0xff]   ;;  %v1022_v28 = vrot.slane %v842_v27, %v2627_v50  ;;  %v1015_v30 = vcombine.high %v842_v27, %v842_v27  ;;  %v2147_v37 = vld [vmem:[%s2586_s6 + $0x228] sm:$0xff]   ;;  %v2149_v39 = vld [vmem:[%s2586_s6 + $0x218] sm:$0xff]  }
  0x96   : > { %1912 = vmatprep.subr.bf16.mxu0 %v2103_v44  ;;  %v2143_v29 = vld [vmem:[%s2586_s6 + $0x180] sm:$0xff]   ;;  %v2150_v40 = vld [vmem:[%s2586_s6 + $0x210] sm:$0xff]   ;;  %v2151_v41 = vld [vmem:[%s2586_s6 + $0x208] sm:$0xff]  }
  0x97   : > { %1933 = vmatpush3.bf16.msra.mxu1 %v2102_v42  ;;  %v1030_v31 = vcombine.high %v1022_v28, %v1022_v28  ;;  %v1029_v32 = vrot.slane %v1015_v30, %v2627_v50  ;;  %v2148_v38 = vld [vmem:[%s2586_s6 + $0x220] sm:$0xff]   ;;  %v1825_v43 = vld.sshfl [vmem:[%s2625_s10 + $0x10] sm:$0x3 pattern:$0x76325410] }
  0x98   : > { %1934 = vmatprep.subr.bf16.mxu1 %v2105_v47  ;;  %v2152_v42 = vld [vmem:[%s2586_s6 + $0x200] sm:$0xff]  }
  0x99   : > { %1913 = vmatpush3.bf16.msra.mxu0 %v2104_v46  ;;  %v1031_v35 = vcombine.high %v1029_v32, %v1029_v32 }
  0x9a   : > { %1914 = vmatprep.subr.bf16.mxu0 %v2107_v49 }
  0x9b   : > { %1935 = vmatpush3.bf16.msra.mxu1 %v2106_v48 }
  0x9c   : > { %1936 = vmatprep.subr.bf16.mxu1 %v2109_v52 }
  0x9d   : > { %1915 = vmatpush3.bf16.msra.mxu0 %v2108_v51 }
  0x9e   : > { %1944 = vmatprep.subr.bf16.mxu0 %v2111_v57 }
  0x9f   : > { %1937 = vmatpush3.bf16.msra.mxu1 %v2110_v55 }
  0xa0   : > { %1513 = vmatmul.mubr.bf16.vlgmr.msra.gmra.mxu0 %v1005_v54  ;;  %1966 = vmatprep.subr.bf16.mxu1 %v2114_v61  ;;  %v1824_v61 = vld [vmem:[%s831_s21] ss:$0 sm:$0xff] }
  0xa1   : > { %1945 = vmatpush3.bf16.msra.mxu0 %v2113_v60  ;;  %1592 = vmatprep.mubr.bf16.mxu0 %v1030_v31 }
  0xa2   : > { %1553 = vmatmul.mubr.bf16.vlgmr.msra.gmra.mxu1 %v1012_v59  ;;  %1946 = vmatprep.subr.bf16.mxu0 %v2116_v0 }
  0xa3   : > { %1967 = vmatpush3.bf16.msra.mxu1 %v2115_v63  ;;  %1632 = vmatprep.mubr.bf16.mxu1 %v1031_v35 }
  0xa4   : > { %1968 = vmatprep.subr.bf16.mxu1 %v2118_v2 }
  0xa5   : > { %1947 = vmatpush3.bf16.msra.mxu0 %v2117_v1 }
  0xa6   : > { %1948 = vmatprep.subr.bf16.mxu0 %v2120_v4 }
  0xa7   : > { %1969 = vmatpush3.bf16.msra.mxu1 %v2119_v3 }
  0xa8   : > { %1970 = vmatprep.subr.bf16.mxu1 %v2122_v6 }
  0xa9   : > { %1949 = vmatpush3.bf16.msra.mxu0 %v2121_v5 }
  0xaa   : > { %1950 = vmatprep.subr.bf16.mxu0 %v2124_v8 }
  0xab   : > { %1971 = vmatpush3.bf16.msra.mxu1 %v2123_v7 }
  0xac   : > { %1972 = vmatprep.subr.bf16.mxu1 %v2126_v10 }
  0xad   : > { %1951 = vmatpush3.bf16.msra.mxu0 %v2125_v9 }
  0xae   : > { %1952 = vmatprep.subr.bf16.mxu0 %v2128_v12 }
  0xaf   : > { %1973 = vmatpush3.bf16.msra.mxu1 %v2127_v11 }
  0xb0   : > { %1974 = vmatprep.subr.bf16.mxu1 %v2130_v14 }
  0xb1   : > { %1953 = vmatpush3.bf16.msra.mxu0 %v2129_v13 }
  0xb2   : > { %1954 = vmatprep.subr.bf16.mxu0 %v2132_v16 }
  0xb3   : > { %1975 = vmatpush3.bf16.msra.mxu1 %v2131_v15 }
  0xb4   : > { %1976 = vmatprep.subr.bf16.mxu1 %v2134_v18 }
  0xb5   : > { %1955 = vmatpush3.bf16.msra.mxu0 %v2133_v17 }
  0xb6   : > { %1956 = vmatprep.subr.bf16.mxu0 %v2136_v20 }
  0xb7   : > { %1977 = vmatpush3.bf16.msra.mxu1 %v2135_v19 }
  0xb8   : > { %1978 = vmatprep.subr.bf16.mxu1 %v2138_v22 }
  0xb9   : > { %1957 = vmatpush3.bf16.msra.mxu0 %v2137_v21 }
  0xba   : > { %1958 = vmatprep.subr.bf16.mxu0 %v2140_v24 }
  0xbb   : > { %1979 = vmatpush3.bf16.msra.mxu1 %v2139_v23 }
  0xbc   : > { %1980 = vmatprep.subr.bf16.mxu1 %v2142_v26 }
  0xbd   : > { %1959 = vmatpush3.bf16.msra.mxu0 %v2141_v25 }
  0xbe   : > { %1997 = vmatprep.subr.bf16.mxu0 %v2212_v34 }
  0xbf   : > { %1981 = vmatpush3.bf16.msra.mxu1 %v2143_v29 }
  0xc0   : > { %1593 = vmatmul.mubr.bf16.vlgmr.msra.gmra.mxu0 %v1022_v28 }
  0xc1   : > { %1998 = vmatpush3.bf16.msra.mxu0 %v2145_v33  ;;  %2013 = vmatprep.mubr.msk.bf16.mxu0 %vm2213_vm0, %v2212_v34 }
  0xc2   : > { %1633 = vmatmul.mubr.bf16.vlgmr.msra.gmra.mxu1 %v1029_v32  ;;  %1999 = vmatprep.subr.bf16.mxu0 %v2212_v34 }
  0xc5   : > { %2000 = vmatpush3.bf16.msra.mxu0 %v2146_v36 }
  0xc6   : > { %2001 = vmatprep.subr.bf16.mxu0 %v2212_v34 }
  0xc9   : > { %2002 = vmatpush3.bf16.msra.mxu0 %v2147_v37 }
  0xca   : > { %2003 = vmatprep.subr.bf16.mxu0 %v2212_v34 }
  0xcd   : > { %2004 = vmatpush3.bf16.msra.mxu0 %v2148_v38 }
  0xce   : > { %2005 = vmatprep.subr.bf16.mxu0 %v2212_v34 }
  0xd1   : > { %2006 = vmatpush3.bf16.msra.mxu0 %v2149_v39 }
  0xd2   : > { %2007 = vmatprep.subr.bf16.mxu0 %v2212_v34 }
  0xd5   : > { %2008 = vmatpush3.bf16.msra.mxu0 %v2150_v40 }
  0xd6   : > { %2009 = vmatprep.subr.bf16.mxu0 %v2212_v34 }
  0xd9   : > { %2010 = vmatpush3.bf16.msra.mxu0 %v2151_v41 }
  0xda   : > { %2011 = vmatprep.subr.bf16.mxu0 %v2212_v34 }
  0xdd   : > { %2012 = vmatpush3.bf16.msra.mxu0 %v2152_v42 }
  0xe0   : > { %2014 = vmatmul.mubr.bf16.vlgmr.msra.gmra.mxu0 %v1825_v43 }
 0x160   : > { %v1916_v44 = vpop.f32.mrf.mxu0 }
 0x162   : > { %v1917_v45 = vpop.f32.mrf.mxu0  ;;  %v1938_v46 = vpop.f32.mrf.mxu1 }
 0x163   : > { %v1918_v60 = vadd.f32 %v1917_v45, %v1916_v44 }
 0x164   : > { %v1919_v47 = vpop.f32.mrf.mxu0  ;;  %v1939_v48 = vpop.f32.mrf.mxu1 }
 0x165   : > { %v1515_v62 = vadd.f32 %v1918_v60, %v1824_v61  ;;  %v1940_v63 = vadd.f32 %v1939_v48, %v1938_v46 }
 0x166   : > { %v1920_v49 = vpop.f32.mrf.mxu0  ;;  %v1941_v50 = vpop.f32.mrf.mxu1 }
 0x167   : > { %v1555_v1 = vadd.f32 %v1940_v63, %v1515_v62 }
 0x168   : > { %v1942_v51 = vpop.f32.mrf.mxu1 }
 0x180   : > { %v1960_v52 = vpop.f32.mrf.mxu0 }
 0x182   : > { %v1961_v53 = vpop.f32.mrf.mxu0  ;;  %v1982_v54 = vpop.f32.mrf.mxu1 }
 0x183   : > { %v1962_v0 = vadd.f32 %v1961_v53, %v1960_v52 }
 0x184   : > { %v1963_v55 = vpop.f32.mrf.mxu0  ;;  %v1983_v56 = vpop.f32.mrf.mxu1 }
 0x185   : > { %v1595_v2 = vadd.f32 %v1962_v0, %v1555_v1  ;;  %v1984_v3 = vadd.f32 %v1983_v56, %v1982_v54 }
 0x186   : > { %v1964_v57 = vpop.f32.mrf.mxu0  ;;  %v1985_v58 = vpop.f32.mrf.mxu1 }
 0x187   : > { %v1635_v4 = vadd.f32 %v1984_v3, %v1595_v2 }
 0x188   : > { %v1986_v59 = vpop.f32.mrf.mxu1 }
 0x1a0   : > { %v1674_v5 = vpop.f32.mrf.mxu0 }
 0x1a1   : > { %v1675_v6 = vadd.f32 %v1674_v5, %v1635_v4 }
 0x1a2   : > { %v2015_v7 = vpop.f32.mrf.mxu0 }
 0x1a3   : > { %v1681_v8 = vsel %vm1680_vm1, %v1675_v6, 0.0 }
 0x1a4   : > { %v1682_v9 = vrot.slane %v1681_v8, 4  ;;  %v1677_v10 = vpop.f32.mrf.mxu0 }
 0x1a6   : > { %v1683_v11 = vadd.f32 %v1682_v9, %v1681_v8  ;;  %v2016_v12 = vpop.f32.mrf.mxu0 }
 0x1a8   : > { %v1684_v13 = vrot.slane %v1683_v11, 2 }
 0x1aa   : > { %v1685_v14 = vadd.f32 %v1684_v13, %v1683_v11 }
 0x1ac   : > { %v1686_v15 = vrot.slane %v1685_v14, 1 }
 0x1ae   : > { %v1687_v16 = vadd.f32 %v1686_v15, %v1685_v14 }
 0x1b0   : > { %v1689_v17 = vmul.f32 0.25, %v1687_v16 }
 0x1b2   : > { %v1690_v18 = vsub.f32 %v1675_v6, %v1689_v17 }
 0x1b4   : > { %v1691_v19 = vmul.f32 %v1690_v18, %v1690_v18 }
 0x1b6   : > { %v1692_v20 = vsel %vm1680_vm1, %v1691_v19, 0.0 }
 0x1b7   : > { %v1693_v21 = vrot.slane %v1692_v20, 4 }
 0x1b9   : > { %v1694_v22 = vadd.f32 %v1693_v21, %v1692_v20 }
 0x1bb   : > { %v1695_v23 = vrot.slane %v1694_v22, 2 }
 0x1bd   : > { %v1696_v24 = vadd.f32 %v1695_v23, %v1694_v22 }
 0x1bf   : > { %v1697_v25 = vrot.slane %v1696_v24, 1 }
 0x1c1   : > { %v1698_v26 = vadd.f32 %v1697_v25, %v1696_v24 }
 0x1c3   : > { %v1699_v27 = vmul.f32 0.25, %v1698_v26 }
 0x1c5   : > { %v1700_v28 = vadd.f32 1e-05, %v1699_v27 }
 0x1c7   : > { %2153 = vrsqrt.f32 %v1700_v28 }
 0x1d4   : > { %v2154_v29 = vpop.eup %2153 }
 0x1d5   : > { %v1702_v30 = vmul.f32 %v2154_v29, %v1690_v18 }
 0x1d7   : > { %vm1703_vm2 = vcmp.gt.f32.partialorder %v1702_v30, 0.0  ;;  %v1704_v31 = vmul.f32 0.2, %v1702_v30 }
 0x1d9   : > { %v1705_v32 = vsel %vm1703_vm2, %v1702_v30, %v1704_v31 }
 0x1da   : > { %v1706_v33 = vpack.c.bf16 %v1705_v32, %v1705_v32 }
 0x1dc   : > { %1707 = vst [vmem:[%s839_s28] sm:$0x3] %v1706_v33 }
 0x1dd PF: > { %s13_s18 = sadd.s32 1, %s2209_s18   ;;  %s2717_s12 = smov %s2189_s13 }
 0x1de   : > { %p10_p12 = scmp.ge.s32.totalorder %s13_s18, 6   ;;  %s2718_s13 = smov %s2283_s23 }
 0x1df   : > { %s2719_s14 = smov %s2201_s16  ;;  %s2720_s15 = smov %s2205_s17 }
 0x1e0   : > { %s2721_s16 = smov %s2724_s19  ;;  %s2722_s17 = smov %s2728_s20 }
 0x1e1   :  { %12 = sbr.rel (!%p10_p12) target bundleno = 4 (0x4), region = 114 }

// kernel: discriminator_forward.8
= control target key start
LH: loop header
LB: loop body
LE: loop exit
PB: predicated region body
PF: predicated region fallthrough
CT: control target
= control target key end

     0   :  { %s3817_s12 = smov 0   ;;  %s3819_s13 = smov 0   ;;  %s4662_s0 = inlined_call_operand.vmem [shape: bf16[2,4,2304], index: 0, kind: input, shape index: {}]   ;;  %s4663_s1 = inlined_call_operand.vmem [shape: bf16[2304,512], index: 1, kind: input, shape index: {}]   ;;  %s4664_s2 = inlined_call_operand.vmem [shape: f32[1,512], index: 2, kind: input, shape index: {}]   ;;  %s4665_s3 = inlined_call_operand.vmem [shape: bf16[2,4,512], index: 3, kind: output, shape index: {}]  }
   0x1   :  { %s3821_s14 = smov 0   ;;  %s3823_s15 = smov 0  }
   0x2   :  { %s3825_s16 = smov 0   ;;  %s3827_s17 = smov 0  }
   0x3   :  { %s3829_s18 = smov 0  }
   0x4 LB: > { %s22_s19 = sadd.s32 1, %s3786_s16  ;;  %s25_s20 = sadd.s32 1, %s3790_s17  ;;  %s3794_s18 = sphi %s3829_s18, %s13_s18   ;;  %s3790_s17 = sphi %s3827_s17, %s4671_s17   ;;  %s3786_s16 = sphi %s3825_s16, %s4670_s16   ;;  %s3782_s15 = sphi %s3823_s15, %s4669_s15   ;;  %s3778_s14 = sphi %s3821_s14, %s4668_s14   ;;  %s3774_s13 = sphi %s3819_s13, %s4667_s13   ;;  %s3770_s12 = sphi %s3817_s12, %s4666_s12  }
   0x5   : > { %p23_p0 = scmp.ge.s32.totalorder %s22_s19, 4  ;;  %s58_s21 = sadd.s32 1, %s3774_s13 }
   0x6   : > { %p65_p1 = scmp.ne.s32.totalorder %s3774_s13, %s3770_s12  ;;  %p66_p2 = scmp.eq.s32.totalorder %s3794_s18, 0 }
   0x7   : > { %s4673_s19 = smov (%p23_p0, %s22_s19), 0  ;;  %s4675_s20 = smov (!%p23_p0, %s25_s20), %s3790_s17 }
   0x8   : > { %s55_s22 = ssub.s32 %s3786_s16, %s4673_s19  ;;  %p67_p3 = por %p66_p2, %p65_p1 }
   0x9   : > { %p27_p4 = scmp.ge.s32.totalorder %s4675_s20, 2  ;;  %p56_p5 = scmp.eq.s32.totalorder %s55_s22, 0 }
   0xa   : > { %p3178_p6 = scmp.ge.s32.totalorder %s3794_s18, 8 }
   0xb   : > { %s4677_s20 = smov (%p27_p4, %s4675_s20), 0 }
   0xc   : > { %s3866_s23 = scalar_select %p56_p5, %s3774_s13, %s58_s21  }
   0xd   : > { %145 = sbr.rel (%p3178_p6) target bundleno = 214 (0xd6), region = 16 }
  0x12   : > { %156 = sbr.rel (!%p67_p3) target bundleno = 214 (0xd6), region = 24  ;;  %s158_s24 = sand.u32 (%p67_p3), 1, %s3774_s13  }
  0x13   : > { %s3179_s25 = sshll.u32 (%p67_p3), %s3786_s16, 2  ;;  %s3530_s26 = smul.u32 (%p67_p3), 1152, %s158_s24 }
  0x14   : > { %s3874_s29 = scalar_lea.vmem (%p67_p3), %s4663_s1, %s3179_s25 }
  0x15   : > { %v179_v0 = vld [vmem:[%s3874_s29] sm:$0xf] (%p67_p3)  ;;  %v181_v1 = vld [vmem:[%s3874_s29 + $0x10] sm:$0xf] (%p67_p3)  ;;  %s3881_s30 = scalar_lea.vmem (%p67_p3), [#allocation2], %s3530_s26 }
  0x16   : > { %v183_v2 = vld [vmem:[%s3874_s29 + $0x20] sm:$0xf] (%p67_p3)  ;;  %v185_v3 = vld [vmem:[%s3874_s29 + $0x30] sm:$0xf] (%p67_p3)  ;;  %180 = vst [vmem:[%s3881_s30] sm:$0xf] (%p67_p3), %v179_v0 }
  0x17   : > { %v187_v4 = vld [vmem:[%s3874_s29 + $0x40] sm:$0xf]  ;;  %182 = vst [vmem:[%s3881_s30 + $0x4] sm:$0xf] %v181_v1  ;;  %184 = vst [vmem:[%s3881_s30 + $0x8] sm:$0xf] %v183_v2 }
  0x18   : > { %186 = vst [vmem:[%s3881_s30 + $0xc] sm:$0xf] %v185_v3  ;;  %188 = vst [vmem:[%s3881_s30 + $0x10] sm:$0xf] %v187_v4  ;;  %v189_v5 = vld [vmem:[%s3874_s29 + $0x50] sm:$0xf] }
  0x19   : > { %v191_v6 = vld [vmem:[%s3874_s29 + $0x60] sm:$0xf]  ;;  %v193_v7 = vld [vmem:[%s3874_s29 + $0x70] sm:$0xf]  ;;  %190 = vst [vmem:[%s3881_s30 + $0x14] sm:$0xf] %v189_v5 }
  0x1a   : > { %192 = vst [vmem:[%s3881_s30 + $0x18] sm:$0xf] %v191_v6  ;;  %194 = vst [vmem:[%s3881_s30 + $0x1c] sm:$0xf] %v193_v7  ;;  %v195_v8 = vld [vmem:[%s3874_s29 + $0x80] sm:$0xf] }
  0x1b   : > { %v197_v9 = vld [vmem:[%s3874_s29 + $0x90] sm:$0xf]  ;;  %v199_v10 = vld [vmem:[%s3874_s29 + $0xa0] sm:$0xf]  ;;  %196 = vst [vmem:[%s3881_s30 + $0x20] sm:$0xf] %v195_v8 }
  0x1c   : > { %198 = vst [vmem:[%s3881_s30 + $0x24] sm:$0xf] %v197_v9  ;;  %200 = vst [vmem:[%s3881_s30 + $0x28] sm:$0xf] %v199_v10  ;;  %v201_v11 = vld [vmem:[%s3874_s29 + $0xb0] sm:$0xf] }
  0x1d   : > { %v203_v12 = vld [vmem:[%s3874_s29 + $0xc0] sm:$0xf]  ;;  %v205_v13 = vld [vmem:[%s3874_s29 + $0xd0] sm:$0xf]  ;;  %202 = vst [vmem:[%s3881_s30 + $0x2c] sm:$0xf] %v201_v11 }
  0x1e   : > { %204 = vst [vmem:[%s3881_s30 + $0x30] sm:$0xf] %v203_v12  ;;  %206 = vst [vmem:[%s3881_s30 + $0x34] sm:$0xf] %v205_v13  ;;  %v207_v14 = vld [vmem:[%s3874_s29 + $0xe0] sm:$0xf] }
  0x1f   : > { %v209_v15 = vld [vmem:[%s3874_s29 + $0xf0] sm:$0xf]  ;;  %v211_v16 = vld [vmem:[%s3874_s29 + $0x100] sm:$0xf]  ;;  %208 = vst [vmem:[%s3881_s30 + $0x38] sm:$0xf] %v207_v14 }
  0x20   : > { %210 = vst [vmem:[%s3881_s30 + $0x3c] sm:$0xf] %v209_v15  ;;  %212 = vst [vmem:[%s3881_s30 + $0x40] sm:$0xf] %v211_v16  ;;  %v213_v17 = vld [vmem:[%s3874_s29 + $0x110] sm:$0xf] }
  0x21   : > { %v215_v18 = vld [vmem:[%s3874_s29 + $0x120] sm:$0xf]  ;;  %v217_v19 = vld [vmem:[%s3874_s29 + $0x130] sm:$0xf]  ;;  %214 = vst [vmem:[%s3881_s30 + $0x44] sm:$0xf] %v213_v17 }
  0x22   : > { %216 = vst [vmem:[%s3881_s30 + $0x48] sm:$0xf] %v215_v18  ;;  %218 = vst [vmem:[%s3881_s30 + $0x4c] sm:$0xf] %v217_v19  ;;  %v219_v20 = vld [vmem:[%s3874_s29 + $0x140] sm:$0xf] }
  0x23   : > { %v221_v21 = vld [vmem:[%s3874_s29 + $0x150] sm:$0xf]  ;;  %v223_v22 = vld [vmem:[%s3874_s29 + $0x160] sm:$0xf]  ;;  %220 = vst [vmem:[%s3881_s30 + $0x50] sm:$0xf] %v219_v20 }
  0x24   : > { %222 = vst [vmem:[%s3881_s30 + $0x54] sm:$0xf] %v221_v21  ;;  %224 = vst [vmem:[%s3881_s30 + $0x58] sm:$0xf] %v223_v22  ;;  %v225_v23 = vld [vmem:[%s3874_s29 + $0x170] sm:$0xf] }
  0x25   : > { %v227_v24 = vld [vmem:[%s3874_s29 + $0x180] sm:$0xf]  ;;  %v229_v25 = vld [vmem:[%s3874_s29 + $0x190] sm:$0xf]  ;;  %226 = vst [vmem:[%s3881_s30 + $0x5c] sm:$0xf] %v225_v23 }
  0x26   : > { %228 = vst [vmem:[%s3881_s30 + $0x60] sm:$0xf] %v227_v24  ;;  %230 = vst [vmem:[%s3881_s30 + $0x64] sm:$0xf] %v229_v25  ;;  %v231_v26 = vld [vmem:[%s3874_s29 + $0x1a0] sm:$0xf] }
  0x27   : > { %v233_v27 = vld [vmem:[%s3874_s29 + $0x1b0] sm:$0xf]  ;;  %v235_v28 = vld [vmem:[%s3874_s29 + $0x1c0] sm:$0xf]  ;;  %232 = vst [vmem:[%s3881_s30 + $0x68] sm:$0xf] %v231_v26 }
  0x28   : > { %234 = vst [vmem:[%s3881_s30 + $0x6c] sm:$0xf] %v233_v27  ;;  %236 = vst [vmem:[%s3881_s30 + $0x70] sm:$0xf] %v235_v28  ;;  %v237_v29 = vld [vmem:[%s3874_s29 + $0x1d0] sm:$0xf] }
  0x29   : > { %v239_v30 = vld [vmem:[%s3874_s29 + $0x1e0] sm:$0xf]  ;;  %v241_v31 = vld [vmem:[%s3874_s29 + $0x1f0] sm:$0xf]  ;;  %238 = vst [vmem:[%s3881_s30 + $0x74] sm:$0xf] %v237_v29 }
  0x2a   : > { %240 = vst [vmem:[%s3881_s30 + $0x78] sm:$0xf] %v239_v30  ;;  %242 = vst [vmem:[%s3881_s30 + $0x7c] sm:$0xf] %v241_v31  ;;  %v243_v32 = vld [vmem:[%s3874_s29 + $0x200] sm:$0xf] }
  0x2b   : > { %v245_v33 = vld [vmem:[%s3874_s29 + $0x210] sm:$0xf]  ;;  %v247_v34 = vld [vmem:[%s3874_s29 + $0x220] sm:$0xf]  ;;  %244 = vst [vmem:[%s3881_s30 + $0x80] sm:$0xf] %v243_v32 }
  0x2c   : > { %246 = vst [vmem:[%s3881_s30 + $0x84] sm:$0xf] %v245_v33  ;;  %248 = vst [vmem:[%s3881_s30 + $0x88] sm:$0xf] %v247_v34  ;;  %v249_v35 = vld [vmem:[%s3874_s29 + $0x230] sm:$0xf] }
  0x2d   : > { %v251_v36 = vld [vmem:[%s3874_s29 + $0x240] sm:$0xf]  ;;  %v253_v37 = vld [vmem:[%s3874_s29 + $0x250] sm:$0xf]  ;;  %250 = vst [vmem:[%s3881_s30 + $0x8c] sm:$0xf] %v249_v35 }
  0x2e   : > { %252 = vst [vmem:[%s3881_s30 + $0x90] sm:$0xf] %v251_v36  ;;  %254 = vst [vmem:[%s3881_s30 + $0x94] sm:$0xf] %v253_v37  ;;  %v255_v38 = vld [vmem:[%s3874_s29 + $0x260] sm:$0xf] }
  0x2f   : > { %v257_v39 = vld [vmem:[%s3874_s29 + $0x270] sm:$0xf]  ;;  %v259_v40 = vld [vmem:[%s3874_s29 + $0x280] sm:$0xf]  ;;  %256 = vst [vmem:[%s3881_s30 + $0x98] sm:$0xf] %v255_v38 }
  0x30   : > { %258 = vst [vmem:[%s3881_s30 + $0x9c] sm:$0xf] %v257_v39  ;;  %260 = vst [vmem:[%s3881_s30 + $0xa0] sm:$0xf] %v259_v40  ;;  %v261_v41 = vld [vmem:[%s3874_s29 + $0x290] sm:$0xf] }
  0x31   : > { %v263_v42 = vld [vmem:[%s3874_s29 + $0x2a0] sm:$0xf]  ;;  %v265_v43 = vld [vmem:[%s3874_s29 + $0x2b0] sm:$0xf]  ;;  %262 = vst [vmem:[%s3881_s30 + $0xa4] sm:$0xf] %v261_v41 }
  0x32   : > { %264 = vst [vmem:[%s3881_s30 + $0xa8] sm:$0xf] %v263_v42  ;;  %266 = vst [vmem:[%s3881_s30 + $0xac] sm:$0xf] %v265_v43  ;;  %v267_v44 = vld [vmem:[%s3874_s29 + $0x2c0] sm:$0xf] }
  0x33   : > { %v269_v45 = vld [vmem:[%s3874_s29 + $0x2d0] sm:$0xf]  ;;  %v271_v46 = vld [vmem:[%s3874_s29 + $0x2e0] sm:$0xf]  ;;  %268 = vst [vmem:[%s3881_s30 + $0xb0] sm:$0xf] %v267_v44 }
  0x34   : > { %270 = vst [vmem:[%s3881_s30 + $0xb4] sm:$0xf] %v269_v45  ;;  %272 = vst [vmem:[%s3881_s30 + $0xb8] sm:$0xf] %v271_v46  ;;  %v273_v47 = vld [vmem:[%s3874_s29 + $0x2f0] sm:$0xf] }
  0x35   : > { %v275_v48 = vld [vmem:[%s3874_s29 + $0x300] sm:$0xf]  ;;  %v277_v49 = vld [vmem:[%s3874_s29 + $0x310] sm:$0xf]  ;;  %274 = vst [vmem:[%s3881_s30 + $0xbc] sm:$0xf] %v273_v47 }
  0x36   : > { %276 = vst [vmem:[%s3881_s30 + $0xc0] sm:$0xf] %v275_v48  ;;  %278 = vst [vmem:[%s3881_s30 + $0xc4] sm:$0xf] %v277_v49  ;;  %v279_v50 = vld [vmem:[%s3874_s29 + $0x320] sm:$0xf] }
  0x37   : > { %v281_v51 = vld [vmem:[%s3874_s29 + $0x330] sm:$0xf]  ;;  %v283_v52 = vld [vmem:[%s3874_s29 + $0x340] sm:$0xf]  ;;  %280 = vst [vmem:[%s3881_s30 + $0xc8] sm:$0xf] %v279_v50 }
  0x38   : > { %282 = vst [vmem:[%s3881_s30 + $0xcc] sm:$0xf] %v281_v51  ;;  %284 = vst [vmem:[%s3881_s30 + $0xd0] sm:$0xf] %v283_v52  ;;  %v285_v53 = vld [vmem:[%s3874_s29 + $0x350] sm:$0xf] }
  0x39   : > { %v287_v54 = vld [vmem:[%s3874_s29 + $0x360] sm:$0xf]  ;;  %v289_v55 = vld [vmem:[%s3874_s29 + $0x370] sm:$0xf]  ;;  %286 = vst [vmem:[%s3881_s30 + $0xd4] sm:$0xf] %v285_v53 }
  0x3a   : > { %288 = vst [vmem:[%s3881_s30 + $0xd8] sm:$0xf] %v287_v54  ;;  %290 = vst [vmem:[%s3881_s30 + $0xdc] sm:$0xf] %v289_v55  ;;  %v291_v56 = vld [vmem:[%s3874_s29 + $0x380] sm:$0xf] }
  0x3b   : > { %v293_v57 = vld [vmem:[%s3874_s29 + $0x390] sm:$0xf]  ;;  %v295_v58 = vld [vmem:[%s3874_s29 + $0x3a0] sm:$0xf]  ;;  %292 = vst [vmem:[%s3881_s30 + $0xe0] sm:$0xf] %v291_v56 }
  0x3c   : > { %294 = vst [vmem:[%s3881_s30 + $0xe4] sm:$0xf] %v293_v57  ;;  %296 = vst [vmem:[%s3881_s30 + $0xe8] sm:$0xf] %v295_v58  ;;  %v297_v59 = vld [vmem:[%s3874_s29 + $0x3b0] sm:$0xf] }
  0x3d   : > { %v299_v60 = vld [vmem:[%s3874_s29 + $0x3c0] sm:$0xf]  ;;  %v301_v61 = vld [vmem:[%s3874_s29 + $0x3d0] sm:$0xf]  ;;  %298 = vst [vmem:[%s3881_s30 + $0xec] sm:$0xf] %v297_v59 }
  0x3e   : > { %300 = vst [vmem:[%s3881_s30 + $0xf0] sm:$0xf] %v299_v60  ;;  %302 = vst [vmem:[%s3881_s30 + $0xf4] sm:$0xf] %v301_v61  ;;  %v303_v62 = vld [vmem:[%s3874_s29 + $0x3e0] sm:$0xf] }
  0x3f   : > { %v305_v63 = vld [vmem:[%s3874_s29 + $0x3f0] sm:$0xf]  ;;  %v307_v0 = vld [vmem:[%s3874_s29 + $0x400] sm:$0xf]  ;;  %304 = vst [vmem:[%s3881_s30 + $0xf8] sm:$0xf] %v303_v62 }
  0x40   : > { %306 = vst [vmem:[%s3881_s30 + $0xfc] sm:$0xf] %v305_v63  ;;  %308 = vst [vmem:[%s3881_s30 + $0x100] sm:$0xf] %v307_v0  ;;  %v309_v1 = vld [vmem:[%s3874_s29 + $0x410] sm:$0xf] }
  0x41   : > { %v311_v2 = vld [vmem:[%s3874_s29 + $0x420] sm:$0xf]  ;;  %v313_v3 = vld [vmem:[%s3874_s29 + $0x430] sm:$0xf]  ;;  %310 = vst [vmem:[%s3881_s30 + $0x104] sm:$0xf] %v309_v1 }
  0x42   : > { %312 = vst [vmem:[%s3881_s30 + $0x108] sm:$0xf] %v311_v2  ;;  %314 = vst [vmem:[%s3881_s30 + $0x10c] sm:$0xf] %v313_v3  ;;  %v315_v4 = vld [vmem:[%s3874_s29 + $0x440] sm:$0xf] }
  0x43   : > { %v317_v5 = vld [vmem:[%s3874_s29 + $0x450] sm:$0xf]  ;;  %v319_v6 = vld [vmem:[%s3874_s29 + $0x460] sm:$0xf]  ;;  %316 = vst [vmem:[%s3881_s30 + $0x110] sm:$0xf] %v315_v4 }
  0x44   : > { %318 = vst [vmem:[%s3881_s30 + $0x114] sm:$0xf] %v317_v5  ;;  %320 = vst [vmem:[%s3881_s30 + $0x118] sm:$0xf] %v319_v6  ;;  %v321_v7 = vld [vmem:[%s3874_s29 + $0x470] sm:$0xf] }
  0x45   : > { %v323_v8 = vld [vmem:[%s3874_s29 + $0x480] sm:$0xf]  ;;  %v325_v9 = vld [vmem:[%s3874_s29 + $0x490] sm:$0xf]  ;;  %322 = vst [vmem:[%s3881_s30 + $0x11c] sm:$0xf] %v321_v7 }
  0x46   : > { %324 = vst [vmem:[%s3881_s30 + $0x120] sm:$0xf] %v323_v8  ;;  %326 = vst [vmem:[%s3881_s30 + $0x124] sm:$0xf] %v325_v9  ;;  %v327_v10 = vld [vmem:[%s3874_s29 + $0x4a0] sm:$0xf] }
  0x47   : > { %v329_v11 = vld [vmem:[%s3874_s29 + $0x4b0] sm:$0xf]  ;;  %v331_v12 = vld [vmem:[%s3874_s29 + $0x4c0] sm:$0xf]  ;;  %328 = vst [vmem:[%s3881_s30 + $0x128] sm:$0xf] %v327_v10 }
  0x48   : > { %330 = vst [vmem:[%s3881_s30 + $0x12c] sm:$0xf] %v329_v11  ;;  %332 = vst [vmem:[%s3881_s30 + $0x130] sm:$0xf] %v331_v12  ;;  %v333_v13 = vld [vmem:[%s3874_s29 + $0x4d0] sm:$0xf] }
  0x49   : > { %v335_v14 = vld [vmem:[%s3874_s29 + $0x4e0] sm:$0xf]  ;;  %v337_v15 = vld [vmem:[%s3874_s29 + $0x4f0] sm:$0xf]  ;;  %334 = vst [vmem:[%s3881_s30 + $0x134] sm:$0xf] %v333_v13 }
  0x4a   : > { %336 = vst [vmem:[%s3881_s30 + $0x138] sm:$0xf] %v335_v14  ;;  %338 = vst [vmem:[%s3881_s30 + $0x13c] sm:$0xf] %v337_v15  ;;  %v339_v16 = vld [vmem:[%s3874_s29 + $0x500] sm:$0xf] }
  0x4b   : > { %v341_v17 = vld [vmem:[%s3874_s29 + $0x510] sm:$0xf]  ;;  %v343_v18 = vld [vmem:[%s3874_s29 + $0x520] sm:$0xf]  ;;  %340 = vst [vmem:[%s3881_s30 + $0x140] sm:$0xf] %v339_v16 }
  0x4c   : > { %342 = vst [vmem:[%s3881_s30 + $0x144] sm:$0xf] %v341_v17  ;;  %344 = vst [vmem:[%s3881_s30 + $0x148] sm:$0xf] %v343_v18  ;;  %v345_v19 = vld [vmem:[%s3874_s29 + $0x530] sm:$0xf] }
  0x4d   : > { %v347_v20 = vld [vmem:[%s3874_s29 + $0x540] sm:$0xf]  ;;  %v349_v21 = vld [vmem:[%s3874_s29 + $0x550] sm:$0xf]  ;;  %346 = vst [vmem:[%s3881_s30 + $0x14c] sm:$0xf] %v345_v19 }
  0x4e   : > { %348 = vst [vmem:[%s3881_s30 + $0x150] sm:$0xf] %v347_v20  ;;  %350 = vst [vmem:[%s3881_s30 + $0x154] sm:$0xf] %v349_v21  ;;  %v351_v22 = vld [vmem:[%s3874_s29 + $0x560] sm:$0xf] }
  0x4f   : > { %v353_v23 = vld [vmem:[%s3874_s29 + $0x570] sm:$0xf]  ;;  %v355_v24 = vld [vmem:[%s3874_s29 + $0x580] sm:$0xf]  ;;  %352 = vst [vmem:[%s3881_s30 + $0x158] sm:$0xf] %v351_v22 }
  0x50   : > { %354 = vst [vmem:[%s3881_s30 + $0x15c] sm:$0xf] %v353_v23  ;;  %356 = vst [vmem:[%s3881_s30 + $0x160] sm:$0xf] %v355_v24  ;;  %v357_v25 = vld [vmem:[%s3874_s29 + $0x590] sm:$0xf] }
  0x51   : > { %v359_v26 = vld [vmem:[%s3874_s29 + $0x5a0] sm:$0xf]  ;;  %v361_v27 = vld [vmem:[%s3874_s29 + $0x5b0] sm:$0xf]  ;;  %358 = vst [vmem:[%s3881_s30 + $0x164] sm:$0xf] %v357_v25 }
  0x52   : > { %360 = vst [vmem:[%s3881_s30 + $0x168] sm:$0xf] %v359_v26  ;;  %362 = vst [vmem:[%s3881_s30 + $0x16c] sm:$0xf] %v361_v27  ;;  %v363_v28 = vld [vmem:[%s3874_s29 + $0x5c0] sm:$0xf] }
  0x53   : > { %v365_v29 = vld [vmem:[%s3874_s29 + $0x5d0] sm:$0xf]  ;;  %v367_v30 = vld [vmem:[%s3874_s29 + $0x5e0] sm:$0xf]  ;;  %364 = vst [vmem:[%s3881_s30 + $0x170] sm:$0xf] %v363_v28 }
  0x54   : > { %366 = vst [vmem:[%s3881_s30 + $0x174] sm:$0xf] %v365_v29  ;;  %368 = vst [vmem:[%s3881_s30 + $0x178] sm:$0xf] %v367_v30  ;;  %v369_v31 = vld [vmem:[%s3874_s29 + $0x5f0] sm:$0xf] }
  0x55   : > { %v371_v32 = vld [vmem:[%s3874_s29 + $0x600] sm:$0xf]  ;;  %v373_v33 = vld [vmem:[%s3874_s29 + $0x610] sm:$0xf]  ;;  %370 = vst [vmem:[%s3881_s30 + $0x17c] sm:$0xf] %v369_v31 }
  0x56   : > { %372 = vst [vmem:[%s3881_s30 + $0x180] sm:$0xf] %v371_v32  ;;  %374 = vst [vmem:[%s3881_s30 + $0x184] sm:$0xf] %v373_v33  ;;  %v375_v34 = vld [vmem:[%s3874_s29 + $0x620] sm:$0xf] }
  0x57   : > { %v377_v35 = vld [vmem:[%s3874_s29 + $0x630] sm:$0xf]  ;;  %v379_v36 = vld [vmem:[%s3874_s29 + $0x640] sm:$0xf]  ;;  %376 = vst [vmem:[%s3881_s30 + $0x188] sm:$0xf] %v375_v34 }
  0x58   : > { %378 = vst [vmem:[%s3881_s30 + $0x18c] sm:$0xf] %v377_v35  ;;  %380 = vst [vmem:[%s3881_s30 + $0x190] sm:$0xf] %v379_v36  ;;  %v381_v37 = vld [vmem:[%s3874_s29 + $0x650] sm:$0xf] }
  0x59   : > { %v383_v38 = vld [vmem:[%s3874_s29 + $0x660] sm:$0xf]  ;;  %v385_v39 = vld [vmem:[%s3874_s29 + $0x670] sm:$0xf]  ;;  %382 = vst [vmem:[%s3881_s30 + $0x194] sm:$0xf] %v381_v37 }
  0x5a   : > { %384 = vst [vmem:[%s3881_s30 + $0x198] sm:$0xf] %v383_v38  ;;  %386 = vst [vmem:[%s3881_s30 + $0x19c] sm:$0xf] %v385_v39  ;;  %v387_v40 = vld [vmem:[%s3874_s29 + $0x680] sm:$0xf] }
  0x5b   : > { %v389_v41 = vld [vmem:[%s3874_s29 + $0x690] sm:$0xf]  ;;  %v391_v42 = vld [vmem:[%s3874_s29 + $0x6a0] sm:$0xf]  ;;  %388 = vst [vmem:[%s3881_s30 + $0x1a0] sm:$0xf] %v387_v40 }
  0x5c   : > { %390 = vst [vmem:[%s3881_s30 + $0x1a4] sm:$0xf] %v389_v41  ;;  %392 = vst [vmem:[%s3881_s30 + $0x1a8] sm:$0xf] %v391_v42  ;;  %v393_v43 = vld [vmem:[%s3874_s29 + $0x6b0] sm:$0xf] }
  0x5d   : > { %v395_v44 = vld [vmem:[%s3874_s29 + $0x6c0] sm:$0xf]  ;;  %v397_v45 = vld [vmem:[%s3874_s29 + $0x6d0] sm:$0xf]  ;;  %394 = vst [vmem:[%s3881_s30 + $0x1ac] sm:$0xf] %v393_v43 }
  0x5e   : > { %396 = vst [vmem:[%s3881_s30 + $0x1b0] sm:$0xf] %v395_v44  ;;  %398 = vst [vmem:[%s3881_s30 + $0x1b4] sm:$0xf] %v397_v45  ;;  %v399_v46 = vld [vmem:[%s3874_s29 + $0x6e0] sm:$0xf] }
  0x5f   : > { %v401_v47 = vld [vmem:[%s3874_s29 + $0x6f0] sm:$0xf]  ;;  %v403_v48 = vld [vmem:[%s3874_s29 + $0x700] sm:$0xf]  ;;  %400 = vst [vmem:[%s3881_s30 + $0x1b8] sm:$0xf] %v399_v46 }
  0x60   : > { %402 = vst [vmem:[%s3881_s30 + $0x1bc] sm:$0xf] %v401_v47  ;;  %404 = vst [vmem:[%s3881_s30 + $0x1c0] sm:$0xf] %v403_v48  ;;  %v405_v49 = vld [vmem:[%s3874_s29 + $0x710] sm:$0xf] }
  0x61   : > { %v407_v50 = vld [vmem:[%s3874_s29 + $0x720] sm:$0xf]  ;;  %v409_v51 = vld [vmem:[%s3874_s29 + $0x730] sm:$0xf]  ;;  %406 = vst [vmem:[%s3881_s30 + $0x1c4] sm:$0xf] %v405_v49 }
  0x62   : > { %408 = vst [vmem:[%s3881_s30 + $0x1c8] sm:$0xf] %v407_v50  ;;  %410 = vst [vmem:[%s3881_s30 + $0x1cc] sm:$0xf] %v409_v51  ;;  %v411_v52 = vld [vmem:[%s3874_s29 + $0x740] sm:$0xf] }
  0x63   : > { %v413_v53 = vld [vmem:[%s3874_s29 + $0x750] sm:$0xf]  ;;  %v415_v54 = vld [vmem:[%s3874_s29 + $0x760] sm:$0xf]  ;;  %412 = vst [vmem:[%s3881_s30 + $0x1d0] sm:$0xf] %v411_v52 }
  0x64   : > { %414 = vst [vmem:[%s3881_s30 + $0x1d4] sm:$0xf] %v413_v53  ;;  %416 = vst [vmem:[%s3881_s30 + $0x1d8] sm:$0xf] %v415_v54  ;;  %v417_v55 = vld [vmem:[%s3874_s29 + $0x770] sm:$0xf] }
  0x65   : > { %v419_v56 = vld [vmem:[%s3874_s29 + $0x780] sm:$0xf]  ;;  %v421_v57 = vld [vmem:[%s3874_s29 + $0x790] sm:$0xf]  ;;  %418 = vst [vmem:[%s3881_s30 + $0x1dc] sm:$0xf] %v417_v55 }
  0x66   : > { %420 = vst [vmem:[%s3881_s30 + $0x1e0] sm:$0xf] %v419_v56  ;;  %422 = vst [vmem:[%s3881_s30 + $0x1e4] sm:$0xf] %v421_v57  ;;  %v423_v58 = vld [vmem:[%s3874_s29 + $0x7a0] sm:$0xf] }
  0x67   : > { %v425_v59 = vld [vmem:[%s3874_s29 + $0x7b0] sm:$0xf]  ;;  %v427_v60 = vld [vmem:[%s3874_s29 + $0x7c0] sm:$0xf]  ;;  %424 = vst [vmem:[%s3881_s30 + $0x1e8] sm:$0xf] %v423_v58 }
  0x68   : > { %426 = vst [vmem:[%s3881_s30 + $0x1ec] sm:$0xf] %v425_v59  ;;  %428 = vst [vmem:[%s3881_s30 + $0x1f0] sm:$0xf] %v427_v60  ;;  %v429_v61 = vld [vmem:[%s3874_s29 + $0x7d0] sm:$0xf] }
  0x69   : > { %v431_v62 = vld [vmem:[%s3874_s29 + $0x7e0] sm:$0xf]  ;;  %v433_v63 = vld [vmem:[%s3874_s29 + $0x7f0] sm:$0xf]  ;;  %430 = vst [vmem:[%s3881_s30 + $0x1f4] sm:$0xf] %v429_v61 }
  0x6a   : > { %432 = vst [vmem:[%s3881_s30 + $0x1f8] sm:$0xf] %v431_v62  ;;  %434 = vst [vmem:[%s3881_s30 + $0x1fc] sm:$0xf] %v433_v63  ;;  %v435_v0 = vld [vmem:[%s3874_s29 + $0x800] sm:$0xf] }
  0x6b   : > { %v437_v1 = vld [vmem:[%s3874_s29 + $0x810] sm:$0xf]  ;;  %v439_v2 = vld [vmem:[%s3874_s29 + $0x820] sm:$0xf]  ;;  %436 = vst [vmem:[%s3881_s30 + $0x200] sm:$0xf] %v435_v0 }
  0x6c   : > { %438 = vst [vmem:[%s3881_s30 + $0x204] sm:$0xf] %v437_v1  ;;  %440 = vst [vmem:[%s3881_s30 + $0x208] sm:$0xf] %v439_v2  ;;  %v441_v3 = vld [vmem:[%s3874_s29 + $0x830] sm:$0xf] }
  0x6d   : > { %v443_v4 = vld [vmem:[%s3874_s29 + $0x840] sm:$0xf]  ;;  %v445_v5 = vld [vmem:[%s3874_s29 + $0x850] sm:$0xf]  ;;  %442 = vst [vmem:[%s3881_s30 + $0x20c] sm:$0xf] %v441_v3 }
  0x6e   : > { %444 = vst [vmem:[%s3881_s30 + $0x210] sm:$0xf] %v443_v4  ;;  %446 = vst [vmem:[%s3881_s30 + $0x214] sm:$0xf] %v445_v5  ;;  %v447_v6 = vld [vmem:[%s3874_s29 + $0x860] sm:$0xf] }
  0x6f   : > { %v449_v7 = vld [vmem:[%s3874_s29 + $0x870] sm:$0xf]  ;;  %v451_v8 = vld [vmem:[%s3874_s29 + $0x880] sm:$0xf]  ;;  %448 = vst [vmem:[%s3881_s30 + $0x218] sm:$0xf] %v447_v6 }
  0x70   : > { %450 = vst [vmem:[%s3881_s30 + $0x21c] sm:$0xf] %v449_v7  ;;  %452 = vst [vmem:[%s3881_s30 + $0x220] sm:$0xf] %v451_v8  ;;  %v453_v9 = vld [vmem:[%s3874_s29 + $0x890] sm:$0xf] }
  0x71   : > { %v455_v10 = vld [vmem:[%s3874_s29 + $0x8a0] sm:$0xf]  ;;  %v457_v11 = vld [vmem:[%s3874_s29 + $0x8b0] sm:$0xf]  ;;  %454 = vst [vmem:[%s3881_s30 + $0x224] sm:$0xf] %v453_v9 }
  0x72   : > { %456 = vst [vmem:[%s3881_s30 + $0x228] sm:$0xf] %v455_v10  ;;  %458 = vst [vmem:[%s3881_s30 + $0x22c] sm:$0xf] %v457_v11  ;;  %v459_v12 = vld [vmem:[%s3874_s29 + $0x8c0] sm:$0xf] }
  0x73   : > { %v461_v13 = vld [vmem:[%s3874_s29 + $0x8d0] sm:$0xf]  ;;  %v463_v14 = vld [vmem:[%s3874_s29 + $0x8e0] sm:$0xf]  ;;  %460 = vst [vmem:[%s3881_s30 + $0x230] sm:$0xf] %v459_v12 }
  0x74   : > { %462 = vst [vmem:[%s3881_s30 + $0x234] sm:$0xf] %v461_v13  ;;  %464 = vst [vmem:[%s3881_s30 + $0x238] sm:$0xf] %v463_v14  ;;  %v465_v15 = vld [vmem:[%s3874_s29 + $0x8f0] sm:$0xf] }
  0x75   : > { %v467_v16 = vld [vmem:[%s3874_s29 + $0x900] sm:$0xf]  ;;  %v469_v17 = vld [vmem:[%s3874_s29 + $0x910] sm:$0xf]  ;;  %466 = vst [vmem:[%s3881_s30 + $0x23c] sm:$0xf] %v465_v15 }
  0x76   : > { %468 = vst [vmem:[%s3881_s30 + $0x240] sm:$0xf] %v467_v16  ;;  %470 = vst [vmem:[%s3881_s30 + $0x244] sm:$0xf] %v469_v17  ;;  %v471_v18 = vld [vmem:[%s3874_s29 + $0x920] sm:$0xf] }
  0x77   : > { %v473_v19 = vld [vmem:[%s3874_s29 + $0x930] sm:$0xf]  ;;  %v475_v20 = vld [vmem:[%s3874_s29 + $0x940] sm:$0xf]  ;;  %472 = vst [vmem:[%s3881_s30 + $0x248] sm:$0xf] %v471_v18 }
  0x78   : > { %474 = vst [vmem:[%s3881_s30 + $0x24c] sm:$0xf] %v473_v19  ;;  %476 = vst [vmem:[%s3881_s30 + $0x250] sm:$0xf] %v475_v20  ;;  %v477_v21 = vld [vmem:[%s3874_s29 + $0x950] sm:$0xf] }
  0x79   : > { %v479_v22 = vld [vmem:[%s3874_s29 + $0x960] sm:$0xf]  ;;  %v481_v23 = vld [vmem:[%s3874_s29 + $0x970] sm:$0xf]  ;;  %478 = vst [vmem:[%s3881_s30 + $0x254] sm:$0xf] %v477_v21 }
  0x7a   : > { %480 = vst [vmem:[%s3881_s30 + $0x258] sm:$0xf] %v479_v22  ;;  %482 = vst [vmem:[%s3881_s30 + $0x25c] sm:$0xf] %v481_v23  ;;  %v483_v24 = vld [vmem:[%s3874_s29 + $0x980] sm:$0xf] }
  0x7b   : > { %v485_v25 = vld [vmem:[%s3874_s29 + $0x990] sm:$0xf]  ;;  %v487_v26 = vld [vmem:[%s3874_s29 + $0x9a0] sm:$0xf]  ;;  %484 = vst [vmem:[%s3881_s30 + $0x260] sm:$0xf] %v483_v24 }
  0x7c   : > { %486 = vst [vmem:[%s3881_s30 + $0x264] sm:$0xf] %v485_v25  ;;  %488 = vst [vmem:[%s3881_s30 + $0x268] sm:$0xf] %v487_v26  ;;  %v489_v27 = vld [vmem:[%s3874_s29 + $0x9b0] sm:$0xf] }
  0x7d   : > { %v491_v28 = vld [vmem:[%s3874_s29 + $0x9c0] sm:$0xf]  ;;  %v493_v29 = vld [vmem:[%s3874_s29 + $0x9d0] sm:$0xf]  ;;  %490 = vst [vmem:[%s3881_s30 + $0x26c] sm:$0xf] %v489_v27 }
  0x7e   : > { %492 = vst [vmem:[%s3881_s30 + $0x270] sm:$0xf] %v491_v28  ;;  %494 = vst [vmem:[%s3881_s30 + $0x274] sm:$0xf] %v493_v29  ;;  %v495_v30 = vld [vmem:[%s3874_s29 + $0x9e0] sm:$0xf] }
  0x7f   : > { %v497_v31 = vld [vmem:[%s3874_s29 + $0x9f0] sm:$0xf]  ;;  %v499_v32 = vld [vmem:[%s3874_s29 + $0xa00] sm:$0xf]  ;;  %496 = vst [vmem:[%s3881_s30 + $0x278] sm:$0xf] %v495_v30 }
  0x80   : > { %498 = vst [vmem:[%s3881_s30 + $0x27c] sm:$0xf] %v497_v31  ;;  %500 = vst [vmem:[%s3881_s30 + $0x280] sm:$0xf] %v499_v32  ;;  %v501_v33 = vld [vmem:[%s3874_s29 + $0xa10] sm:$0xf] }
  0x81   : > { %v503_v34 = vld [vmem:[%s3874_s29 + $0xa20] sm:$0xf]  ;;  %v505_v35 = vld [vmem:[%s3874_s29 + $0xa30] sm:$0xf]  ;;  %502 = vst [vmem:[%s3881_s30 + $0x284] sm:$0xf] %v501_v33 }
  0x82   : > { %504 = vst [vmem:[%s3881_s30 + $0x288] sm:$0xf] %v503_v34  ;;  %506 = vst [vmem:[%s3881_s30 + $0x28c] sm:$0xf] %v505_v35  ;;  %v507_v36 = vld [vmem:[%s3874_s29 + $0xa40] sm:$0xf] }
  0x83   : > { %v509_v37 = vld [vmem:[%s3874_s29 + $0xa50] sm:$0xf]  ;;  %v511_v38 = vld [vmem:[%s3874_s29 + $0xa60] sm:$0xf]  ;;  %508 = vst [vmem:[%s3881_s30 + $0x290] sm:$0xf] %v507_v36 }
  0x84   : > { %510 = vst [vmem:[%s3881_s30 + $0x294] sm:$0xf] %v509_v37  ;;  %512 = vst [vmem:[%s3881_s30 + $0x298] sm:$0xf] %v511_v38  ;;  %v513_v39 = vld [vmem:[%s3874_s29 + $0xa70] sm:$0xf] }
  0x85   : > { %v515_v40 = vld [vmem:[%s3874_s29 + $0xa80] sm:$0xf]  ;;  %v517_v41 = vld [vmem:[%s3874_s29 + $0xa90] sm:$0xf]  ;;  %514 = vst [vmem:[%s3881_s30 + $0x29c] sm:$0xf] %v513_v39 }
  0x86   : > { %516 = vst [vmem:[%s3881_s30 + $0x2a0] sm:$0xf] %v515_v40  ;;  %518 = vst [vmem:[%s3881_s30 + $0x2a4] sm:$0xf] %v517_v41  ;;  %v519_v42 = vld [vmem:[%s3874_s29 + $0xaa0] sm:$0xf] }
  0x87   : > { %v521_v43 = vld [vmem:[%s3874_s29 + $0xab0] sm:$0xf]  ;;  %v523_v44 = vld [vmem:[%s3874_s29 + $0xac0] sm:$0xf]  ;;  %520 = vst [vmem:[%s3881_s30 + $0x2a8] sm:$0xf] %v519_v42 }
  0x88   : > { %522 = vst [vmem:[%s3881_s30 + $0x2ac] sm:$0xf] %v521_v43  ;;  %524 = vst [vmem:[%s3881_s30 + $0x2b0] sm:$0xf] %v523_v44  ;;  %v525_v45 = vld [vmem:[%s3874_s29 + $0xad0] sm:$0xf] }
  0x89   : > { %v527_v46 = vld [vmem:[%s3874_s29 + $0xae0] sm:$0xf]  ;;  %v529_v47 = vld [vmem:[%s3874_s29 + $0xaf0] sm:$0xf]  ;;  %526 = vst [vmem:[%s3881_s30 + $0x2b4] sm:$0xf] %v525_v45 }
  0x8a   : > { %528 = vst [vmem:[%s3881_s30 + $0x2b8] sm:$0xf] %v527_v46  ;;  %530 = vst [vmem:[%s3881_s30 + $0x2bc] sm:$0xf] %v529_v47  ;;  %v531_v48 = vld [vmem:[%s3874_s29 + $0xb00] sm:$0xf] }
  0x8b   : > { %v533_v49 = vld [vmem:[%s3874_s29 + $0xb10] sm:$0xf]  ;;  %v535_v50 = vld [vmem:[%s3874_s29 + $0xb20] sm:$0xf]  ;;  %532 = vst [vmem:[%s3881_s30 + $0x2c0] sm:$0xf] %v531_v48 }
  0x8c   : > { %534 = vst [vmem:[%s3881_s30 + $0x2c4] sm:$0xf] %v533_v49  ;;  %536 = vst [vmem:[%s3881_s30 + $0x2c8] sm:$0xf] %v535_v50  ;;  %v537_v51 = vld [vmem:[%s3874_s29 + $0xb30] sm:$0xf] }
  0x8d   : > { %v539_v52 = vld [vmem:[%s3874_s29 + $0xb40] sm:$0xf]  ;;  %v541_v53 = vld [vmem:[%s3874_s29 + $0xb50] sm:$0xf]  ;;  %538 = vst [vmem:[%s3881_s30 + $0x2cc] sm:$0xf] %v537_v51 }
  0x8e   : > { %540 = vst [vmem:[%s3881_s30 + $0x2d0] sm:$0xf] %v539_v52  ;;  %542 = vst [vmem:[%s3881_s30 + $0x2d4] sm:$0xf] %v541_v53  ;;  %v543_v54 = vld [vmem:[%s3874_s29 + $0xb60] sm:$0xf] }
  0x8f   : > { %v545_v55 = vld [vmem:[%s3874_s29 + $0xb70] sm:$0xf]  ;;  %v547_v56 = vld [vmem:[%s3874_s29 + $0xb80] sm:$0xf]  ;;  %544 = vst [vmem:[%s3881_s30 + $0x2d8] sm:$0xf] %v543_v54 }
  0x90   : > { %546 = vst [vmem:[%s3881_s30 + $0x2dc] sm:$0xf] %v545_v55  ;;  %548 = vst [vmem:[%s3881_s30 + $0x2e0] sm:$0xf] %v547_v56  ;;  %v549_v57 = vld [vmem:[%s3874_s29 + $0xb90] sm:$0xf] }
  0x91   : > { %v551_v58 = vld [vmem:[%s3874_s29 + $0xba0] sm:$0xf]  ;;  %v553_v59 = vld [vmem:[%s3874_s29 + $0xbb0] sm:$0xf]  ;;  %550 = vst [vmem:[%s3881_s30 + $0x2e4] sm:$0xf] %v549_v57 }
  0x92   : > { %552 = vst [vmem:[%s3881_s30 + $0x2e8] sm:$0xf] %v551_v58  ;;  %554 = vst [vmem:[%s3881_s30 + $0x2ec] sm:$0xf] %v553_v59  ;;  %v555_v60 = vld [vmem:[%s3874_s29 + $0xbc0] sm:$0xf] }
  0x93   : > { %v557_v61 = vld [vmem:[%s3874_s29 + $0xbd0] sm:$0xf]  ;;  %v559_v62 = vld [vmem:[%s3874_s29 + $0xbe0] sm:$0xf]  ;;  %556 = vst [vmem:[%s3881_s30 + $0x2f0] sm:$0xf] %v555_v60 }
  0x94   : > { %558 = vst [vmem:[%s3881_s30 + $0x2f4] sm:$0xf] %v557_v61  ;;  %560 = vst [vmem:[%s3881_s30 + $0x2f8] sm:$0xf] %v559_v62  ;;  %v561_v63 = vld [vmem:[%s3874_s29 + $0xbf0] sm:$0xf] }
  0x95   : > { %v563_v0 = vld [vmem:[%s3874_s29 + $0xc00] sm:$0xf]  ;;  %v565_v1 = vld [vmem:[%s3874_s29 + $0xc10] sm:$0xf]  ;;  %562 = vst [vmem:[%s3881_s30 + $0x2fc] sm:$0xf] %v561_v63 }
  0x96   : > { %564 = vst [vmem:[%s3881_s30 + $0x300] sm:$0xf] %v563_v0  ;;  %566 = vst [vmem:[%s3881_s30 + $0x304] sm:$0xf] %v565_v1  ;;  %v567_v2 = vld [vmem:[%s3874_s29 + $0xc20] sm:$0xf] }
  0x97   : > { %v569_v3 = vld [vmem:[%s3874_s29 + $0xc30] sm:$0xf]  ;;  %v571_v4 = vld [vmem:[%s3874_s29 + $0xc40] sm:$0xf]  ;;  %568 = vst [vmem:[%s3881_s30 + $0x308] sm:$0xf] %v567_v2 }
  0x98   : > { %570 = vst [vmem:[%s3881_s30 + $0x30c] sm:$0xf] %v569_v3  ;;  %572 = vst [vmem:[%s3881_s30 + $0x310] sm:$0xf] %v571_v4  ;;  %v573_v5 = vld [vmem:[%s3874_s29 + $0xc50] sm:$0xf] }
  0x99   : > { %v575_v6 = vld [vmem:[%s3874_s29 + $0xc60] sm:$0xf]  ;;  %v577_v7 = vld [vmem:[%s3874_s29 + $0xc70] sm:$0xf]  ;;  %574 = vst [vmem:[%s3881_s30 + $0x314] sm:$0xf] %v573_v5 }
  0x9a   : > { %576 = vst [vmem:[%s3881_s30 + $0x318] sm:$0xf] %v575_v6  ;;  %578 = vst [vmem:[%s3881_s30 + $0x31c] sm:$0xf] %v577_v7  ;;  %v579_v8 = vld [vmem:[%s3874_s29 + $0xc80] sm:$0xf] }
  0x9b   : > { %v581_v9 = vld [vmem:[%s3874_s29 + $0xc90] sm:$0xf]  ;;  %v583_v10 = vld [vmem:[%s3874_s29 + $0xca0] sm:$0xf]  ;;  %580 = vst [vmem:[%s3881_s30 + $0x320] sm:$0xf] %v579_v8 }
  0x9c   : > { %582 = vst [vmem:[%s3881_s30 + $0x324] sm:$0xf] %v581_v9  ;;  %584 = vst [vmem:[%s3881_s30 + $0x328] sm:$0xf] %v583_v10  ;;  %v585_v11 = vld [vmem:[%s3874_s29 + $0xcb0] sm:$0xf] }
  0x9d   : > { %v587_v12 = vld [vmem:[%s3874_s29 + $0xcc0] sm:$0xf]  ;;  %v589_v13 = vld [vmem:[%s3874_s29 + $0xcd0] sm:$0xf]  ;;  %586 = vst [vmem:[%s3881_s30 + $0x32c] sm:$0xf] %v585_v11 }
  0x9e   : > { %588 = vst [vmem:[%s3881_s30 + $0x330] sm:$0xf] %v587_v12  ;;  %590 = vst [vmem:[%s3881_s30 + $0x334] sm:$0xf] %v589_v13  ;;  %v591_v14 = vld [vmem:[%s3874_s29 + $0xce0] sm:$0xf] }
  0x9f   : > { %v593_v15 = vld [vmem:[%s3874_s29 + $0xcf0] sm:$0xf]  ;;  %v595_v16 = vld [vmem:[%s3874_s29 + $0xd00] sm:$0xf]  ;;  %592 = vst [vmem:[%s3881_s30 + $0x338] sm:$0xf] %v591_v14 }
  0xa0   : > { %594 = vst [vmem:[%s3881_s30 + $0x33c] sm:$0xf] %v593_v15  ;;  %596 = vst [vmem:[%s3881_s30 + $0x340] sm:$0xf] %v595_v16  ;;  %v597_v17 = vld [vmem:[%s3874_s29 + $0xd10] sm:$0xf] }
  0xa1   : > { %v599_v18 = vld [vmem:[%s3874_s29 + $0xd20] sm:$0xf]  ;;  %v601_v19 = vld [vmem:[%s3874_s29 + $0xd30] sm:$0xf]  ;;  %598 = vst [vmem:[%s3881_s30 + $0x344] sm:$0xf] %v597_v17 }
  0xa2   : > { %600 = vst [vmem:[%s3881_s30 + $0x348] sm:$0xf] %v599_v18  ;;  %602 = vst [vmem:[%s3881_s30 + $0x34c] sm:$0xf] %v601_v19  ;;  %v603_v20 = vld [vmem:[%s3874_s29 + $0xd40] sm:$0xf] }
  0xa3   : > { %v605_v21 = vld [vmem:[%s3874_s29 + $0xd50] sm:$0xf]  ;;  %v607_v22 = vld [vmem:[%s3874_s29 + $0xd60] sm:$0xf]  ;;  %604 = vst [vmem:[%s3881_s30 + $0x350] sm:$0xf] %v603_v20 }
  0xa4   : > { %606 = vst [vmem:[%s3881_s30 + $0x354] sm:$0xf] %v605_v21  ;;  %608 = vst [vmem:[%s3881_s30 + $0x358] sm:$0xf] %v607_v22  ;;  %v609_v23 = vld [vmem:[%s3874_s29 + $0xd70] sm:$0xf] }
  0xa5   : > { %v611_v24 = vld [vmem:[%s3874_s29 + $0xd80] sm:$0xf]  ;;  %v613_v25 = vld [vmem:[%s3874_s29 + $0xd90] sm:$0xf]  ;;  %610 = vst [vmem:[%s3881_s30 + $0x35c] sm:$0xf] %v609_v23 }
  0xa6   : > { %612 = vst [vmem:[%s3881_s30 + $0x360] sm:$0xf] %v611_v24  ;;  %614 = vst [vmem:[%s3881_s30 + $0x364] sm:$0xf] %v613_v25  ;;  %v615_v26 = vld [vmem:[%s3874_s29 + $0xda0] sm:$0xf] }
  0xa7   : > { %v617_v27 = vld [vmem:[%s3874_s29 + $0xdb0] sm:$0xf]  ;;  %v619_v28 = vld [vmem:[%s3874_s29 + $0xdc0] sm:$0xf]  ;;  %616 = vst [vmem:[%s3881_s30 + $0x368] sm:$0xf] %v615_v26 }
  0xa8   : > { %618 = vst [vmem:[%s3881_s30 + $0x36c] sm:$0xf] %v617_v27  ;;  %620 = vst [vmem:[%s3881_s30 + $0x370] sm:$0xf] %v619_v28  ;;  %v621_v29 = vld [vmem:[%s3874_s29 + $0xdd0] sm:$0xf] }
  0xa9   : > { %v623_v30 = vld [vmem:[%s3874_s29 + $0xde0] sm:$0xf]  ;;  %v625_v31 = vld [vmem:[%s3874_s29 + $0xdf0] sm:$0xf]  ;;  %622 = vst [vmem:[%s3881_s30 + $0x374] sm:$0xf] %v621_v29 }
  0xaa   : > { %624 = vst [vmem:[%s3881_s30 + $0x378] sm:$0xf] %v623_v30  ;;  %626 = vst [vmem:[%s3881_s30 + $0x37c] sm:$0xf] %v625_v31  ;;  %v627_v32 = vld [vmem:[%s3874_s29 + $0xe00] sm:$0xf] }
  0xab   : > { %v629_v33 = vld [vmem:[%s3874_s29 + $0xe10] sm:$0xf]  ;;  %v631_v34 = vld [vmem:[%s3874_s29 + $0xe20] sm:$0xf]  ;;  %628 = vst [vmem:[%s3881_s30 + $0x380] sm:$0xf] %v627_v32 }
  0xac   : > { %630 = vst [vmem:[%s3881_s30 + $0x384] sm:$0xf] %v629_v33  ;;  %632 = vst [vmem:[%s3881_s30 + $0x388] sm:$0xf] %v631_v34  ;;  %v633_v35 = vld [vmem:[%s3874_s29 + $0xe30] sm:$0xf] }
  0xad   : > { %v635_v36 = vld [vmem:[%s3874_s29 + $0xe40] sm:$0xf]  ;;  %v637_v37 = vld [vmem:[%s3874_s29 + $0xe50] sm:$0xf]  ;;  %634 = vst [vmem:[%s3881_s30 + $0x38c] sm:$0xf] %v633_v35 }
  0xae   : > { %636 = vst [vmem:[%s3881_s30 + $0x390] sm:$0xf] %v635_v36  ;;  %638 = vst [vmem:[%s3881_s30 + $0x394] sm:$0xf] %v637_v37  ;;  %v639_v38 = vld [vmem:[%s3874_s29 + $0xe60] sm:$0xf] }
  0xaf   : > { %v641_v39 = vld [vmem:[%s3874_s29 + $0xe70] sm:$0xf]  ;;  %v643_v40 = vld [vmem:[%s3874_s29 + $0xe80] sm:$0xf]  ;;  %640 = vst [vmem:[%s3881_s30 + $0x398] sm:$0xf] %v639_v38 }
  0xb0   : > { %642 = vst [vmem:[%s3881_s30 + $0x39c] sm:$0xf] %v641_v39  ;;  %644 = vst [vmem:[%s3881_s30 + $0x3a0] sm:$0xf] %v643_v40  ;;  %v645_v41 = vld [vmem:[%s3874_s29 + $0xe90] sm:$0xf] }
  0xb1   : > { %v647_v42 = vld [vmem:[%s3874_s29 + $0xea0] sm:$0xf]  ;;  %v649_v43 = vld [vmem:[%s3874_s29 + $0xeb0] sm:$0xf]  ;;  %646 = vst [vmem:[%s3881_s30 + $0x3a4] sm:$0xf] %v645_v41 }
  0xb2   : > { %648 = vst [vmem:[%s3881_s30 + $0x3a8] sm:$0xf] %v647_v42  ;;  %650 = vst [vmem:[%s3881_s30 + $0x3ac] sm:$0xf] %v649_v43  ;;  %v651_v44 = vld [vmem:[%s3874_s29 + $0xec0] sm:$0xf] }
  0xb3   : > { %v653_v45 = vld [vmem:[%s3874_s29 + $0xed0] sm:$0xf]  ;;  %v655_v46 = vld [vmem:[%s3874_s29 + $0xee0] sm:$0xf]  ;;  %652 = vst [vmem:[%s3881_s30 + $0x3b0] sm:$0xf] %v651_v44 }
  0xb4   : > { %654 = vst [vmem:[%s3881_s30 + $0x3b4] sm:$0xf] %v653_v45  ;;  %656 = vst [vmem:[%s3881_s30 + $0x3b8] sm:$0xf] %v655_v46  ;;  %v657_v47 = vld [vmem:[%s3874_s29 + $0xef0] sm:$0xf] }
  0xb5   : > { %v659_v48 = vld [vmem:[%s3874_s29 + $0xf00] sm:$0xf]  ;;  %v661_v49 = vld [vmem:[%s3874_s29 + $0xf10] sm:$0xf]  ;;  %658 = vst [vmem:[%s3881_s30 + $0x3bc] sm:$0xf] %v657_v47 }
  0xb6   : > { %660 = vst [vmem:[%s3881_s30 + $0x3c0] sm:$0xf] %v659_v48  ;;  %662 = vst [vmem:[%s3881_s30 + $0x3c4] sm:$0xf] %v661_v49  ;;  %v663_v50 = vld [vmem:[%s3874_s29 + $0xf20] sm:$0xf] }
  0xb7   : > { %v665_v51 = vld [vmem:[%s3874_s29 + $0xf30] sm:$0xf]  ;;  %v667_v52 = vld [vmem:[%s3874_s29 + $0xf40] sm:$0xf]  ;;  %664 = vst [vmem:[%s3881_s30 + $0x3c8] sm:$0xf] %v663_v50 }
  0xb8   : > { %666 = vst [vmem:[%s3881_s30 + $0x3cc] sm:$0xf] %v665_v51  ;;  %668 = vst [vmem:[%s3881_s30 + $0x3d0] sm:$0xf] %v667_v52  ;;  %v669_v53 = vld [vmem:[%s3874_s29 + $0xf50] sm:$0xf] }
  0xb9   : > { %v671_v54 = vld [vmem:[%s3874_s29 + $0xf60] sm:$0xf]  ;;  %v673_v55 = vld [vmem:[%s3874_s29 + $0xf70] sm:$0xf]  ;;  %670 = vst [vmem:[%s3881_s30 + $0x3d4] sm:$0xf] %v669_v53 }
  0xba   : > { %672 = vst [vmem:[%s3881_s30 + $0x3d8] sm:$0xf] %v671_v54  ;;  %674 = vst [vmem:[%s3881_s30 + $0x3dc] sm:$0xf] %v673_v55  ;;  %v675_v56 = vld [vmem:[%s3874_s29 + $0xf80] sm:$0xf] }
  0xbb   : > { %v677_v57 = vld [vmem:[%s3874_s29 + $0xf90] sm:$0xf]  ;;  %v679_v58 = vld [vmem:[%s3874_s29 + $0xfa0] sm:$0xf]  ;;  %676 = vst [vmem:[%s3881_s30 + $0x3e0] sm:$0xf] %v675_v56 }
  0xbc   : > { %678 = vst [vmem:[%s3881_s30 + $0x3e4] sm:$0xf] %v677_v57  ;;  %680 = vst [vmem:[%s3881_s30 + $0x3e8] sm:$0xf] %v679_v58  ;;  %v681_v59 = vld [vmem:[%s3874_s29 + $0xfb0] sm:$0xf] }
  0xbd   : > { %v683_v60 = vld [vmem:[%s3874_s29 + $0xfc0] sm:$0xf]  ;;  %v685_v61 = vld [vmem:[%s3874_s29 + $0xfd0] sm:$0xf]  ;;  %682 = vst [vmem:[%s3881_s30 + $0x3ec] sm:$0xf] %v681_v59 }
  0xbe   : > { %684 = vst [vmem:[%s3881_s30 + $0x3f0] sm:$0xf] %v683_v60  ;;  %686 = vst [vmem:[%s3881_s30 + $0x3f4] sm:$0xf] %v685_v61  ;;  %v687_v62 = vld [vmem:[%s3874_s29 + $0xfe0] sm:$0xf] }
  0xbf   : > { %v689_v63 = vld [vmem:[%s3874_s29 + $0xff0] sm:$0xf]  ;;  %v691_v0 = vld [vmem:[%s3874_s29 + $0x1000] sm:$0xf]  ;;  %688 = vst [vmem:[%s3881_s30 + $0x3f8] sm:$0xf] %v687_v62 }
  0xc0   : > { %690 = vst [vmem:[%s3881_s30 + $0x3fc] sm:$0xf] %v689_v63  ;;  %692 = vst [vmem:[%s3881_s30 + $0x400] sm:$0xf] %v691_v0  ;;  %v693_v1 = vld [vmem:[%s3874_s29 + $0x1010] sm:$0xf] }
  0xc1   : > { %v695_v2 = vld [vmem:[%s3874_s29 + $0x1020] sm:$0xf]  ;;  %v697_v3 = vld [vmem:[%s3874_s29 + $0x1030] sm:$0xf]  ;;  %694 = vst [vmem:[%s3881_s30 + $0x404] sm:$0xf] %v693_v1 }
  0xc2   : > { %696 = vst [vmem:[%s3881_s30 + $0x408] sm:$0xf] %v695_v2  ;;  %698 = vst [vmem:[%s3881_s30 + $0x40c] sm:$0xf] %v697_v3  ;;  %v699_v4 = vld [vmem:[%s3874_s29 + $0x1040] sm:$0xf] }
  0xc3   : > { %v701_v5 = vld [vmem:[%s3874_s29 + $0x1050] sm:$0xf]  ;;  %v703_v6 = vld [vmem:[%s3874_s29 + $0x1060] sm:$0xf]  ;;  %700 = vst [vmem:[%s3881_s30 + $0x410] sm:$0xf] %v699_v4 }
  0xc4   : > { %702 = vst [vmem:[%s3881_s30 + $0x414] sm:$0xf] %v701_v5  ;;  %704 = vst [vmem:[%s3881_s30 + $0x418] sm:$0xf] %v703_v6  ;;  %v705_v7 = vld [vmem:[%s3874_s29 + $0x1070] sm:$0xf] }
  0xc5   : > { %v707_v8 = vld [vmem:[%s3874_s29 + $0x1080] sm:$0xf]  ;;  %v709_v9 = vld [vmem:[%s3874_s29 + $0x1090] sm:$0xf]  ;;  %706 = vst [vmem:[%s3881_s30 + $0x41c] sm:$0xf] %v705_v7 }
  0xc6   : > { %708 = vst [vmem:[%s3881_s30 + $0x420] sm:$0xf] %v707_v8  ;;  %710 = vst [vmem:[%s3881_s30 + $0x424] sm:$0xf] %v709_v9  ;;  %v711_v10 = vld [vmem:[%s3874_s29 + $0x10a0] sm:$0xf] }
  0xc7   : > { %v713_v11 = vld [vmem:[%s3874_s29 + $0x10b0] sm:$0xf]  ;;  %v715_v12 = vld [vmem:[%s3874_s29 + $0x10c0] sm:$0xf]  ;;  %712 = vst [vmem:[%s3881_s30 + $0x428] sm:$0xf] %v711_v10 }
  0xc8   : > { %714 = vst [vmem:[%s3881_s30 + $0x42c] sm:$0xf] %v713_v11  ;;  %716 = vst [vmem:[%s3881_s30 + $0x430] sm:$0xf] %v715_v12  ;;  %v717_v13 = vld [vmem:[%s3874_s29 + $0x10d0] sm:$0xf] }
  0xc9   : > { %v719_v14 = vld [vmem:[%s3874_s29 + $0x10e0] sm:$0xf]  ;;  %v721_v15 = vld [vmem:[%s3874_s29 + $0x10f0] sm:$0xf]  ;;  %718 = vst [vmem:[%s3881_s30 + $0x434] sm:$0xf] %v717_v13 }
  0xca   : > { %720 = vst [vmem:[%s3881_s30 + $0x438] sm:$0xf] %v719_v14  ;;  %722 = vst [vmem:[%s3881_s30 + $0x43c] sm:$0xf] %v721_v15  ;;  %v723_v16 = vld [vmem:[%s3874_s29 + $0x1100] sm:$0xf] }
  0xcb   : > { %v725_v17 = vld [vmem:[%s3874_s29 + $0x1110] sm:$0xf]  ;;  %v727_v18 = vld [vmem:[%s3874_s29 + $0x1120] sm:$0xf]  ;;  %724 = vst [vmem:[%s3881_s30 + $0x440] sm:$0xf] %v723_v16 }
  0xcc   : > { %726 = vst [vmem:[%s3881_s30 + $0x444] sm:$0xf] %v725_v17  ;;  %728 = vst [vmem:[%s3881_s30 + $0x448] sm:$0xf] %v727_v18  ;;  %v729_v19 = vld [vmem:[%s3874_s29 + $0x1130] sm:$0xf] }
  0xcd   : > { %v731_v20 = vld [vmem:[%s3874_s29 + $0x1140] sm:$0xf]  ;;  %v733_v21 = vld [vmem:[%s3874_s29 + $0x1150] sm:$0xf]  ;;  %730 = vst [vmem:[%s3881_s30 + $0x44c] sm:$0xf] %v729_v19 }
  0xce   : > { %732 = vst [vmem:[%s3881_s30 + $0x450] sm:$0xf] %v731_v20  ;;  %734 = vst [vmem:[%s3881_s30 + $0x454] sm:$0xf] %v733_v21  ;;  %v735_v22 = vld [vmem:[%s3874_s29 + $0x1160] sm:$0xf] }
  0xcf   : > { %v737_v23 = vld [vmem:[%s3874_s29 + $0x1170] sm:$0xf]  ;;  %v739_v24 = vld [vmem:[%s3874_s29 + $0x1180] sm:$0xf]  ;;  %736 = vst [vmem:[%s3881_s30 + $0x458] sm:$0xf] %v735_v22 }
  0xd0   : > { %738 = vst [vmem:[%s3881_s30 + $0x45c] sm:$0xf] %v737_v23  ;;  %740 = vst [vmem:[%s3881_s30 + $0x460] sm:$0xf] %v739_v24  ;;  %v741_v25 = vld [vmem:[%s3874_s29 + $0x1190] sm:$0xf] }
  0xd1   : > { %v743_v26 = vld [vmem:[%s3874_s29 + $0x11a0] sm:$0xf]  ;;  %v745_v27 = vld [vmem:[%s3874_s29 + $0x11b0] sm:$0xf]  ;;  %742 = vst [vmem:[%s3881_s30 + $0x464] sm:$0xf] %v741_v25 }
  0xd2   : > { %744 = vst [vmem:[%s3881_s30 + $0x468] sm:$0xf] %v743_v26  ;;  %746 = vst [vmem:[%s3881_s30 + $0x46c] sm:$0xf] %v745_v27  ;;  %v747_v28 = vld [vmem:[%s3874_s29 + $0x11c0] sm:$0xf] }
  0xd3   : > { %v749_v29 = vld [vmem:[%s3874_s29 + $0x11d0] sm:$0xf]  ;;  %v751_v30 = vld [vmem:[%s3874_s29 + $0x11e0] sm:$0xf]  ;;  %748 = vst [vmem:[%s3881_s30 + $0x470] sm:$0xf] %v747_v28 }
  0xd4   : > { %750 = vst [vmem:[%s3881_s30 + $0x474] sm:$0xf] %v749_v29  ;;  %752 = vst [vmem:[%s3881_s30 + $0x478] sm:$0xf] %v751_v30  ;;  %v753_v31 = vld [vmem:[%s3874_s29 + $0x11f0] sm:$0xf] }
  0xd5   : > { %754 = vst [vmem:[%s3881_s30 + $0x47c] sm:$0xf] %v753_v31 }
  0xd6 PF: > { %p3180_p7 = scmp.ge.s32.totalorder %s3794_s18, 1  ;;  %p1359_p8 = scmp.lt.s32.totalorder %s3794_s18, 9 }
  0xd8   : > { %p1360_p9 = pnand %p3180_p7, %p1359_p8 }
  0xd9   : > { %s1366_s4 = sand.u32 (!%p1360_p9), 1, %s3770_s12   ;;  %p1400_p10 = scmp.lt.s32.totalorder (!%p1360_p9), %s3782_s15, 1 }
  0xda   : > { %1363 = sbr.rel (%p1360_p9) target bundleno = 641 (0x281), region = 69  ;;  %p1405_p11 = scmp.lt.s32.totalorder (!%p1360_p9), %s3778_s14, 3 }
  0xdb   : > { %s3531_s5 = smul.u32 (!%p1360_p9), 1152, %s1366_s4 }
  0xdd   : > { %s4457_s6 = scalar_lea.vmem (!%p1360_p9), [#allocation2], %s3531_s5 }
  0xdf   : > { %v3590_v32 = vld [vmem:[%s4457_s6 + $0x78] sm:$0xff]   ;;  %v3594_v36 = vld [vmem:[%s4457_s6 + $0x70] sm:$0xff]   ;;  %v3598_v40 = vld [vmem:[%s4457_s6 + $0x68] sm:$0xff]   ;;  %v1726_v52 = vlaneseq  ;;  %s4679_s15 = smov (!%p1400_p10, %s3782_s15), 1  ;;  %v3796_v54 = vmov 1983009808  }
  0xe0   : > { %v3591_v33 = vld [vmem:[%s4457_s6 + $0x38] sm:$0xff]   ;;  %3332 = vmatprep.subr.bf16.mxu0 %v3590_v32  ;;  %v3595_v37 = vld [vmem:[%s4457_s6 + $0x30] sm:$0xff]   ;;  %v3599_v41 = vld [vmem:[%s4457_s6 + $0x28] sm:$0xff]   ;;  %v1724_v55 = vunpack.c.l.s4 %v3796_v54  ;;  %s3532_s7 = smul.u32 36, %s4679_s15  ;;  %s4681_s14 = smov (!%p1405_p11, %s3778_s14), 3  ;;  %vm3040_vm0 = vcmask 1043456  }
  0xe1   : > { %v3592_v34 = vld [vmem:[%s4457_s6 + $0xf8] sm:$0xff]   ;;  %3333 = vmatpush3.bf16.msra.mxu0 %v3591_v33  ;;  %v3596_v38 = vld [vmem:[%s4457_s6 + $0xf0] sm:$0xff]   ;;  %v3600_v42 = vld [vmem:[%s4457_s6 + $0xe8] sm:$0xff]   ;;  %v1727_v59 = vshrl.u32 %v1726_v52, 7  ;;  %s1407_s21 = scalar_lea.vmem %s4664_s2, %s4681_s14  ;;  %s3182_s22 = sshll.u32 %s4679_s15, 2 }
  0xe2   : > { %v3593_v35 = vld [vmem:[%s4457_s6 + $0xb8] sm:$0xff]   ;;  %3354 = vmatprep.subr.bf16.mxu1 %v3592_v34  ;;  %3334 = vmatprep.subr.bf16.mxu0 %v3594_v36  ;;  %v3597_v39 = vld [vmem:[%s4457_s6 + $0xb0] sm:$0xff]   ;;  %v3601_v43 = vld [vmem:[%s4457_s6 + $0xa8] sm:$0xff]   ;;  %v1725_v61 = vunpack.c.0.s8 %v1724_v55  ;;  %s4496_s10 = scalar_lea.vmem %s4662_s0, %s3532_s7  ;;  %s1413_s24 = sadd.s32 %s3182_s22, %s4681_s14 }
  0xe3   : > { %3355 = vmatpush3.bf16.msra.mxu1 %v3593_v35  ;;  %v3602_v44 = vld [vmem:[%s4457_s6 + $0x60] sm:$0xff]   ;;  %v3606_v48 = vld [vmem:[%s4457_s6 + $0x58] sm:$0xff]   ;;  %v3610_v53 = vld [vmem:[%s4457_s6 + $0x50] sm:$0xff]   ;;  %s3183_s25 = sshll.u32 %s1413_s24, 1 }
  0xe4   : > { %3356 = vmatprep.subr.bf16.mxu1 %v3596_v38  ;;  %v3603_v45 = vld [vmem:[%s4457_s6 + $0x20] sm:$0xff]   ;;  %v3607_v49 = vld [vmem:[%s4457_s6 + $0x18] sm:$0xff]   ;;  %v3611_v56 = vld [vmem:[%s4457_s6 + $0x10] sm:$0xff]   ;;  %v4498_v2 = vsub.s32 %v1725_v61, %v1727_v59  ;;  %s1415_s28 = scalar_lea.vmem %s4665_s3, %s3183_s25 }
  0xe5   : > { %3335 = vmatpush3.bf16.msra.mxu0 %v3595_v37  ;;  %v3604_v46 = vld [vmem:[%s4457_s6 + $0xe0] sm:$0xff]   ;;  %v3608_v50 = vld [vmem:[%s4457_s6 + $0xd8] sm:$0xff]   ;;  %v3612_v57 = vld [vmem:[%s4457_s6 + $0xd0] sm:$0xff]  }
  0xe6   : > { %3336 = vmatprep.subr.bf16.mxu0 %v3598_v40  ;;  %v3605_v47 = vld [vmem:[%s4457_s6 + $0xa0] sm:$0xff]   ;;  %v3609_v51 = vld [vmem:[%s4457_s6 + $0x98] sm:$0xff]   ;;  %v3613_v58 = vld [vmem:[%s4457_s6 + $0x90] sm:$0xff]  }
  0xe7   : > { %3357 = vmatpush3.bf16.msra.mxu1 %v3597_v39  ;;  %v3614_v60 = vld [vmem:[%s4457_s6 + $0x48] sm:$0xff]   ;;  %v3618_v1 = vld [vmem:[%s4457_s6 + $0x40] sm:$0xff]   ;;  %v3622_v9 = vld [vmem:[%s4457_s6 + $0x178] sm:$0xff]  }
  0xe8   : > { %3358 = vmatprep.subr.bf16.mxu1 %v3600_v42  ;;  %v3615_v62 = vld [vmem:[%s4457_s6 + $0x8] sm:$0xff]   ;;  %v3619_v3 = vld [vmem:[%s4457_s6] sm:$0xff]   ;;  %v3624_v12 = vld [vmem:[%s4457_s6 + $0x138] sm:$0xff]  }
  0xe9   : > { %3337 = vmatpush3.bf16.msra.mxu0 %v3599_v41  ;;  %v3616_v63 = vld [vmem:[%s4457_s6 + $0xc8] sm:$0xff]   ;;  %v3620_v4 = vld [vmem:[%s4457_s6 + $0xc0] sm:$0xff]   ;;  %v3625_v13 = vld [vmem:[%s4457_s6 + $0x1f8] sm:$0xff]  }
  0xea   : > { %3338 = vmatprep.subr.bf16.mxu0 %v3602_v44  ;;  %v3617_v0 = vld [vmem:[%s4457_s6 + $0x88] sm:$0xff]   ;;  %v1417_v5 = vld [vmem:[%s4496_s10] sm:$0xff]  ;;  %v3626_v15 = vld [vmem:[%s4457_s6 + $0x1b8] sm:$0xff]  }
  0xeb   : > { %3359 = vmatpush3.bf16.msra.mxu1 %v3601_v43  ;;  %v1729_v6 = vrot.slane %v1417_v5, %v4498_v2  ;;  %v3621_v7 = vld [vmem:[%s4457_s6 + $0x80] sm:$0xff]   ;;  %v1722_v8 = vcombine.high %v1417_v5, %v1417_v5  ;;  %v3627_v16 = vld [vmem:[%s4457_s6 + $0x170] sm:$0xff]   ;;  %v3631_v20 = vld [vmem:[%s4457_s6 + $0x168] sm:$0xff]  }
  0xec   : > { %3360 = vmatprep.subr.bf16.mxu1 %v3604_v46  ;;  %v3628_v17 = vld [vmem:[%s4457_s6 + $0x130] sm:$0xff]   ;;  %v3632_v21 = vld [vmem:[%s4457_s6 + $0x128] sm:$0xff]   ;;  %v3635_v24 = vld [vmem:[%s4457_s6 + $0x160] sm:$0xff]  }
  0xed   : > { %3339 = vmatpush3.bf16.msra.mxu0 %v3603_v45  ;;  %v1737_v10 = vcombine.high %v1729_v6, %v1729_v6  ;;  %v1736_v11 = vrot.slane %v1722_v8, %v4498_v2  ;;  %v3629_v18 = vld [vmem:[%s4457_s6 + $0x1f0] sm:$0xff]   ;;  %v3633_v22 = vld [vmem:[%s4457_s6 + $0x1e8] sm:$0xff]   ;;  %v3636_v25 = vld [vmem:[%s4457_s6 + $0x120] sm:$0xff]  }
  0xee   : > { %3340 = vmatprep.subr.bf16.mxu0 %v3606_v48  ;;  %v3630_v19 = vld [vmem:[%s4457_s6 + $0x1b0] sm:$0xff]   ;;  %v3634_v23 = vld [vmem:[%s4457_s6 + $0x1a8] sm:$0xff]   ;;  %v3637_v26 = vld [vmem:[%s4457_s6 + $0x1e0] sm:$0xff]  }
  0xef   : > { %3361 = vmatpush3.bf16.msra.mxu1 %v3605_v47  ;;  %2712 = vmatprep.mubr.bf16.mxu0 %v1737_v10  ;;  %v1738_v14 = vcombine.high %v1736_v11, %v1736_v11  ;;  %v3638_v27 = vld [vmem:[%s4457_s6 + $0x1a0] sm:$0xff]   ;;  %v3639_v28 = vld [vmem:[%s4457_s6 + $0x158] sm:$0xff]   ;;  %v3643_v32 = vld [vmem:[%s4457_s6 + $0x150] sm:$0xff]  }
  0xf0   : > { %3362 = vmatprep.subr.bf16.mxu1 %v3608_v50  ;;  %v3640_v29 = vld [vmem:[%s4457_s6 + $0x118] sm:$0xff]   ;;  %v3644_v33 = vld [vmem:[%s4457_s6 + $0x110] sm:$0xff]   ;;  %v3647_v36 = vld [vmem:[%s4457_s6 + $0x148] sm:$0xff]  }
  0xf1   : > { %3341 = vmatpush3.bf16.msra.mxu0 %v3607_v49  ;;  %2752 = vmatprep.mubr.bf16.mxu1 %v1738_v14  ;;  %v3641_v30 = vld [vmem:[%s4457_s6 + $0x1d8] sm:$0xff]   ;;  %v3645_v34 = vld [vmem:[%s4457_s6 + $0x1d0] sm:$0xff]   ;;  %v3648_v37 = vld [vmem:[%s4457_s6 + $0x108] sm:$0xff]  }
  0xf2   : > { %3342 = vmatprep.subr.bf16.mxu0 %v3610_v53  ;;  %v3642_v31 = vld [vmem:[%s4457_s6 + $0x198] sm:$0xff]   ;;  %v3646_v35 = vld [vmem:[%s4457_s6 + $0x190] sm:$0xff]   ;;  %v3649_v38 = vld [vmem:[%s4457_s6 + $0x1c8] sm:$0xff]  }
  0xf3   : > { %3363 = vmatpush3.bf16.msra.mxu1 %v3609_v51  ;;  %v3650_v39 = vld [vmem:[%s4457_s6 + $0x188] sm:$0xff]   ;;  %v3651_v40 = vld [vmem:[%s4457_s6 + $0x140] sm:$0xff]   ;;  %v3655_v47 = vld [vmem:[%s4457_s6 + $0x278] sm:$0xff]  }
  0xf4   : > { %3364 = vmatprep.subr.bf16.mxu1 %v3612_v57  ;;  %v3652_v41 = vld [vmem:[%s4457_s6 + $0x100] sm:$0xff]   ;;  %v1418_v43 = vld [vmem:[%s4496_s10 + $0x8] sm:$0xff]  ;;  %v3657_v50 = vld [vmem:[%s4457_s6 + $0x238] sm:$0xff]  }
  0xf5   : > { %3343 = vmatpush3.bf16.msra.mxu0 %v3611_v56  ;;  %v3653_v42 = vld [vmem:[%s4457_s6 + $0x1c0] sm:$0xff]   ;;  %v1746_v44 = vrot.slane %v1418_v43, %v4498_v2  ;;  %v1739_v46 = vcombine.high %v1418_v43, %v1418_v43  ;;  %v3658_v51 = vld [vmem:[%s4457_s6 + $0x2f8] sm:$0xff]   ;;  %v3660_v54 = vld [vmem:[%s4457_s6 + $0x270] sm:$0xff]  }
  0xf6   : > { %3344 = vmatprep.subr.bf16.mxu0 %v3614_v60  ;;  %v3654_v45 = vld [vmem:[%s4457_s6 + $0x180] sm:$0xff]   ;;  %v3659_v53 = vld [vmem:[%s4457_s6 + $0x2b8] sm:$0xff]   ;;  %v3661_v55 = vld [vmem:[%s4457_s6 + $0x230] sm:$0xff]  }
  0xf7   : > { %3365 = vmatpush3.bf16.msra.mxu1 %v3613_v58  ;;  %v1754_v48 = vcombine.high %v1746_v44, %v1746_v44  ;;  %v1753_v49 = vrot.slane %v1739_v46, %v4498_v2  ;;  %v3662_v56 = vld [vmem:[%s4457_s6 + $0x2f0] sm:$0xff]   ;;  %v3664_v58 = vld [vmem:[%s4457_s6 + $0x268] sm:$0xff]   ;;  %v3674_v5 = vld [vmem:[%s4457_s6 + $0x2d8] sm:$0xff]  }
  0xf8   : > { %3366 = vmatprep.subr.bf16.mxu1 %v3616_v63  ;;  %v3663_v57 = vld [vmem:[%s4457_s6 + $0x2b0] sm:$0xff]   ;;  %v3665_v59 = vld [vmem:[%s4457_s6 + $0x228] sm:$0xff]   ;;  %v3669_v63 = vld [vmem:[%s4457_s6 + $0x220] sm:$0xff]  }
  0xf9   : > { %3345 = vmatpush3.bf16.msra.mxu0 %v3615_v62  ;;  %v1755_v52 = vcombine.high %v1753_v49, %v1753_v49  ;;  %v3666_v60 = vld [vmem:[%s4457_s6 + $0x2e8] sm:$0xff]   ;;  %v3668_v62 = vld [vmem:[%s4457_s6 + $0x260] sm:$0xff]   ;;  %v3677_v8 = vld [vmem:[%s4457_s6 + $0x210] sm:$0xff]  }
  0xfa   : > { %3346 = vmatprep.subr.bf16.mxu0 %v3618_v1  ;;  %v3667_v61 = vld [vmem:[%s4457_s6 + $0x2a8] sm:$0xff]   ;;  %v3671_v1 = vld [vmem:[%s4457_s6 + $0x2a0] sm:$0xff]   ;;  %v3679_v10 = vld [vmem:[%s4457_s6 + $0x290] sm:$0xff]  }
  0xfb   : > { %3367 = vmatpush3.bf16.msra.mxu1 %v3617_v0  ;;  %v3670_v0 = vld [vmem:[%s4457_s6 + $0x2e0] sm:$0xff]   ;;  %v3683_v14 = vld [vmem:[%s4457_s6 + $0x288] sm:$0xff]   ;;  %v3707_v43 = vld [vmem:[%s4457_s6 + $0x3d8] sm:$0xff]  }
  0xfc   : > { %3368 = vmatprep.subr.bf16.mxu1 %v3620_v4  ;;  %v3673_v4 = vld [vmem:[%s4457_s6 + $0x218] sm:$0xff]   ;;  %v3710_v46 = vld [vmem:[%s4457_s6 + $0x310] sm:$0xff]  }
  0xfd   : > { %3347 = vmatpush3.bf16.msra.mxu0 %v3619_v3  ;;  %v3672_v3 = vld [vmem:[%s4457_s6 + $0x258] sm:$0xff]  }
  0xfe   : > { %3376 = vmatprep.subr.bf16.mxu0 %v3622_v9  ;;  %v3678_v9 = vld [vmem:[%s4457_s6 + $0x2d0] sm:$0xff]  }
  0xff   : > { %3369 = vmatpush3.bf16.msra.mxu1 %v3621_v7  ;;  %v3676_v7 = vld [vmem:[%s4457_s6 + $0x250] sm:$0xff]  }
 0x100   : > { %2713 = vmatmul.mubr.bf16.vlgmr.msra.gmra.mxu0 %v1729_v6  ;;  %3398 = vmatprep.subr.bf16.mxu1 %v3625_v13  ;;  %v3675_v6 = vld [vmem:[%s4457_s6 + $0x298] sm:$0xff]   ;;  %v3682_v13 = vld [vmem:[%s4457_s6 + $0x2c8] sm:$0xff]  }
 0x101   : > { %3377 = vmatpush3.bf16.msra.mxu0 %v3624_v12  ;;  %2792 = vmatprep.mubr.bf16.mxu0 %v1754_v48  ;;  %v3681_v12 = vld [vmem:[%s4457_s6 + $0x208] sm:$0xff]   ;;  %v3712_v48 = vld [vmem:[%s4457_s6 + $0x390] sm:$0xff]  }
 0x102   : > { %2753 = vmatmul.mubr.bf16.vlgmr.msra.gmra.mxu1 %v1736_v11  ;;  %3378 = vmatprep.subr.bf16.mxu0 %v3627_v16  ;;  %v3680_v11 = vld [vmem:[%s4457_s6 + $0x248] sm:$0xff]   ;;  %v3685_v16 = vld [vmem:[%s4457_s6 + $0x200] sm:$0xff]  }
 0x103   : > { %3399 = vmatpush3.bf16.msra.mxu1 %v3626_v15  ;;  %2832 = vmatprep.mubr.bf16.mxu1 %v1755_v52  ;;  %v3684_v15 = vld [vmem:[%s4457_s6 + $0x240] sm:$0xff]   ;;  %v3716_v52 = vld [vmem:[%s4457_s6 + $0x388] sm:$0xff]  }
 0x104   : > { %3400 = vmatprep.subr.bf16.mxu1 %v3629_v18  ;;  %v1419_v18 = vld [vmem:[%s4496_s10 + $0x10] sm:$0xff] }
 0x105   : > { %3379 = vmatpush3.bf16.msra.mxu0 %v3628_v17  ;;  %v3686_v17 = vld [vmem:[%s4457_s6 + $0x2c0] sm:$0xff]  }
 0x106   : > { %3380 = vmatprep.subr.bf16.mxu0 %v3631_v20  ;;  %v3687_v20 = vld [vmem:[%s4457_s6 + $0x280] sm:$0xff]  }
 0x107   : > { %3401 = vmatpush3.bf16.msra.mxu1 %v3630_v19  ;;  %v1763_v19 = vrot.slane %v1419_v18, %v4498_v2 }
 0x108   : > { %3402 = vmatprep.subr.bf16.mxu1 %v3633_v22  ;;  %v3688_v22 = vld [vmem:[%s4457_s6 + $0x378] sm:$0xff]  }
 0x109   : > { %3381 = vmatpush3.bf16.msra.mxu0 %v3632_v21  ;;  %v1756_v21 = vcombine.high %v1419_v18, %v1419_v18  ;;  %v3184_v18 = vld [vmem:[%s1407_s21] ss:$0 sm:$0xff] }
 0x10a   : > { %3382 = vmatprep.subr.bf16.mxu0 %v3635_v24 }
 0x10b   : > { %3403 = vmatpush3.bf16.msra.mxu1 %v3634_v23  ;;  %v1771_v23 = vcombine.high %v1763_v19, %v1763_v19  ;;  %v1770_v24 = vrot.slane %v1756_v21, %v4498_v2 }
 0x10c   : > { %3404 = vmatprep.subr.bf16.mxu1 %v3637_v26  ;;  %v3691_v26 = vld [vmem:[%s4457_s6 + $0x3f8] sm:$0xff]  }
 0x10d   : > { %3383 = vmatpush3.bf16.msra.mxu0 %v3636_v25  ;;  %v3690_v25 = vld [vmem:[%s4457_s6 + $0x338] sm:$0xff]  }
 0x10e   : > { %3384 = vmatprep.subr.bf16.mxu0 %v3639_v28  ;;  %v3692_v28 = vld [vmem:[%s4457_s6 + $0x3b8] sm:$0xff]  }
 0x10f   : > { %3405 = vmatpush3.bf16.msra.mxu1 %v3638_v27  ;;  %v1772_v27 = vcombine.high %v1770_v24, %v1770_v24 }
 0x110   : > { %3406 = vmatprep.subr.bf16.mxu1 %v3641_v30  ;;  %v3694_v30 = vld [vmem:[%s4457_s6 + $0x330] sm:$0xff]  }
 0x111   : > { %3385 = vmatpush3.bf16.msra.mxu0 %v3640_v29  ;;  %v3693_v29 = vld [vmem:[%s4457_s6 + $0x370] sm:$0xff]  }
 0x112   : > { %3386 = vmatprep.subr.bf16.mxu0 %v3643_v32  ;;  %v3696_v32 = vld [vmem:[%s4457_s6 + $0x3b0] sm:$0xff]  }
 0x113   : > { %3407 = vmatpush3.bf16.msra.mxu1 %v3642_v31  ;;  %v3695_v31 = vld [vmem:[%s4457_s6 + $0x3f0] sm:$0xff]  }
 0x114   : > { %3408 = vmatprep.subr.bf16.mxu1 %v3645_v34  ;;  %v3698_v34 = vld [vmem:[%s4457_s6 + $0x328] sm:$0xff]  }
 0x115   : > { %3387 = vmatpush3.bf16.msra.mxu0 %v3644_v33  ;;  %v3697_v33 = vld [vmem:[%s4457_s6 + $0x368] sm:$0xff]  }
 0x116   : > { %3388 = vmatprep.subr.bf16.mxu0 %v3647_v36  ;;  %v3700_v36 = vld [vmem:[%s4457_s6 + $0x3a8] sm:$0xff]  }
 0x117   : > { %3409 = vmatpush3.bf16.msra.mxu1 %v3646_v35  ;;  %v3699_v35 = vld [vmem:[%s4457_s6 + $0x3e8] sm:$0xff]  }
 0x118   : > { %3410 = vmatprep.subr.bf16.mxu1 %v3649_v38  ;;  %v3702_v38 = vld [vmem:[%s4457_s6 + $0x320] sm:$0xff]  }
 0x119   : > { %3389 = vmatpush3.bf16.msra.mxu0 %v3648_v37  ;;  %v3701_v37 = vld [vmem:[%s4457_s6 + $0x360] sm:$0xff]  }
 0x11a   : > { %3390 = vmatprep.subr.bf16.mxu0 %v3651_v40  ;;  %v3704_v40 = vld [vmem:[%s4457_s6 + $0x3a0] sm:$0xff]  }
 0x11b   : > { %3411 = vmatpush3.bf16.msra.mxu1 %v3650_v39  ;;  %v3703_v39 = vld [vmem:[%s4457_s6 + $0x3e0] sm:$0xff]  }
 0x11c   : > { %3412 = vmatprep.subr.bf16.mxu1 %v3653_v42  ;;  %v3706_v42 = vld [vmem:[%s4457_s6 + $0x318] sm:$0xff]  }
 0x11d   : > { %3391 = vmatpush3.bf16.msra.mxu0 %v3652_v41  ;;  %v3705_v41 = vld [vmem:[%s4457_s6 + $0x358] sm:$0xff]  }
 0x11e   : > { %3420 = vmatprep.subr.bf16.mxu0 %v3655_v47  ;;  %v3711_v47 = vld [vmem:[%s4457_s6 + $0x3d0] sm:$0xff]  }
 0x11f   : > { %3413 = vmatpush3.bf16.msra.mxu1 %v3654_v45  ;;  %v3709_v45 = vld [vmem:[%s4457_s6 + $0x350] sm:$0xff]  }
 0x120   : > { %2793 = vmatmul.mubr.bf16.vlgmr.msra.gmra.mxu0 %v1746_v44  ;;  %3442 = vmatprep.subr.bf16.mxu1 %v3658_v51  ;;  %v3708_v44 = vld [vmem:[%s4457_s6 + $0x398] sm:$0xff]   ;;  %v3715_v51 = vld [vmem:[%s4457_s6 + $0x3c8] sm:$0xff]  }
 0x121   : > { %3421 = vmatpush3.bf16.msra.mxu0 %v3657_v50  ;;  %2872 = vmatprep.mubr.bf16.mxu0 %v1771_v23  ;;  %v3714_v50 = vld [vmem:[%s4457_s6 + $0x308] sm:$0xff]  }
 0x122   : > { %2833 = vmatmul.mubr.bf16.vlgmr.msra.gmra.mxu1 %v1753_v49  ;;  %3422 = vmatprep.subr.bf16.mxu0 %v3660_v54  ;;  %v3713_v49 = vld [vmem:[%s4457_s6 + $0x348] sm:$0xff]   ;;  %v3718_v54 = vld [vmem:[%s4457_s6 + $0x300] sm:$0xff]  }
 0x123   : > { %3443 = vmatpush3.bf16.msra.mxu1 %v3659_v53  ;;  %2912 = vmatprep.mubr.bf16.mxu1 %v1772_v27  ;;  %v3717_v53 = vld [vmem:[%s4457_s6 + $0x340] sm:$0xff]  }
 0x124   : > { %3444 = vmatprep.subr.bf16.mxu1 %v3662_v56  ;;  %v1420_v56 = vld [vmem:[%s4496_s10 + $0x18] sm:$0xff] }
 0x125   : > { %3423 = vmatpush3.bf16.msra.mxu0 %v3661_v55  ;;  %v3719_v55 = vld [vmem:[%s4457_s6 + $0x3c0] sm:$0xff]  }
 0x126   : > { %3424 = vmatprep.subr.bf16.mxu0 %v3664_v58  ;;  %v3720_v58 = vld [vmem:[%s4457_s6 + $0x380] sm:$0xff]  }
 0x127   : > { %3445 = vmatpush3.bf16.msra.mxu1 %v3663_v57  ;;  %v1780_v57 = vrot.slane %v1420_v56, %v4498_v2 }
 0x128   : > { %3446 = vmatprep.subr.bf16.mxu1 %v3666_v60  ;;  %v3721_v60 = vld [vmem:[%s4457_s6 + $0x478] sm:$0xff]  }
 0x129   : > { %3425 = vmatpush3.bf16.msra.mxu0 %v3665_v59  ;;  %v1773_v59 = vcombine.high %v1420_v56, %v1420_v56 }
 0x12a   : > { %3426 = vmatprep.subr.bf16.mxu0 %v3668_v62 }
 0x12b   : > { %3447 = vmatpush3.bf16.msra.mxu1 %v3667_v61  ;;  %v1788_v61 = vcombine.high %v1780_v57, %v1780_v57  ;;  %v1787_v62 = vrot.slane %v1773_v59, %v4498_v2  ;;  %v3727_v2 = vld [vmem:[%s4457_s6 + $0x428] sm:$0xff]  }
 0x12c   : > { %3448 = vmatprep.subr.bf16.mxu1 %v3670_v0  ;;  %v3724_v0 = vld [vmem:[%s4457_s6 + $0x470] sm:$0xff]  }
 0x12d   : > { %3427 = vmatpush3.bf16.msra.mxu0 %v3669_v63  ;;  %v3723_v63 = vld [vmem:[%s4457_s6 + $0x438] sm:$0xff]  }
 0x12e   : > { %3428 = vmatprep.subr.bf16.mxu0 %v3672_v3  ;;  %v3725_v3 = vld [vmem:[%s4457_s6 + $0x430] sm:$0xff]  }
 0x12f   : > { %3449 = vmatpush3.bf16.msra.mxu1 %v3671_v1  ;;  %v1789_v1 = vcombine.high %v1787_v62, %v1787_v62 }
 0x130   : > { %3450 = vmatprep.subr.bf16.mxu1 %v3674_v5  ;;  %v3728_v5 = vld [vmem:[%s4457_s6 + $0x460] sm:$0xff]  }
 0x131   : > { %3429 = vmatpush3.bf16.msra.mxu0 %v3673_v4  ;;  %v3726_v4 = vld [vmem:[%s4457_s6 + $0x468] sm:$0xff]  }
 0x132   : > { %3430 = vmatprep.subr.bf16.mxu0 %v3676_v7  ;;  %v3730_v7 = vld [vmem:[%s4457_s6 + $0x458] sm:$0xff]  }
 0x133   : > { %3451 = vmatpush3.bf16.msra.mxu1 %v3675_v6  ;;  %v3729_v6 = vld [vmem:[%s4457_s6 + $0x420] sm:$0xff]  }
 0x134   : > { %3452 = vmatprep.subr.bf16.mxu1 %v3678_v9 }
 0x135   : > { %3431 = vmatpush3.bf16.msra.mxu0 %v3677_v8  ;;  %v3185_v8 = vld.sshfl [vmem:[%s4496_s10 + $0x20] sm:$0x33 pattern:$0x76325410] }
 0x136   : > { %3432 = vmatprep.subr.bf16.mxu0 %v3680_v11  ;;  %v1797_v9 = vcombine.high %v3185_v8, %v3185_v8  ;;  %v3732_v11 = vld [vmem:[%s4457_s6 + $0x450] sm:$0xff]  }
 0x137   : > { %3453 = vmatpush3.bf16.msra.mxu1 %v3679_v10  ;;  %v3731_v10 = vld [vmem:[%s4457_s6 + $0x418] sm:$0xff]  }
 0x138   : > { %3454 = vmatprep.subr.bf16.mxu1 %v3682_v13  ;;  %v3734_v13 = vld [vmem:[%s4457_s6 + $0x448] sm:$0xff]  }
 0x139   : > { %3433 = vmatpush3.bf16.msra.mxu0 %v3681_v12  ;;  %v3733_v12 = vld [vmem:[%s4457_s6 + $0x410] sm:$0xff]  }
 0x13a   : > { %3434 = vmatprep.subr.bf16.mxu0 %v3684_v15  ;;  %v3736_v15 = vld [vmem:[%s4457_s6 + $0x440] sm:$0xff]  }
 0x13b   : > { %3455 = vmatpush3.bf16.msra.mxu1 %v3683_v14  ;;  %v3735_v14 = vld [vmem:[%s4457_s6 + $0x408] sm:$0xff]  }
 0x13c   : > { %3456 = vmatprep.subr.bf16.mxu1 %v3686_v17 }
 0x13d   : > { %3435 = vmatpush3.bf16.msra.mxu0 %v3685_v16  ;;  %v3737_v16 = vld [vmem:[%s4457_s6 + $0x400] sm:$0xff]  }
 0x13e   : > { %3464 = vmatprep.subr.bf16.mxu0 %v3688_v22 }
 0x13f   : > { %3457 = vmatpush3.bf16.msra.mxu1 %v3687_v20 }
 0x140   : > { %2873 = vmatmul.mubr.bf16.vlgmr.msra.gmra.mxu0 %v1763_v19  ;;  %3486 = vmatprep.subr.bf16.mxu1 %v3691_v26 }
 0x141   : > { %3465 = vmatpush3.bf16.msra.mxu0 %v3690_v25  ;;  %2952 = vmatprep.mubr.bf16.mxu0 %v1788_v61 }
 0x142   : > { %2913 = vmatmul.mubr.bf16.vlgmr.msra.gmra.mxu1 %v1770_v24  ;;  %3466 = vmatprep.subr.bf16.mxu0 %v3693_v29 }
 0x143   : > { %3487 = vmatpush3.bf16.msra.mxu1 %v3692_v28  ;;  %2992 = vmatprep.mubr.bf16.mxu1 %v1789_v1 }
 0x144   : > { %3488 = vmatprep.subr.bf16.mxu1 %v3695_v31 }
 0x145   : > { %3467 = vmatpush3.bf16.msra.mxu0 %v3694_v30 }
 0x146   : > { %3468 = vmatprep.subr.bf16.mxu0 %v3697_v33 }
 0x147   : > { %3489 = vmatpush3.bf16.msra.mxu1 %v3696_v32 }
 0x148   : > { %3490 = vmatprep.subr.bf16.mxu1 %v3699_v35 }
 0x149   : > { %3469 = vmatpush3.bf16.msra.mxu0 %v3698_v34 }
 0x14a   : > { %3470 = vmatprep.subr.bf16.mxu0 %v3701_v37 }
 0x14b   : > { %3491 = vmatpush3.bf16.msra.mxu1 %v3700_v36 }
 0x14c   : > { %3492 = vmatprep.subr.bf16.mxu1 %v3703_v39 }
 0x14d   : > { %3471 = vmatpush3.bf16.msra.mxu0 %v3702_v38 }
 0x14e   : > { %3472 = vmatprep.subr.bf16.mxu0 %v3705_v41 }
 0x14f   : > { %3493 = vmatpush3.bf16.msra.mxu1 %v3704_v40 }
 0x150   : > { %3494 = vmatprep.subr.bf16.mxu1 %v3707_v43 }
 0x151   : > { %3473 = vmatpush3.bf16.msra.mxu0 %v3706_v42 }
 0x152   : > { %3474 = vmatprep.subr.bf16.mxu0 %v3709_v45 }
 0x153   : > { %3495 = vmatpush3.bf16.msra.mxu1 %v3708_v44 }
 0x154   : > { %3496 = vmatprep.subr.bf16.mxu1 %v3711_v47 }
 0x155   : > { %3475 = vmatpush3.bf16.msra.mxu0 %v3710_v46 }
 0x156   : > { %3476 = vmatprep.subr.bf16.mxu0 %v3713_v49 }
 0x157   : > { %3497 = vmatpush3.bf16.msra.mxu1 %v3712_v48 }
 0x158   : > { %3498 = vmatprep.subr.bf16.mxu1 %v3715_v51 }
 0x159   : > { %3477 = vmatpush3.bf16.msra.mxu0 %v3714_v50 }
 0x15a   : > { %3478 = vmatprep.subr.bf16.mxu0 %v3717_v53 }
 0x15b   : > { %3499 = vmatpush3.bf16.msra.mxu1 %v3716_v52 }
 0x15c   : > { %3500 = vmatprep.subr.bf16.mxu1 %v3719_v55 }
 0x15d   : > { %3479 = vmatpush3.bf16.msra.mxu0 %v3718_v54 }
 0x15e   : > { %3508 = vmatprep.subr.bf16.mxu0 %v3721_v60 }
 0x15f   : > { %3501 = vmatpush3.bf16.msra.mxu1 %v3720_v58 }
 0x160   : > { %2953 = vmatmul.mubr.bf16.vlgmr.msra.gmra.mxu0 %v1780_v57 }
 0x161   : > { %3509 = vmatpush3.bf16.msra.mxu0 %v3723_v63  ;;  %3032 = vmatprep.mubr.bf16.mxu0 %v1797_v9 }
 0x162   : > { %2993 = vmatmul.mubr.bf16.vlgmr.msra.gmra.mxu1 %v1787_v62  ;;  %3510 = vmatprep.subr.bf16.mxu0 %v3724_v0 }
 0x165   : > { %3511 = vmatpush3.bf16.msra.mxu0 %v3725_v3 }
 0x166   : > { %3512 = vmatprep.subr.bf16.mxu0 %v3726_v4 }
 0x169   : > { %3513 = vmatpush3.bf16.msra.mxu0 %v3727_v2 }
 0x16a   : > { %3514 = vmatprep.subr.bf16.mxu0 %v3728_v5 }
 0x16d   : > { %3515 = vmatpush3.bf16.msra.mxu0 %v3729_v6 }
 0x16e   : > { %3516 = vmatprep.subr.bf16.mxu0 %v3730_v7 }
 0x171   : > { %3517 = vmatpush3.bf16.msra.mxu0 %v3731_v10 }
 0x172   : > { %3518 = vmatprep.subr.bf16.mxu0 %v3732_v11 }
 0x175   : > { %3519 = vmatpush3.bf16.msra.mxu0 %v3733_v12 }
 0x176   : > { %3520 = vmatprep.subr.bf16.mxu0 %v3734_v13 }
 0x179   : > { %3521 = vmatpush3.bf16.msra.mxu0 %v3735_v14 }
 0x17a   : > { %3522 = vmatprep.subr.bf16.mxu0 %v3736_v15 }
 0x17d   : > { %3523 = vmatpush3.bf16.msra.mxu0 %v3737_v16 }
 0x180   : > { %3033 = vmatmul.mubr.bf16.vlgmr.msra.gmra.mxu0 %v3185_v8 }
 0x1c0   : > { %v3348_v17 = vpop.f32.mrf.mxu0 }
 0x1c2   : > { %v3349_v19 = vpop.f32.mrf.mxu0  ;;  %v3370_v20 = vpop.f32.mrf.mxu1 }
 0x1c3   : > { %v3350_v21 = vadd.f32 %v3349_v19, %v3348_v17 }
 0x1c4   : > { %v3351_v22 = vpop.f32.mrf.mxu0  ;;  %v3371_v23 = vpop.f32.mrf.mxu1 }
 0x1c5   : > { %v2715_v24 = vadd.f32 %v3350_v21, %v3184_v18  ;;  %v3372_v25 = vadd.f32 %v3371_v23, %v3370_v20 }
 0x1c6   : > { %v3352_v26 = vpop.f32.mrf.mxu0  ;;  %v3373_v27 = vpop.f32.mrf.mxu1 }
 0x1c7   : > { %v2755_v28 = vadd.f32 %v3372_v25, %v2715_v24 }
 0x1c8   : > { %v3374_v29 = vpop.f32.mrf.mxu1 }
 0x1e0   : > { %v3392_v30 = vpop.f32.mrf.mxu0 }
 0x1e2   : > { %v3393_v31 = vpop.f32.mrf.mxu0  ;;  %v3414_v32 = vpop.f32.mrf.mxu1 }
 0x1e3   : > { %v3394_v33 = vadd.f32 %v3393_v31, %v3392_v30 }
 0x1e4   : > { %v3395_v34 = vpop.f32.mrf.mxu0  ;;  %v3415_v35 = vpop.f32.mrf.mxu1 }
 0x1e5   : > { %v2795_v36 = vadd.f32 %v3394_v33, %v2755_v28  ;;  %v3416_v37 = vadd.f32 %v3415_v35, %v3414_v32 }
 0x1e6   : > { %v3396_v38 = vpop.f32.mrf.mxu0  ;;  %v3417_v39 = vpop.f32.mrf.mxu1 }
 0x1e7   : > { %v2835_v40 = vadd.f32 %v3416_v37, %v2795_v36 }
 0x1e8   : > { %v3418_v41 = vpop.f32.mrf.mxu1 }
 0x200   : > { %v3436_v42 = vpop.f32.mrf.mxu0 }
 0x202   : > { %v3437_v43 = vpop.f32.mrf.mxu0  ;;  %v3458_v44 = vpop.f32.mrf.mxu1 }
 0x203   : > { %v3438_v58 = vadd.f32 %v3437_v43, %v3436_v42 }
 0x204   : > { %v3439_v45 = vpop.f32.mrf.mxu0  ;;  %v3459_v46 = vpop.f32.mrf.mxu1 }
 0x205   : > { %v2875_v59 = vadd.f32 %v3438_v58, %v2835_v40  ;;  %v3460_v60 = vadd.f32 %v3459_v46, %v3458_v44 }
 0x206   : > { %v3440_v47 = vpop.f32.mrf.mxu0  ;;  %v3461_v48 = vpop.f32.mrf.mxu1 }
 0x207   : > { %v2915_v62 = vadd.f32 %v3460_v60, %v2875_v59 }
 0x208   : > { %v3462_v49 = vpop.f32.mrf.mxu1 }
 0x220   : > { %v3480_v50 = vpop.f32.mrf.mxu0 }
 0x222   : > { %v3481_v51 = vpop.f32.mrf.mxu0  ;;  %v3502_v52 = vpop.f32.mrf.mxu1 }
 0x223   : > { %v3482_v61 = vadd.f32 %v3481_v51, %v3480_v50 }
 0x224   : > { %v3483_v53 = vpop.f32.mrf.mxu0  ;;  %v3503_v54 = vpop.f32.mrf.mxu1 }
 0x225   : > { %v2955_v63 = vadd.f32 %v3482_v61, %v2915_v62  ;;  %v3504_v0 = vadd.f32 %v3503_v54, %v3502_v52 }
 0x226   : > { %v3484_v55 = vpop.f32.mrf.mxu0  ;;  %v3505_v56 = vpop.f32.mrf.mxu1 }
 0x227   : > { %v2995_v4 = vadd.f32 %v3504_v0, %v2955_v63 }
 0x228   : > { %v3506_v57 = vpop.f32.mrf.mxu1 }
 0x240   : > { %v3524_v1 = vpop.f32.mrf.mxu0 }
 0x242   : > { %v3525_v3 = vpop.f32.mrf.mxu0 }
 0x243   : > { %v3526_v2 = vadd.f32 %v3525_v3, %v3524_v1 }
 0x244   : > { %v3527_v5 = vpop.f32.mrf.mxu0 }
 0x245   : > { %v3035_v6 = vadd.f32 %v3526_v2, %v2995_v4 }
 0x246   : > { %v3528_v7 = vpop.f32.mrf.mxu0 }
 0x247   : > { %v3041_v8 = vsel %vm3040_vm0, %v3035_v6, 0.0 }
 0x248   : > { %v3042_v9 = vrot.slane %v3041_v8, 4 }
 0x24a   : > { %v3043_v10 = vadd.f32 %v3042_v9, %v3041_v8 }
 0x24c   : > { %v3044_v11 = vrot.slane %v3043_v10, 2 }
 0x24e   : > { %v3045_v12 = vadd.f32 %v3044_v11, %v3043_v10 }
 0x250   : > { %v3046_v13 = vrot.slane %v3045_v12, 1 }
 0x252   : > { %v3047_v14 = vadd.f32 %v3046_v13, %v3045_v12 }
 0x254   : > { %v3049_v15 = vmul.f32 0.25, %v3047_v14 }
 0x256   : > { %v3050_v16 = vsub.f32 %v3035_v6, %v3049_v15 }
 0x258   : > { %v3051_v17 = vmul.f32 %v3050_v16, %v3050_v16 }
 0x25a   : > { %v3052_v18 = vsel %vm3040_vm0, %v3051_v17, 0.0 }
 0x25b   : > { %v3053_v19 = vrot.slane %v3052_v18, 4 }
 0x25d   : > { %v3054_v20 = vadd.f32 %v3053_v19, %v3052_v18 }
 0x25f   : > { %v3055_v21 = vrot.slane %v3054_v20, 2 }
 0x261   : > { %v3056_v22 = vadd.f32 %v3055_v21, %v3054_v20 }
 0x263   : > { %v3057_v23 = vrot.slane %v3056_v22, 1 }
 0x265   : > { %v3058_v24 = vadd.f32 %v3057_v23, %v3056_v22 }
 0x267   : > { %v3059_v25 = vmul.f32 0.25, %v3058_v24 }
 0x269   : > { %v3060_v26 = vadd.f32 1e-05, %v3059_v25 }
 0x26b   : > { %3738 = vrsqrt.f32 %v3060_v26 }
 0x278   : > { %v3739_v27 = vpop.eup %3738 }
 0x279   : > { %v3062_v28 = vmul.f32 %v3739_v27, %v3050_v16 }
 0x27b   : > { %vm3063_vm1 = vcmp.gt.f32.partialorder %v3062_v28, 0.0  ;;  %v3064_v29 = vmul.f32 0.2, %v3062_v28 }
 0x27d   : > { %v3065_v30 = vsel %vm3063_vm1, %v3062_v28, %v3064_v29 }
 0x27e   : > { %v3066_v31 = vpack.c.bf16 %v3065_v30, %v3065_v30 }
 0x280   : > { %3067 = vst [vmem:[%s1415_s28] sm:$0x3] %v3066_v31 }
 0x281 PF: > { %s13_s18 = sadd.s32 1, %s3794_s18   ;;  %s4666_s12 = smov %s3774_s13 }
 0x282   : > { %p10_p12 = scmp.ge.s32.totalorder %s13_s18, 10   ;;  %s4667_s13 = smov %s3866_s23 }
 0x283   : > { %s4668_s14 = smov %s3786_s16  ;;  %s4669_s15 = smov %s3790_s17 }
 0x284   : > { %s4670_s16 = smov %s4673_s19  ;;  %s4671_s17 = smov %s4677_s20 }
 0x285   :  { %12 = sbr.rel (!%p10_p12) target bundleno = 4 (0x4), region = 114 }

// kernel: discriminator_forward.9
= control target key start
LH: loop header
LB: loop body
LE: loop exit
PB: predicated region body
PF: predicated region fallthrough
CT: control target
= control target key end

     0   :  { %s4629_s14 = smov 0   ;;  %s4631_s15 = smov 0   ;;  %s5568_s0 = inlined_call_operand.vmem [shape: bf16[2,4,4608], index: 0, kind: input, shape index: {}]   ;;  %s5569_s1 = inlined_call_operand.vmem [shape: bf16[4608,1], index: 1, kind: input, shape index: {}]   ;;  %s5570_s2 = inlined_call_operand.<no memory space> [shape: f32[1,1], index: 2, kind: input, shape index: {}]   ;;  %s5571_s3 = inlined_call_operand.vmem [shape: f32[2,4,1], index: 3, kind: output, shape index: {}]  }
   0x1   :  { %v8_v0 = vstv %s5570_s2  ;;  %s4633_s16 = smov 0  }
   0x2   :  { %9 = vst [vmem:[#allocation2] sm:$0x1] %v8_v0 }
   0x3 LB: > { %s27_s2 = sadd.s32 1, %s4599_s15  ;;  %p3568_p0 = scmp.ge.s32.totalorder %s4603_s16, 1  ;;  %s4603_s16 = sphi %s4633_s16, %s15_s16   ;;  %s4599_s15 = sphi %s4631_s15, %s5573_s15   ;;  %s4595_s14 = sphi %s4629_s14, %s5572_s14  }
   0x4   : > { %p29_p1 = scmp.ge.s32.totalorder %s27_s2, 2  ;;  %p170_p2 = scmp.lt.s32.totalorder %s4603_s16, 3 }
   0x6   : > { %s5575_s2 = smov (%p29_p1, %s27_s2), 0  ;;  %p171_p3 = pnand %p3568_p0, %p170_p2 }
   0x7   : > { %p203_p4 = scmp.lt.s32.totalorder (!%p171_p3), %s4595_s14, 1 }
   0x8   : > { %174 = sbr.rel (%p171_p3) target bundleno = 505 (0x1f9), region = 32 }
   0xd   : > { %v4284_v1 = vld [vmem:[%s5569_s1 + $0x78] sm:$0xff]   ;;  %v4288_v5 = vld [vmem:[%s5569_s1 + $0x70] sm:$0xff]   ;;  %v4292_v9 = vld [vmem:[%s5569_s1 + $0x68] sm:$0xff]   ;;  %s5577_s14 = smov (!%p203_p4, %s4595_s14), 1  ;;  %v828_v29 = vlaneseq  ;;  %v4605_v37 = vmov 1983009808  }
   0xe   : > { %v4285_v2 = vld [vmem:[%s5569_s1 + $0xf8] sm:$0xff]   ;;  %3862 = vmatprep.subr.bf16.mxu0 %v4284_v1  ;;  %v4289_v6 = vld [vmem:[%s5569_s1 + $0xf0] sm:$0xff]   ;;  %v4293_v10 = vld [vmem:[%s5569_s1 + $0xe8] sm:$0xff]   ;;  %s4258_s21 = smul.u32 72, %s5577_s14  ;;  %v826_v38 = vunpack.c.l.s4 %v4605_v37  ;;  %vm3461_vm0 = vcmask 3072  }
   0xf   : > { %v4286_v3 = vld [vmem:[%s5569_s1 + $0x38] sm:$0xff]   ;;  %3884 = vmatprep.subr.bf16.mxu1 %v4285_v2  ;;  %v4290_v7 = vld [vmem:[%s5569_s1 + $0x30] sm:$0xff]   ;;  %v4294_v11 = vld [vmem:[%s5569_s1 + $0x28] sm:$0xff]   ;;  %v829_v34 = vshrl.u32 %v828_v29, 7 }
  0x10   : > { %v4287_v4 = vld [vmem:[%s5569_s1 + $0xb8] sm:$0xff]   ;;  %3863 = vmatpush3.bf16.msra.mxu0 %v4286_v3  ;;  %v4291_v8 = vld [vmem:[%s5569_s1 + $0xb0] sm:$0xff]   ;;  %v4295_v12 = vld [vmem:[%s5569_s1 + $0xa8] sm:$0xff]   ;;  %s4747_s5 = scalar_lea.vmem %s5568_s0, %s4258_s21  ;;  %v827_v40 = vunpack.c.0.s8 %v826_v38 }
  0x11   : > { %3885 = vmatpush3.bf16.msra.mxu1 %v4287_v4  ;;  %3864 = vmatprep.subr.bf16.mxu0 %v4288_v5  ;;  %v4296_v13 = vld [vmem:[%s5569_s1 + $0x60] sm:$0xff]   ;;  %v4300_v17 = vld [vmem:[%s5569_s1 + $0x58] sm:$0xff]   ;;  %v4304_v21 = vld [vmem:[%s5569_s1 + $0x50] sm:$0xff]  }
  0x12   : > { %3886 = vmatprep.subr.bf16.mxu1 %v4289_v6  ;;  %v4297_v14 = vld [vmem:[%s5569_s1 + $0xe0] sm:$0xff]   ;;  %v4301_v18 = vld [vmem:[%s5569_s1 + $0xd8] sm:$0xff]   ;;  %v4305_v22 = vld [vmem:[%s5569_s1 + $0xd0] sm:$0xff]   ;;  %v4762_v42 = vsub.s32 %v827_v40, %v829_v34 }
  0x13   : > { %v4298_v15 = vld [vmem:[%s5569_s1 + $0x20] sm:$0xff]   ;;  %v4302_v19 = vld [vmem:[%s5569_s1 + $0x18] sm:$0xff]   ;;  %v4306_v23 = vld [vmem:[%s5569_s1 + $0x10] sm:$0xff]  }
  0x14   : > { %3865 = vmatpush3.bf16.msra.mxu0 %v4290_v7  ;;  %v4299_v16 = vld [vmem:[%s5569_s1 + $0xa0] sm:$0xff]   ;;  %v4303_v20 = vld [vmem:[%s5569_s1 + $0x98] sm:$0xff]   ;;  %v4307_v24 = vld [vmem:[%s5569_s1 + $0x90] sm:$0xff]  }
  0x15   : > { %3887 = vmatpush3.bf16.msra.mxu1 %v4291_v8  ;;  %3866 = vmatprep.subr.bf16.mxu0 %v4292_v9  ;;  %v4308_v25 = vld [vmem:[%s5569_s1 + $0x48] sm:$0xff]   ;;  %v4312_v30 = vld [vmem:[%s5569_s1 + $0x40] sm:$0xff]   ;;  %v4317_v36 = vld [vmem:[%s5569_s1 + $0x178] sm:$0xff]  }
  0x16   : > { %3888 = vmatprep.subr.bf16.mxu1 %v4293_v10  ;;  %v4309_v26 = vld [vmem:[%s5569_s1 + $0xc8] sm:$0xff]   ;;  %v4313_v31 = vld [vmem:[%s5569_s1 + $0xc0] sm:$0xff]   ;;  %v4318_v39 = vld [vmem:[%s5569_s1 + $0x1f8] sm:$0xff]  }
  0x17   : > { %v4310_v27 = vld [vmem:[%s5569_s1 + $0x8] sm:$0xff]   ;;  %v4314_v32 = vld [vmem:[%s5569_s1] sm:$0xff]   ;;  %v4319_v45 = vld [vmem:[%s5569_s1 + $0x138] sm:$0xff]  }
  0x18   : > { %3867 = vmatpush3.bf16.msra.mxu0 %v4294_v11  ;;  %v4311_v28 = vld [vmem:[%s5569_s1 + $0x88] sm:$0xff]   ;;  %v4315_v33 = vld [vmem:[%s5569_s1 + $0x80] sm:$0xff]   ;;  %v4320_v46 = vld [vmem:[%s5569_s1 + $0x1b8] sm:$0xff]  }
  0x19   : > { %3889 = vmatpush3.bf16.msra.mxu1 %v4295_v12  ;;  %3868 = vmatprep.subr.bf16.mxu0 %v4296_v13  ;;  %v223_v35 = vld [vmem:[%s4747_s5] sm:$0xff]  ;;  %v4321_v49 = vld [vmem:[%s5569_s1 + $0x170] sm:$0xff]   ;;  %v4325_v53 = vld [vmem:[%s5569_s1 + $0x168] sm:$0xff]  }
  0x1a   : > { %3890 = vmatprep.subr.bf16.mxu1 %v4297_v14  ;;  %v824_v41 = vcombine.high %v223_v35, %v223_v35  ;;  %v831_v43 = vrot.slane %v223_v35, %v4762_v42  ;;  %v4322_v50 = vld [vmem:[%s5569_s1 + $0x1f0] sm:$0xff]   ;;  %v4326_v54 = vld [vmem:[%s5569_s1 + $0x1e8] sm:$0xff]   ;;  %v4329_v57 = vld [vmem:[%s5569_s1 + $0x160] sm:$0xff]  }
  0x1b   : > { %v4323_v51 = vld [vmem:[%s5569_s1 + $0x130] sm:$0xff]   ;;  %v4327_v55 = vld [vmem:[%s5569_s1 + $0x128] sm:$0xff]   ;;  %v4330_v58 = vld [vmem:[%s5569_s1 + $0x1e0] sm:$0xff]  }
  0x1c   : > { %3869 = vmatpush3.bf16.msra.mxu0 %v4298_v15  ;;  %v838_v44 = vrot.slane %v824_v41, %v4762_v42  ;;  %v839_v47 = vcombine.high %v831_v43, %v831_v43  ;;  %v4324_v52 = vld [vmem:[%s5569_s1 + $0x1b0] sm:$0xff]   ;;  %v4328_v56 = vld [vmem:[%s5569_s1 + $0x1a8] sm:$0xff]   ;;  %v4331_v59 = vld [vmem:[%s5569_s1 + $0x120] sm:$0xff]  }
  0x1d   : > { %3891 = vmatpush3.bf16.msra.mxu1 %v4299_v16  ;;  %3870 = vmatprep.subr.bf16.mxu0 %v4300_v17  ;;  %v4332_v60 = vld [vmem:[%s5569_s1 + $0x1a0] sm:$0xff]   ;;  %v4333_v61 = vld [vmem:[%s5569_s1 + $0x158] sm:$0xff]   ;;  %v4337_v1 = vld [vmem:[%s5569_s1 + $0x150] sm:$0xff]  }
  0x1e   : > { %3892 = vmatprep.subr.bf16.mxu1 %v4301_v18  ;;  %v840_v48 = vcombine.high %v838_v44, %v838_v44  ;;  %2773 = vmatprep.mubr.bf16.mxu0 %v839_v47  ;;  %v4334_v62 = vld [vmem:[%s5569_s1 + $0x1d8] sm:$0xff]   ;;  %v4338_v2 = vld [vmem:[%s5569_s1 + $0x1d0] sm:$0xff]   ;;  %v4341_v5 = vld [vmem:[%s5569_s1 + $0x148] sm:$0xff]  }
  0x1f   : > { %v4335_v63 = vld [vmem:[%s5569_s1 + $0x118] sm:$0xff]   ;;  %v4339_v3 = vld [vmem:[%s5569_s1 + $0x110] sm:$0xff]   ;;  %v4342_v6 = vld [vmem:[%s5569_s1 + $0x1c8] sm:$0xff]  }
  0x20   : > { %3871 = vmatpush3.bf16.msra.mxu0 %v4302_v19  ;;  %2813 = vmatprep.mubr.bf16.mxu1 %v840_v48  ;;  %v4336_v0 = vld [vmem:[%s5569_s1 + $0x198] sm:$0xff]   ;;  %v4340_v4 = vld [vmem:[%s5569_s1 + $0x190] sm:$0xff]   ;;  %v4343_v7 = vld [vmem:[%s5569_s1 + $0x108] sm:$0xff]  }
  0x21   : > { %3893 = vmatpush3.bf16.msra.mxu1 %v4303_v20  ;;  %3872 = vmatprep.subr.bf16.mxu0 %v4304_v21  ;;  %v4344_v8 = vld [vmem:[%s5569_s1 + $0x188] sm:$0xff]   ;;  %v4345_v10 = vld [vmem:[%s5569_s1 + $0x140] sm:$0xff]   ;;  %v4350_v19 = vld [vmem:[%s5569_s1 + $0x278] sm:$0xff]  }
  0x22   : > { %3894 = vmatprep.subr.bf16.mxu1 %v4305_v22  ;;  %v224_v9 = vld [vmem:[%s4747_s5 + $0x8] sm:$0xff]  ;;  %v4346_v13 = vld [vmem:[%s5569_s1 + $0x1c0] sm:$0xff]   ;;  %v4351_v20 = vld [vmem:[%s5569_s1 + $0x2f8] sm:$0xff]  }
  0x23   : > { %v848_v11 = vrot.slane %v224_v9, %v4762_v42  ;;  %v841_v12 = vcombine.high %v224_v9, %v224_v9  ;;  %v4347_v14 = vld [vmem:[%s5569_s1 + $0x100] sm:$0xff]   ;;  %v4352_v21 = vld [vmem:[%s5569_s1 + $0x238] sm:$0xff]   ;;  %v4360_v29 = vld [vmem:[%s5569_s1 + $0x228] sm:$0xff]  }
  0x24   : > { %3873 = vmatpush3.bf16.msra.mxu0 %v4306_v23  ;;  %v4348_v17 = vld [vmem:[%s5569_s1 + $0x180] sm:$0xff]   ;;  %v4353_v22 = vld [vmem:[%s5569_s1 + $0x2b8] sm:$0xff]   ;;  %v4354_v23 = vld [vmem:[%s5569_s1 + $0x270] sm:$0xff]  }
  0x25   : > { %3895 = vmatpush3.bf16.msra.mxu1 %v4307_v24  ;;  %3874 = vmatprep.subr.bf16.mxu0 %v4308_v25  ;;  %v856_v15 = vcombine.high %v848_v11, %v848_v11  ;;  %v855_v16 = vrot.slane %v841_v12, %v4762_v42  ;;  %v4355_v24 = vld [vmem:[%s5569_s1 + $0x2f0] sm:$0xff]   ;;  %v4365_v34 = vld [vmem:[%s5569_s1 + $0x2a0] sm:$0xff]   ;;  %v4366_v35 = vld [vmem:[%s5569_s1 + $0x258] sm:$0xff]  }
  0x26   : > { %3896 = vmatprep.subr.bf16.mxu1 %v4309_v26  ;;  %v4356_v25 = vld [vmem:[%s5569_s1 + $0x230] sm:$0xff]   ;;  %v4368_v37 = vld [vmem:[%s5569_s1 + $0x218] sm:$0xff]   ;;  %v4377_v47 = vld [vmem:[%s5569_s1 + $0x288] sm:$0xff]  }
  0x27   : > { %v857_v18 = vcombine.high %v855_v16, %v855_v16  ;;  %v4357_v26 = vld [vmem:[%s5569_s1 + $0x2b0] sm:$0xff]   ;;  %v4369_v38 = vld [vmem:[%s5569_s1 + $0x298] sm:$0xff]   ;;  %v4398_v9 = vld [vmem:[%s5569_s1 + $0x3a0] sm:$0xff]  }
  0x28   : > { %3875 = vmatpush3.bf16.msra.mxu0 %v4310_v27  ;;  %v4358_v27 = vld [vmem:[%s5569_s1 + $0x268] sm:$0xff]   ;;  %v4371_v40 = vld [vmem:[%s5569_s1 + $0x2d0] sm:$0xff]   ;;  %v4401_v12 = vld [vmem:[%s5569_s1 + $0x318] sm:$0xff]  }
  0x29   : > { %3897 = vmatpush3.bf16.msra.mxu1 %v4311_v28  ;;  %3876 = vmatprep.subr.bf16.mxu0 %v4312_v30  ;;  %v4359_v28 = vld [vmem:[%s5569_s1 + $0x2e8] sm:$0xff]   ;;  %v4372_v41 = vld [vmem:[%s5569_s1 + $0x210] sm:$0xff]  }
  0x2a   : > { %3898 = vmatprep.subr.bf16.mxu1 %v4313_v31  ;;  %v4361_v30 = vld [vmem:[%s5569_s1 + $0x2a8] sm:$0xff]   ;;  %v4362_v31 = vld [vmem:[%s5569_s1 + $0x260] sm:$0xff]   ;;  %v225_v48 = vld [vmem:[%s4747_s5 + $0x10] sm:$0xff] }
  0x2c   : > { %3877 = vmatpush3.bf16.msra.mxu0 %v4314_v32  ;;  %v4363_v32 = vld [vmem:[%s5569_s1 + $0x2e0] sm:$0xff]  }
  0x2d   : > { %3899 = vmatpush3.bf16.msra.mxu1 %v4315_v33  ;;  %3906 = vmatprep.subr.bf16.mxu0 %v4317_v36  ;;  %v4364_v33 = vld [vmem:[%s5569_s1 + $0x220] sm:$0xff]   ;;  %v4367_v36 = vld [vmem:[%s5569_s1 + $0x2d8] sm:$0xff]  }
  0x2e   : > { %3928 = vmatprep.subr.bf16.mxu1 %v4318_v39  ;;  %v4370_v39 = vld [vmem:[%s5569_s1 + $0x250] sm:$0xff]  }
  0x2f   : > { %2774 = vmatmul.mubr.bf16.vlgmr.msra.gmra.mxu0 %v831_v43  ;;  %v4373_v43 = vld [vmem:[%s5569_s1 + $0x290] sm:$0xff]  }
  0x30   : > { %2814 = vmatmul.mubr.bf16.vlgmr.msra.gmra.mxu1 %v838_v44  ;;  %3907 = vmatpush3.bf16.msra.mxu0 %v4319_v45  ;;  %v4374_v44 = vld [vmem:[%s5569_s1 + $0x248] sm:$0xff]  }
  0x31   : > { %3929 = vmatpush3.bf16.msra.mxu1 %v4320_v46  ;;  %3908 = vmatprep.subr.bf16.mxu0 %v4321_v49  ;;  %v4375_v45 = vld [vmem:[%s5569_s1 + $0x2c8] sm:$0xff]   ;;  %v4378_v49 = vld [vmem:[%s5569_s1 + $0x240] sm:$0xff]  }
  0x32   : > { %3930 = vmatprep.subr.bf16.mxu1 %v4322_v50  ;;  %2853 = vmatprep.mubr.bf16.mxu0 %v856_v15  ;;  %v4376_v46 = vld [vmem:[%s5569_s1 + $0x208] sm:$0xff]   ;;  %v865_v50 = vrot.slane %v225_v48, %v4762_v42  ;;  %v4404_v15 = vld [vmem:[%s5569_s1 + $0x3d0] sm:$0xff]  }
  0x33   : > { %2893 = vmatprep.mubr.bf16.mxu1 %v857_v18  ;;  %v4407_v18 = vld [vmem:[%s5569_s1 + $0x348] sm:$0xff]  }
  0x34   : > { %3909 = vmatpush3.bf16.msra.mxu0 %v4323_v51  ;;  %v858_v51 = vcombine.high %v225_v48, %v225_v48  ;;  %v4431_v48 = vld [vmem:[%s5569_s1 + $0x4a0] sm:$0xff]  }
  0x35   : > { %3931 = vmatpush3.bf16.msra.mxu1 %v4324_v52  ;;  %3910 = vmatprep.subr.bf16.mxu0 %v4325_v53  ;;  %v4379_v52 = vld [vmem:[%s5569_s1 + $0x2c0] sm:$0xff]  }
  0x36   : > { %3932 = vmatprep.subr.bf16.mxu1 %v4326_v54  ;;  %v4380_v53 = vld [vmem:[%s5569_s1 + $0x200] sm:$0xff]   ;;  %v873_v54 = vcombine.high %v865_v50, %v865_v50 }
  0x38   : > { %3911 = vmatpush3.bf16.msra.mxu0 %v4327_v55  ;;  %v872_v55 = vrot.slane %v858_v51, %v4762_v42  ;;  %v4434_v51 = vld [vmem:[%s5569_s1 + $0x418] sm:$0xff]  }
  0x39   : > { %3933 = vmatpush3.bf16.msra.mxu1 %v4328_v56  ;;  %3912 = vmatprep.subr.bf16.mxu0 %v4329_v57  ;;  %v4381_v56 = vld [vmem:[%s5569_s1 + $0x280] sm:$0xff]  }
  0x3a   : > { %3934 = vmatprep.subr.bf16.mxu1 %v4330_v58  ;;  %v874_v57 = vcombine.high %v872_v55, %v872_v55  ;;  %v4383_v58 = vld [vmem:[%s5569_s1 + $0x378] sm:$0xff]  }
  0x3c   : > { %3913 = vmatpush3.bf16.msra.mxu0 %v4331_v59  ;;  %v4384_v59 = vld [vmem:[%s5569_s1 + $0x3f8] sm:$0xff]  }
  0x3d   : > { %3935 = vmatpush3.bf16.msra.mxu1 %v4332_v60  ;;  %3914 = vmatprep.subr.bf16.mxu0 %v4333_v61  ;;  %v4385_v60 = vld [vmem:[%s5569_s1 + $0x338] sm:$0xff]  }
  0x3e   : > { %3936 = vmatprep.subr.bf16.mxu1 %v4334_v62  ;;  %v4386_v61 = vld [vmem:[%s5569_s1 + $0x3b8] sm:$0xff]   ;;  %v4387_v62 = vld [vmem:[%s5569_s1 + $0x370] sm:$0xff]  }
  0x40   : > { %3915 = vmatpush3.bf16.msra.mxu0 %v4335_v63  ;;  %v4388_v63 = vld [vmem:[%s5569_s1 + $0x3f0] sm:$0xff]  }
  0x41   : > { %3937 = vmatpush3.bf16.msra.mxu1 %v4336_v0  ;;  %3916 = vmatprep.subr.bf16.mxu0 %v4337_v1  ;;  %v4389_v0 = vld [vmem:[%s5569_s1 + $0x330] sm:$0xff]  }
  0x42   : > { %3938 = vmatprep.subr.bf16.mxu1 %v4338_v2  ;;  %v4390_v1 = vld [vmem:[%s5569_s1 + $0x3b0] sm:$0xff]   ;;  %v4391_v2 = vld [vmem:[%s5569_s1 + $0x368] sm:$0xff]  }
  0x44   : > { %3917 = vmatpush3.bf16.msra.mxu0 %v4339_v3  ;;  %v4392_v3 = vld [vmem:[%s5569_s1 + $0x3e8] sm:$0xff]  }
  0x45   : > { %3939 = vmatpush3.bf16.msra.mxu1 %v4340_v4  ;;  %3918 = vmatprep.subr.bf16.mxu0 %v4341_v5  ;;  %v4393_v4 = vld [vmem:[%s5569_s1 + $0x328] sm:$0xff]  }
  0x46   : > { %3940 = vmatprep.subr.bf16.mxu1 %v4342_v6  ;;  %v4394_v5 = vld [vmem:[%s5569_s1 + $0x3a8] sm:$0xff]   ;;  %v4395_v6 = vld [vmem:[%s5569_s1 + $0x360] sm:$0xff]  }
  0x48   : > { %3919 = vmatpush3.bf16.msra.mxu0 %v4343_v7  ;;  %v4396_v7 = vld [vmem:[%s5569_s1 + $0x3e0] sm:$0xff]  }
  0x49   : > { %3941 = vmatpush3.bf16.msra.mxu1 %v4344_v8  ;;  %3920 = vmatprep.subr.bf16.mxu0 %v4345_v10  ;;  %v4397_v8 = vld [vmem:[%s5569_s1 + $0x320] sm:$0xff]   ;;  %v4399_v10 = vld [vmem:[%s5569_s1 + $0x358] sm:$0xff]  }
  0x4a   : > { %3942 = vmatprep.subr.bf16.mxu1 %v4346_v13  ;;  %v4402_v13 = vld [vmem:[%s5569_s1 + $0x398] sm:$0xff]  }
  0x4c   : > { %3921 = vmatpush3.bf16.msra.mxu0 %v4347_v14  ;;  %v4403_v14 = vld [vmem:[%s5569_s1 + $0x350] sm:$0xff]  }
  0x4d   : > { %3943 = vmatpush3.bf16.msra.mxu1 %v4348_v17  ;;  %3950 = vmatprep.subr.bf16.mxu0 %v4350_v19  ;;  %v4406_v17 = vld [vmem:[%s5569_s1 + $0x390] sm:$0xff]   ;;  %v4408_v19 = vld [vmem:[%s5569_s1 + $0x3c8] sm:$0xff]  }
  0x4e   : > { %3972 = vmatprep.subr.bf16.mxu1 %v4351_v20  ;;  %v4409_v20 = vld [vmem:[%s5569_s1 + $0x308] sm:$0xff]  }
  0x4f   : > { %2854 = vmatmul.mubr.bf16.vlgmr.msra.gmra.mxu0 %v848_v11  ;;  %v4400_v11 = vld [vmem:[%s5569_s1 + $0x3d8] sm:$0xff]  }
  0x50   : > { %2894 = vmatmul.mubr.bf16.vlgmr.msra.gmra.mxu1 %v855_v16  ;;  %3951 = vmatpush3.bf16.msra.mxu0 %v4352_v21  ;;  %v4405_v16 = vld [vmem:[%s5569_s1 + $0x310] sm:$0xff]   ;;  %v4410_v21 = vld [vmem:[%s5569_s1 + $0x388] sm:$0xff]  }
  0x51   : > { %3973 = vmatpush3.bf16.msra.mxu1 %v4353_v22  ;;  %3952 = vmatprep.subr.bf16.mxu0 %v4354_v23  ;;  %v4411_v22 = vld [vmem:[%s5569_s1 + $0x340] sm:$0xff]   ;;  %v226_v23 = vld [vmem:[%s4747_s5 + $0x18] sm:$0xff] }
  0x52   : > { %3974 = vmatprep.subr.bf16.mxu1 %v4355_v24  ;;  %2933 = vmatprep.mubr.bf16.mxu0 %v873_v54  ;;  %v4412_v24 = vld [vmem:[%s5569_s1 + $0x3c0] sm:$0xff]   ;;  %v4437_v54 = vld [vmem:[%s5569_s1 + $0x4d0] sm:$0xff]  }
  0x53   : > { %2973 = vmatprep.mubr.bf16.mxu1 %v874_v57  ;;  %v4440_v57 = vld [vmem:[%s5569_s1 + $0x448] sm:$0xff]  }
  0x54   : > { %3953 = vmatpush3.bf16.msra.mxu0 %v4356_v25  ;;  %v882_v25 = vrot.slane %v226_v23, %v4762_v42 }
  0x55   : > { %3975 = vmatpush3.bf16.msra.mxu1 %v4357_v26  ;;  %3954 = vmatprep.subr.bf16.mxu0 %v4358_v27  ;;  %v875_v26 = vcombine.high %v226_v23, %v226_v23  ;;  %v4413_v27 = vld [vmem:[%s5569_s1 + $0x300] sm:$0xff]   ;;  %v4465_v23 = vld [vmem:[%s5569_s1 + $0x558] sm:$0xff]  }
  0x56   : > { %3976 = vmatprep.subr.bf16.mxu1 %v4359_v28  ;;  %v4414_v28 = vld [vmem:[%s5569_s1 + $0x380] sm:$0xff]  }
  0x58   : > { %3955 = vmatpush3.bf16.msra.mxu0 %v4360_v29  ;;  %v890_v29 = vcombine.high %v882_v25, %v882_v25 }
  0x59   : > { %3977 = vmatpush3.bf16.msra.mxu1 %v4361_v30  ;;  %3956 = vmatprep.subr.bf16.mxu0 %v4362_v31  ;;  %v889_v30 = vrot.slane %v875_v26, %v4762_v42  ;;  %v4416_v31 = vld [vmem:[%s5569_s1 + $0x478] sm:$0xff]  }
  0x5a   : > { %3978 = vmatprep.subr.bf16.mxu1 %v4363_v32  ;;  %v4468_v26 = vld [vmem:[%s5569_s1 + $0x598] sm:$0xff]  }
  0x5b   : > { %v891_v32 = vcombine.high %v889_v30, %v889_v30 }
  0x5c   : > { %3957 = vmatpush3.bf16.msra.mxu0 %v4364_v33  ;;  %v4417_v33 = vld [vmem:[%s5569_s1 + $0x4f8] sm:$0xff]  }
  0x5d   : > { %3979 = vmatpush3.bf16.msra.mxu1 %v4365_v34  ;;  %3958 = vmatprep.subr.bf16.mxu0 %v4366_v35  ;;  %v4418_v34 = vld [vmem:[%s5569_s1 + $0x438] sm:$0xff]  }
  0x5e   : > { %3980 = vmatprep.subr.bf16.mxu1 %v4367_v36  ;;  %v4419_v35 = vld [vmem:[%s5569_s1 + $0x4b8] sm:$0xff]   ;;  %v4420_v36 = vld [vmem:[%s5569_s1 + $0x470] sm:$0xff]  }
  0x60   : > { %3959 = vmatpush3.bf16.msra.mxu0 %v4368_v37  ;;  %v4421_v37 = vld [vmem:[%s5569_s1 + $0x4f0] sm:$0xff]  }
  0x61   : > { %3981 = vmatpush3.bf16.msra.mxu1 %v4369_v38  ;;  %3960 = vmatprep.subr.bf16.mxu0 %v4370_v39  ;;  %v4422_v38 = vld [vmem:[%s5569_s1 + $0x430] sm:$0xff]  }
  0x62   : > { %3982 = vmatprep.subr.bf16.mxu1 %v4371_v40  ;;  %v4423_v39 = vld [vmem:[%s5569_s1 + $0x4b0] sm:$0xff]   ;;  %v4424_v40 = vld [vmem:[%s5569_s1 + $0x468] sm:$0xff]  }
  0x64   : > { %3961 = vmatpush3.bf16.msra.mxu0 %v4372_v41  ;;  %v4425_v41 = vld [vmem:[%s5569_s1 + $0x4e8] sm:$0xff]  }
  0x65   : > { %3983 = vmatpush3.bf16.msra.mxu1 %v4373_v43  ;;  %3962 = vmatprep.subr.bf16.mxu0 %v4374_v44  ;;  %v4426_v43 = vld [vmem:[%s5569_s1 + $0x428] sm:$0xff]  }
  0x66   : > { %3984 = vmatprep.subr.bf16.mxu1 %v4375_v45  ;;  %v4427_v44 = vld [vmem:[%s5569_s1 + $0x4a8] sm:$0xff]   ;;  %v4428_v45 = vld [vmem:[%s5569_s1 + $0x460] sm:$0xff]  }
  0x68   : > { %3963 = vmatpush3.bf16.msra.mxu0 %v4376_v46  ;;  %v4429_v46 = vld [vmem:[%s5569_s1 + $0x4e0] sm:$0xff]  }
  0x69   : > { %3985 = vmatpush3.bf16.msra.mxu1 %v4377_v47  ;;  %3964 = vmatprep.subr.bf16.mxu0 %v4378_v49  ;;  %v4430_v47 = vld [vmem:[%s5569_s1 + $0x420] sm:$0xff]   ;;  %v4432_v49 = vld [vmem:[%s5569_s1 + $0x458] sm:$0xff]  }
  0x6a   : > { %3986 = vmatprep.subr.bf16.mxu1 %v4379_v52  ;;  %v4435_v52 = vld [vmem:[%s5569_s1 + $0x498] sm:$0xff]  }
  0x6c   : > { %3965 = vmatpush3.bf16.msra.mxu0 %v4380_v53  ;;  %v4436_v53 = vld [vmem:[%s5569_s1 + $0x450] sm:$0xff]  }
  0x6d   : > { %3987 = vmatpush3.bf16.msra.mxu1 %v4381_v56  ;;  %3994 = vmatprep.subr.bf16.mxu0 %v4383_v58  ;;  %v4439_v56 = vld [vmem:[%s5569_s1 + $0x490] sm:$0xff]   ;;  %v4441_v58 = vld [vmem:[%s5569_s1 + $0x4c8] sm:$0xff]  }
  0x6e   : > { %4016 = vmatprep.subr.bf16.mxu1 %v4384_v59  ;;  %v4442_v59 = vld [vmem:[%s5569_s1 + $0x408] sm:$0xff]  }
  0x6f   : > { %2934 = vmatmul.mubr.bf16.vlgmr.msra.gmra.mxu0 %v865_v50  ;;  %v4433_v50 = vld [vmem:[%s5569_s1 + $0x4d8] sm:$0xff]  }
  0x70   : > { %2974 = vmatmul.mubr.bf16.vlgmr.msra.gmra.mxu1 %v872_v55  ;;  %3995 = vmatpush3.bf16.msra.mxu0 %v4385_v60  ;;  %v4438_v55 = vld [vmem:[%s5569_s1 + $0x410] sm:$0xff]   ;;  %v4443_v60 = vld [vmem:[%s5569_s1 + $0x488] sm:$0xff]  }
  0x71   : > { %4017 = vmatpush3.bf16.msra.mxu1 %v4386_v61  ;;  %3996 = vmatprep.subr.bf16.mxu0 %v4387_v62  ;;  %v4444_v61 = vld [vmem:[%s5569_s1 + $0x440] sm:$0xff]  }
  0x72   : > { %4018 = vmatprep.subr.bf16.mxu1 %v4388_v63  ;;  %3013 = vmatprep.mubr.bf16.mxu0 %v890_v29  ;;  %v227_v62 = vld [vmem:[%s4747_s5 + $0x20] sm:$0xff]  ;;  %v4471_v29 = vld [vmem:[%s5569_s1 + $0x510] sm:$0xff]  }
  0x73   : > { %3053 = vmatprep.mubr.bf16.mxu1 %v891_v32  ;;  %v4445_v63 = vld [vmem:[%s5569_s1 + $0x4c0] sm:$0xff]   ;;  %v4474_v32 = vld [vmem:[%s5569_s1 + $0x5c8] sm:$0xff]  }
  0x74   : > { %3997 = vmatpush3.bf16.msra.mxu0 %v4389_v0  ;;  %v899_v0 = vrot.slane %v227_v62, %v4762_v42 }
  0x75   : > { %4019 = vmatpush3.bf16.msra.mxu1 %v4390_v1  ;;  %3998 = vmatprep.subr.bf16.mxu0 %v4391_v2  ;;  %v892_v1 = vcombine.high %v227_v62, %v227_v62  ;;  %v4446_v2 = vld [vmem:[%s5569_s1 + $0x400] sm:$0xff]   ;;  %v4498_v62 = vld [vmem:[%s5569_s1 + $0x658] sm:$0xff]  }
  0x76   : > { %4020 = vmatprep.subr.bf16.mxu1 %v4392_v3  ;;  %v4447_v3 = vld [vmem:[%s5569_s1 + $0x480] sm:$0xff]  }
  0x78   : > { %3999 = vmatpush3.bf16.msra.mxu0 %v4393_v4  ;;  %v907_v4 = vcombine.high %v899_v0, %v899_v0 }
  0x79   : > { %4021 = vmatpush3.bf16.msra.mxu1 %v4394_v5  ;;  %4000 = vmatprep.subr.bf16.mxu0 %v4395_v6  ;;  %v906_v5 = vrot.slane %v892_v1, %v4762_v42  ;;  %v4449_v6 = vld [vmem:[%s5569_s1 + $0x578] sm:$0xff]  }
  0x7a   : > { %4022 = vmatprep.subr.bf16.mxu1 %v4396_v7  ;;  %v4501_v1 = vld [vmem:[%s5569_s1 + $0x698] sm:$0xff]  }
  0x7b   : > { %v908_v7 = vcombine.high %v906_v5, %v906_v5 }
  0x7c   : > { %4001 = vmatpush3.bf16.msra.mxu0 %v4397_v8  ;;  %v4450_v8 = vld [vmem:[%s5569_s1 + $0x5f8] sm:$0xff]  }
  0x7d   : > { %4023 = vmatpush3.bf16.msra.mxu1 %v4398_v9  ;;  %4002 = vmatprep.subr.bf16.mxu0 %v4399_v10  ;;  %v4451_v9 = vld [vmem:[%s5569_s1 + $0x538] sm:$0xff]  }
  0x7e   : > { %4024 = vmatprep.subr.bf16.mxu1 %v4400_v11  ;;  %v4452_v10 = vld [vmem:[%s5569_s1 + $0x5b8] sm:$0xff]   ;;  %v4453_v11 = vld [vmem:[%s5569_s1 + $0x570] sm:$0xff]  }
  0x80   : > { %4003 = vmatpush3.bf16.msra.mxu0 %v4401_v12  ;;  %v4454_v12 = vld [vmem:[%s5569_s1 + $0x5f0] sm:$0xff]  }
  0x81   : > { %4025 = vmatpush3.bf16.msra.mxu1 %v4402_v13  ;;  %4004 = vmatprep.subr.bf16.mxu0 %v4403_v14  ;;  %v4455_v13 = vld [vmem:[%s5569_s1 + $0x530] sm:$0xff]  }
  0x82   : > { %4026 = vmatprep.subr.bf16.mxu1 %v4404_v15  ;;  %v4456_v14 = vld [vmem:[%s5569_s1 + $0x5b0] sm:$0xff]   ;;  %v4457_v15 = vld [vmem:[%s5569_s1 + $0x568] sm:$0xff]  }
  0x84   : > { %4005 = vmatpush3.bf16.msra.mxu0 %v4405_v16  ;;  %v4458_v16 = vld [vmem:[%s5569_s1 + $0x5e8] sm:$0xff]  }
  0x85   : > { %4027 = vmatpush3.bf16.msra.mxu1 %v4406_v17  ;;  %4006 = vmatprep.subr.bf16.mxu0 %v4407_v18  ;;  %v4459_v17 = vld [vmem:[%s5569_s1 + $0x528] sm:$0xff]  }
  0x86   : > { %4028 = vmatprep.subr.bf16.mxu1 %v4408_v19  ;;  %v4460_v18 = vld [vmem:[%s5569_s1 + $0x5a8] sm:$0xff]   ;;  %v4461_v19 = vld [vmem:[%s5569_s1 + $0x560] sm:$0xff]  }
  0x88   : > { %4007 = vmatpush3.bf16.msra.mxu0 %v4409_v20  ;;  %v4462_v20 = vld [vmem:[%s5569_s1 + $0x5e0] sm:$0xff]  }
  0x89   : > { %4029 = vmatpush3.bf16.msra.mxu1 %v4410_v21  ;;  %4008 = vmatprep.subr.bf16.mxu0 %v4411_v22  ;;  %v4463_v21 = vld [vmem:[%s5569_s1 + $0x520] sm:$0xff]  }
  0x8a   : > { %4030 = vmatprep.subr.bf16.mxu1 %v4412_v24  ;;  %v4464_v22 = vld [vmem:[%s5569_s1 + $0x5a0] sm:$0xff]   ;;  %v4466_v24 = vld [vmem:[%s5569_s1 + $0x5d8] sm:$0xff]  }
  0x8c   : > { %4009 = vmatpush3.bf16.msra.mxu0 %v4413_v27  ;;  %v4469_v27 = vld [vmem:[%s5569_s1 + $0x550] sm:$0xff]  }
  0x8d   : > { %4031 = vmatpush3.bf16.msra.mxu1 %v4414_v28  ;;  %4038 = vmatprep.subr.bf16.mxu0 %v4416_v31  ;;  %v4470_v28 = vld [vmem:[%s5569_s1 + $0x5d0] sm:$0xff]   ;;  %v4473_v31 = vld [vmem:[%s5569_s1 + $0x548] sm:$0xff]  }
  0x8e   : > { %4060 = vmatprep.subr.bf16.mxu1 %v4417_v33  ;;  %v4475_v33 = vld [vmem:[%s5569_s1 + $0x508] sm:$0xff]  }
  0x8f   : > { %3014 = vmatmul.mubr.bf16.vlgmr.msra.gmra.mxu0 %v882_v25  ;;  %v4467_v25 = vld [vmem:[%s5569_s1 + $0x518] sm:$0xff]  }
  0x90   : > { %3054 = vmatmul.mubr.bf16.vlgmr.msra.gmra.mxu1 %v889_v30  ;;  %4039 = vmatpush3.bf16.msra.mxu0 %v4418_v34  ;;  %v4472_v30 = vld [vmem:[%s5569_s1 + $0x590] sm:$0xff]   ;;  %v4476_v34 = vld [vmem:[%s5569_s1 + $0x588] sm:$0xff]  }
  0x91   : > { %4061 = vmatpush3.bf16.msra.mxu1 %v4419_v35  ;;  %4040 = vmatprep.subr.bf16.mxu0 %v4420_v36  ;;  %v4477_v35 = vld [vmem:[%s5569_s1 + $0x540] sm:$0xff]   ;;  %v228_v36 = vld [vmem:[%s4747_s5 + $0x28] sm:$0xff] }
  0x92   : > { %4062 = vmatprep.subr.bf16.mxu1 %v4421_v37  ;;  %3093 = vmatprep.mubr.bf16.mxu0 %v907_v4  ;;  %v4478_v37 = vld [vmem:[%s5569_s1 + $0x5c0] sm:$0xff]   ;;  %v4504_v4 = vld [vmem:[%s5569_s1 + $0x610] sm:$0xff]  }
  0x93   : > { %3133 = vmatprep.mubr.bf16.mxu1 %v908_v7  ;;  %v4507_v7 = vld [vmem:[%s5569_s1 + $0x6c8] sm:$0xff]  }
  0x94   : > { %4041 = vmatpush3.bf16.msra.mxu0 %v4422_v38  ;;  %v916_v38 = vrot.slane %v228_v36, %v4762_v42 }
  0x95   : > { %4063 = vmatpush3.bf16.msra.mxu1 %v4423_v39  ;;  %4042 = vmatprep.subr.bf16.mxu0 %v4424_v40  ;;  %v909_v39 = vcombine.high %v228_v36, %v228_v36  ;;  %v4479_v40 = vld [vmem:[%s5569_s1 + $0x500] sm:$0xff]  }
  0x96   : > { %4064 = vmatprep.subr.bf16.mxu1 %v4425_v41  ;;  %v4480_v41 = vld [vmem:[%s5569_s1 + $0x580] sm:$0xff]  }
  0x98   : > { %4043 = vmatpush3.bf16.msra.mxu0 %v4426_v43  ;;  %v924_v43 = vcombine.high %v916_v38, %v916_v38 }
  0x99   : > { %4065 = vmatpush3.bf16.msra.mxu1 %v4427_v44  ;;  %4044 = vmatprep.subr.bf16.mxu0 %v4428_v45  ;;  %v923_v44 = vrot.slane %v909_v39, %v4762_v42  ;;  %v4482_v45 = vld [vmem:[%s5569_s1 + $0x678] sm:$0xff]  }
  0x9a   : > { %4066 = vmatprep.subr.bf16.mxu1 %v4429_v46 }
  0x9b   : > { %v925_v46 = vcombine.high %v923_v44, %v923_v44 }
  0x9c   : > { %4045 = vmatpush3.bf16.msra.mxu0 %v4430_v47  ;;  %v4483_v47 = vld [vmem:[%s5569_s1 + $0x6f8] sm:$0xff]  }
  0x9d   : > { %4067 = vmatpush3.bf16.msra.mxu1 %v4431_v48  ;;  %4046 = vmatprep.subr.bf16.mxu0 %v4432_v49  ;;  %v4484_v48 = vld [vmem:[%s5569_s1 + $0x638] sm:$0xff]  }
  0x9e   : > { %4068 = vmatprep.subr.bf16.mxu1 %v4433_v50  ;;  %v4485_v49 = vld [vmem:[%s5569_s1 + $0x6b8] sm:$0xff]   ;;  %v4486_v50 = vld [vmem:[%s5569_s1 + $0x670] sm:$0xff]  }
  0xa0   : > { %4047 = vmatpush3.bf16.msra.mxu0 %v4434_v51  ;;  %v4487_v51 = vld [vmem:[%s5569_s1 + $0x6f0] sm:$0xff]  }
  0xa1   : > { %4069 = vmatpush3.bf16.msra.mxu1 %v4435_v52  ;;  %4048 = vmatprep.subr.bf16.mxu0 %v4436_v53  ;;  %v4488_v52 = vld [vmem:[%s5569_s1 + $0x630] sm:$0xff]  }
  0xa2   : > { %4070 = vmatprep.subr.bf16.mxu1 %v4437_v54  ;;  %v4489_v53 = vld [vmem:[%s5569_s1 + $0x6b0] sm:$0xff]   ;;  %v4490_v54 = vld [vmem:[%s5569_s1 + $0x668] sm:$0xff]  }
  0xa4   : > { %4049 = vmatpush3.bf16.msra.mxu0 %v4438_v55  ;;  %v4491_v55 = vld [vmem:[%s5569_s1 + $0x6e8] sm:$0xff]  }
  0xa5   : > { %4071 = vmatpush3.bf16.msra.mxu1 %v4439_v56  ;;  %4050 = vmatprep.subr.bf16.mxu0 %v4440_v57  ;;  %v4492_v56 = vld [vmem:[%s5569_s1 + $0x628] sm:$0xff]  }
  0xa6   : > { %4072 = vmatprep.subr.bf16.mxu1 %v4441_v58  ;;  %v4493_v57 = vld [vmem:[%s5569_s1 + $0x6a8] sm:$0xff]   ;;  %v4494_v58 = vld [vmem:[%s5569_s1 + $0x660] sm:$0xff]  }
  0xa8   : > { %4051 = vmatpush3.bf16.msra.mxu0 %v4442_v59  ;;  %v4495_v59 = vld [vmem:[%s5569_s1 + $0x6e0] sm:$0xff]  }
  0xa9   : > { %4073 = vmatpush3.bf16.msra.mxu1 %v4443_v60  ;;  %4052 = vmatprep.subr.bf16.mxu0 %v4444_v61  ;;  %v4496_v60 = vld [vmem:[%s5569_s1 + $0x620] sm:$0xff]  }
  0xaa   : > { %4074 = vmatprep.subr.bf16.mxu1 %v4445_v63  ;;  %v4497_v61 = vld [vmem:[%s5569_s1 + $0x6a0] sm:$0xff]   ;;  %v4499_v63 = vld [vmem:[%s5569_s1 + $0x6d8] sm:$0xff]  }
  0xac   : > { %4053 = vmatpush3.bf16.msra.mxu0 %v4446_v2  ;;  %v4502_v2 = vld [vmem:[%s5569_s1 + $0x650] sm:$0xff]  }
  0xad   : > { %4075 = vmatpush3.bf16.msra.mxu1 %v4447_v3  ;;  %4082 = vmatprep.subr.bf16.mxu0 %v4449_v6  ;;  %v4503_v3 = vld [vmem:[%s5569_s1 + $0x6d0] sm:$0xff]   ;;  %v4506_v6 = vld [vmem:[%s5569_s1 + $0x648] sm:$0xff]  }
  0xae   : > { %4104 = vmatprep.subr.bf16.mxu1 %v4450_v8  ;;  %v4508_v8 = vld [vmem:[%s5569_s1 + $0x608] sm:$0xff]  }
  0xaf   : > { %3094 = vmatmul.mubr.bf16.vlgmr.msra.gmra.mxu0 %v899_v0  ;;  %v4500_v0 = vld [vmem:[%s5569_s1 + $0x618] sm:$0xff]  }
  0xb0   : > { %3134 = vmatmul.mubr.bf16.vlgmr.msra.gmra.mxu1 %v906_v5  ;;  %4083 = vmatpush3.bf16.msra.mxu0 %v4451_v9  ;;  %v4505_v5 = vld [vmem:[%s5569_s1 + $0x690] sm:$0xff]   ;;  %v4509_v9 = vld [vmem:[%s5569_s1 + $0x688] sm:$0xff]  }
  0xb1   : > { %4105 = vmatpush3.bf16.msra.mxu1 %v4452_v10  ;;  %4084 = vmatprep.subr.bf16.mxu0 %v4453_v11  ;;  %v4510_v10 = vld [vmem:[%s5569_s1 + $0x640] sm:$0xff]  }
  0xb2   : > { %4106 = vmatprep.subr.bf16.mxu1 %v4454_v12  ;;  %3173 = vmatprep.mubr.bf16.mxu0 %v924_v43  ;;  %v4511_v11 = vld [vmem:[%s5569_s1 + $0x6c0] sm:$0xff]   ;;  %v229_v12 = vld [vmem:[%s4747_s5 + $0x30] sm:$0xff] }
  0xb3   : > { %3213 = vmatprep.mubr.bf16.mxu1 %v925_v46  ;;  %v4527_v43 = vld [vmem:[%s5569_s1 + $0x760] sm:$0xff]  }
  0xb4   : > { %4085 = vmatpush3.bf16.msra.mxu0 %v4455_v13  ;;  %v933_v13 = vrot.slane %v229_v12, %v4762_v42  ;;  %v4528_v46 = vld [vmem:[%s5569_s1 + $0x7e0] sm:$0xff]  }
  0xb5   : > { %4107 = vmatpush3.bf16.msra.mxu1 %v4456_v14  ;;  %4086 = vmatprep.subr.bf16.mxu0 %v4457_v15  ;;  %v926_v14 = vcombine.high %v229_v12, %v229_v12  ;;  %v4512_v15 = vld [vmem:[%s5569_s1 + $0x600] sm:$0xff]   ;;  %v4552_v12 = vld [vmem:[%s5569_s1 + $0x870] sm:$0xff]  }
  0xb6   : > { %4108 = vmatprep.subr.bf16.mxu1 %v4458_v16  ;;  %v4513_v16 = vld [vmem:[%s5569_s1 + $0x680] sm:$0xff]  }
  0xb8   : > { %4087 = vmatpush3.bf16.msra.mxu0 %v4459_v17  ;;  %v941_v17 = vcombine.high %v933_v13, %v933_v13 }
  0xb9   : > { %4109 = vmatpush3.bf16.msra.mxu1 %v4460_v18  ;;  %4088 = vmatprep.subr.bf16.mxu0 %v4461_v19  ;;  %v940_v18 = vrot.slane %v926_v14, %v4762_v42  ;;  %v4515_v19 = vld [vmem:[%s5569_s1 + $0x778] sm:$0xff]   ;;  %v4554_v14 = vld [vmem:[%s5569_s1 + $0x830] sm:$0xff]  }
  0xba   : > { %4110 = vmatprep.subr.bf16.mxu1 %v4462_v20  ;;  %v4516_v20 = vld [vmem:[%s5569_s1 + $0x7f8] sm:$0xff]  }
  0xbc   : > { %4089 = vmatpush3.bf16.msra.mxu0 %v4463_v21  ;;  %v942_v21 = vcombine.high %v940_v18, %v940_v18 }
  0xbd   : > { %4111 = vmatpush3.bf16.msra.mxu1 %v4464_v22  ;;  %4090 = vmatprep.subr.bf16.mxu0 %v4465_v23  ;;  %v4517_v22 = vld [vmem:[%s5569_s1 + $0x738] sm:$0xff]  }
  0xbe   : > { %4112 = vmatprep.subr.bf16.mxu1 %v4466_v24  ;;  %v4518_v23 = vld [vmem:[%s5569_s1 + $0x7b8] sm:$0xff]   ;;  %v4519_v24 = vld [vmem:[%s5569_s1 + $0x770] sm:$0xff]  }
  0xc0   : > { %4091 = vmatpush3.bf16.msra.mxu0 %v4467_v25  ;;  %v4520_v25 = vld [vmem:[%s5569_s1 + $0x7f0] sm:$0xff]  }
  0xc1   : > { %4113 = vmatpush3.bf16.msra.mxu1 %v4468_v26  ;;  %4092 = vmatprep.subr.bf16.mxu0 %v4469_v27  ;;  %v4521_v26 = vld [vmem:[%s5569_s1 + $0x730] sm:$0xff]  }
  0xc2   : > { %4114 = vmatprep.subr.bf16.mxu1 %v4470_v28 }
  0xc4   : > { %4093 = vmatpush3.bf16.msra.mxu0 %v4471_v29  ;;  %v3571_v29 = vld [vmem:[#allocation2] ss:$0 sm:$0xff] }
  0xc5   : > { %4115 = vmatpush3.bf16.msra.mxu1 %v4472_v30  ;;  %4094 = vmatprep.subr.bf16.mxu0 %v4473_v31  ;;  %v4522_v30 = vld [vmem:[%s5569_s1 + $0x7b0] sm:$0xff]   ;;  %v4523_v31 = vld [vmem:[%s5569_s1 + $0x768] sm:$0xff]  }
  0xc6   : > { %4116 = vmatprep.subr.bf16.mxu1 %v4474_v32 }
  0xc8   : > { %4095 = vmatpush3.bf16.msra.mxu0 %v4475_v33 }
  0xc9   : > { %4117 = vmatpush3.bf16.msra.mxu1 %v4476_v34  ;;  %4096 = vmatprep.subr.bf16.mxu0 %v4477_v35  ;;  %v4524_v34 = vld [vmem:[%s5569_s1 + $0x7e8] sm:$0xff]  }
  0xca   : > { %4118 = vmatprep.subr.bf16.mxu1 %v4478_v37  ;;  %v4525_v37 = vld [vmem:[%s5569_s1 + $0x728] sm:$0xff]  }
  0xcc   : > { %4097 = vmatpush3.bf16.msra.mxu0 %v4479_v40  ;;  %v4526_v40 = vld [vmem:[%s5569_s1 + $0x7a8] sm:$0xff]  }
  0xcd   : > { %4119 = vmatpush3.bf16.msra.mxu1 %v4480_v41  ;;  %4126 = vmatprep.subr.bf16.mxu0 %v4482_v45 }
  0xce   : > { %4148 = vmatprep.subr.bf16.mxu1 %v4483_v47 }
  0xcf   : > { %3174 = vmatmul.mubr.bf16.vlgmr.msra.gmra.mxu0 %v916_v38 }
  0xd0   : > { %3214 = vmatmul.mubr.bf16.vlgmr.msra.gmra.mxu1 %v923_v44  ;;  %4127 = vmatpush3.bf16.msra.mxu0 %v4484_v48  ;;  %v4529_v48 = vld [vmem:[%s5569_s1 + $0x720] sm:$0xff]  }
  0xd1   : > { %4149 = vmatpush3.bf16.msra.mxu1 %v4485_v49  ;;  %4128 = vmatprep.subr.bf16.mxu0 %v4486_v50  ;;  %v4530_v49 = vld [vmem:[%s5569_s1 + $0x7a0] sm:$0xff]   ;;  %v4531_v50 = vld [vmem:[%s5569_s1 + $0x758] sm:$0xff]  }
  0xd2   : > { %4150 = vmatprep.subr.bf16.mxu1 %v4487_v51  ;;  %3253 = vmatprep.mubr.bf16.mxu0 %v941_v17  ;;  %v4532_v51 = vld [vmem:[%s5569_s1 + $0x7d8] sm:$0xff]   ;;  %v4555_v17 = vld [vmem:[%s5569_s1 + $0x8b0] sm:$0xff]  }
  0xd3   : > { %3293 = vmatprep.mubr.bf16.mxu1 %v942_v21  ;;  %v4557_v21 = vld [vmem:[%s5569_s1 + $0x8e8] sm:$0xff]  }
  0xd4   : > { %4129 = vmatpush3.bf16.msra.mxu0 %v4488_v52  ;;  %v4533_v52 = vld [vmem:[%s5569_s1 + $0x718] sm:$0xff]  }
  0xd5   : > { %4151 = vmatpush3.bf16.msra.mxu1 %v4489_v53  ;;  %4130 = vmatprep.subr.bf16.mxu0 %v4490_v54  ;;  %v4534_v53 = vld [vmem:[%s5569_s1 + $0x798] sm:$0xff]   ;;  %v4535_v54 = vld [vmem:[%s5569_s1 + $0x750] sm:$0xff]  }
  0xd6   : > { %4152 = vmatprep.subr.bf16.mxu1 %v4491_v55  ;;  %v4536_v55 = vld [vmem:[%s5569_s1 + $0x7d0] sm:$0xff]  }
  0xd8   : > { %4131 = vmatpush3.bf16.msra.mxu0 %v4492_v56  ;;  %v4537_v56 = vld [vmem:[%s5569_s1 + $0x710] sm:$0xff]  }
  0xd9   : > { %4153 = vmatpush3.bf16.msra.mxu1 %v4493_v57  ;;  %4132 = vmatprep.subr.bf16.mxu0 %v4494_v58  ;;  %v4538_v57 = vld [vmem:[%s5569_s1 + $0x790] sm:$0xff]   ;;  %v4539_v58 = vld [vmem:[%s5569_s1 + $0x748] sm:$0xff]  }
  0xda   : > { %4154 = vmatprep.subr.bf16.mxu1 %v4495_v59  ;;  %v4540_v59 = vld [vmem:[%s5569_s1 + $0x7c8] sm:$0xff]  }
  0xdc   : > { %4133 = vmatpush3.bf16.msra.mxu0 %v4496_v60  ;;  %v4541_v60 = vld [vmem:[%s5569_s1 + $0x708] sm:$0xff]  }
  0xdd   : > { %4155 = vmatpush3.bf16.msra.mxu1 %v4497_v61  ;;  %4134 = vmatprep.subr.bf16.mxu0 %v4498_v62  ;;  %v4542_v61 = vld [vmem:[%s5569_s1 + $0x788] sm:$0xff]   ;;  %v4543_v62 = vld [vmem:[%s5569_s1 + $0x740] sm:$0xff]  }
  0xde   : > { %4156 = vmatprep.subr.bf16.mxu1 %v4499_v63  ;;  %v4544_v63 = vld [vmem:[%s5569_s1 + $0x7c0] sm:$0xff]  }
  0xe0   : > { %4135 = vmatpush3.bf16.msra.mxu0 %v4500_v0  ;;  %v230_v0 = vld [vmem:[%s4747_s5 + $0x38] sm:$0xff] }
  0xe1   : > { %4157 = vmatpush3.bf16.msra.mxu1 %v4501_v1  ;;  %4136 = vmatprep.subr.bf16.mxu0 %v4502_v2  ;;  %v4545_v1 = vld [vmem:[%s5569_s1 + $0x700] sm:$0xff]   ;;  %v950_v2 = vrot.slane %v230_v0, %v4762_v42 }
  0xe2   : > { %4158 = vmatprep.subr.bf16.mxu1 %v4503_v3  ;;  %v943_v3 = vcombine.high %v230_v0, %v230_v0 }
  0xe4   : > { %4137 = vmatpush3.bf16.msra.mxu0 %v4504_v4  ;;  %v4546_v4 = vld [vmem:[%s5569_s1 + $0x780] sm:$0xff]  }
  0xe5   : > { %4159 = vmatpush3.bf16.msra.mxu1 %v4505_v5  ;;  %4138 = vmatprep.subr.bf16.mxu0 %v4506_v6  ;;  %v958_v5 = vcombine.high %v950_v2, %v950_v2  ;;  %v957_v6 = vrot.slane %v943_v3, %v4762_v42 }
  0xe6   : > { %4160 = vmatprep.subr.bf16.mxu1 %v4507_v7  ;;  %v4548_v7 = vld [vmem:[%s5569_s1 + $0x878] sm:$0xff]  }
  0xe8   : > { %4139 = vmatpush3.bf16.msra.mxu0 %v4508_v8  ;;  %v4549_v8 = vld [vmem:[%s5569_s1 + $0x8f8] sm:$0xff]  }
  0xe9   : > { %4161 = vmatpush3.bf16.msra.mxu1 %v4509_v9  ;;  %4140 = vmatprep.subr.bf16.mxu0 %v4510_v10  ;;  %v959_v9 = vcombine.high %v957_v6, %v957_v6  ;;  %v4550_v10 = vld [vmem:[%s5569_s1 + $0x838] sm:$0xff]  }
  0xea   : > { %4162 = vmatprep.subr.bf16.mxu1 %v4511_v11  ;;  %v4551_v11 = vld [vmem:[%s5569_s1 + $0x8b8] sm:$0xff]  }
  0xec   : > { %4141 = vmatpush3.bf16.msra.mxu0 %v4512_v15 }
  0xed   : > { %4163 = vmatpush3.bf16.msra.mxu1 %v4513_v16  ;;  %4170 = vmatprep.subr.bf16.mxu0 %v4515_v19 }
  0xee   : > { %4192 = vmatprep.subr.bf16.mxu1 %v4516_v20 }
  0xef   : > { %v3878_v27 = vpop.f32.mrf.mxu0  ;;  %3254 = vmatmul.mubr.bf16.vlgmr.msra.gmra.mxu0 %v933_v13  ;;  %v4553_v13 = vld [vmem:[%s5569_s1 + $0x8f0] sm:$0xff]  }
  0xf0   : > { %v3900_v28 = vpop.f32.mrf.mxu1  ;;  %3294 = vmatmul.mubr.bf16.vlgmr.msra.gmra.mxu1 %v940_v18  ;;  %4171 = vmatpush3.bf16.msra.mxu0 %v4517_v22  ;;  %v4556_v18 = vld [vmem:[%s5569_s1 + $0x868] sm:$0xff]  }
  0xf1   : > { %4193 = vmatpush3.bf16.msra.mxu1 %v4518_v23  ;;  %v3879_v32 = vpop.f32.mrf.mxu0  ;;  %4172 = vmatprep.subr.bf16.mxu0 %v4519_v24  ;;  %v4558_v24 = vld [vmem:[%s5569_s1 + $0x828] sm:$0xff]  }
  0xf2   : > { %v3901_v33 = vpop.f32.mrf.mxu1  ;;  %4194 = vmatprep.subr.bf16.mxu1 %v4520_v25  ;;  %v3880_v35 = vadd.f32 %v3879_v32, %v3878_v27  ;;  %3333 = vmatprep.mubr.bf16.mxu0 %v958_v5  ;;  %v4559_v27 = vld [vmem:[%s5569_s1 + $0x8a8] sm:$0xff]   ;;  %v4561_v32 = vld [vmem:[%s5569_s1 + $0x8e0] sm:$0xff]  }
  0xf3   : > { %v3902_v36 = vadd.f32 %v3901_v33, %v3900_v28  ;;  %v3881_v38 = vpop.f32.mrf.mxu0  ;;  %3373 = vmatprep.mubr.bf16.mxu1 %v959_v9 }
  0xf4   : > { %v3903_v39 = vpop.f32.mrf.mxu1  ;;  %v2776_v41 = vadd.f32 %v3880_v35, %v3571_v29  ;;  %4173 = vmatpush3.bf16.msra.mxu0 %v4521_v26  ;;  %v4560_v29 = vld [vmem:[%s5569_s1 + $0x860] sm:$0xff]   ;;  %v4566_v38 = vld [vmem:[%s5569_s1 + $0x818] sm:$0xff]  }
  0xf5   : > { %4195 = vmatpush3.bf16.msra.mxu1 %v4522_v30  ;;  %v3882_v44 = vpop.f32.mrf.mxu0  ;;  %4174 = vmatprep.subr.bf16.mxu0 %v4523_v31  ;;  %v4563_v35 = vld [vmem:[%s5569_s1 + $0x8a0] sm:$0xff]   ;;  %v4567_v39 = vld [vmem:[%s5569_s1 + $0x898] sm:$0xff]  }
  0xf6   : > { %v3904_v45 = vpop.f32.mrf.mxu1  ;;  %4196 = vmatprep.subr.bf16.mxu1 %v4524_v34  ;;  %v5396_v47 = vadd.f32 %v3902_v36, %v2776_v41  ;;  %v4562_v34 = vld [vmem:[%s5569_s1 + $0x820] sm:$0xff]   ;;  %v4564_v36 = vld [vmem:[%s5569_s1 + $0x858] sm:$0xff]   ;;  %v4569_v41 = vld [vmem:[%s5569_s1 + $0x8d0] sm:$0xff]  }
  0xf7   : > { %v4571_v44 = vld [vmem:[%s5569_s1 + $0x890] sm:$0xff]   ;;  %v4572_v45 = vld [vmem:[%s5569_s1 + $0x848] sm:$0xff]  }
  0xf8   : > { %4175 = vmatpush3.bf16.msra.mxu0 %v4525_v37  ;;  %v4565_v37 = vld [vmem:[%s5569_s1 + $0x8d8] sm:$0xff]  }
  0xf9   : > { %4197 = vmatpush3.bf16.msra.mxu1 %v4526_v40  ;;  %4176 = vmatprep.subr.bf16.mxu0 %v4527_v43  ;;  %v4568_v40 = vld [vmem:[%s5569_s1 + $0x850] sm:$0xff]  }
  0xfa   : > { %4198 = vmatprep.subr.bf16.mxu1 %v4528_v46  ;;  %v4570_v43 = vld [vmem:[%s5569_s1 + $0x810] sm:$0xff]   ;;  %v4573_v46 = vld [vmem:[%s5569_s1 + $0x8c8] sm:$0xff]  }
  0xfc   : > { %4177 = vmatpush3.bf16.msra.mxu0 %v4529_v48  ;;  %v4575_v48 = vld [vmem:[%s5569_s1 + $0x888] sm:$0xff]  }
  0xfd   : > { %4199 = vmatpush3.bf16.msra.mxu1 %v4530_v49  ;;  %4178 = vmatprep.subr.bf16.mxu0 %v4531_v50  ;;  %v4576_v49 = vld [vmem:[%s5569_s1 + $0x840] sm:$0xff]  }
  0xfe   : > { %4200 = vmatprep.subr.bf16.mxu1 %v4532_v51  ;;  %v4577_v50 = vld [vmem:[%s5569_s1 + $0x8c0] sm:$0xff]  }
  0xff   : > { %v231_v51 = vld [vmem:[%s4747_s5 + $0x40] sm:$0xff]  ;;  %s3570_s5 = sshll.u32 %s5577_s14, 2 }
 0x100   : > { %4179 = vmatpush3.bf16.msra.mxu0 %v4533_v52  ;;  %v967_v52 = vrot.slane %v231_v51, %v4762_v42  ;;  %s221_s21 = scalar_lea.vmem %s5571_s3, %s3570_s5 }
 0x101   : > { %4201 = vmatpush3.bf16.msra.mxu1 %v4534_v53  ;;  %4180 = vmatprep.subr.bf16.mxu0 %v4535_v54  ;;  %v960_v53 = vcombine.high %v231_v51, %v231_v51  ;;  %v4578_v54 = vld [vmem:[%s5569_s1 + $0x800] sm:$0xff]  }
 0x102   : > { %4202 = vmatprep.subr.bf16.mxu1 %v4536_v55  ;;  %v4579_v55 = vld [vmem:[%s5569_s1 + $0x880] sm:$0xff]  }
 0x104   : > { %4181 = vmatpush3.bf16.msra.mxu0 %v4537_v56  ;;  %v975_v56 = vcombine.high %v967_v52, %v967_v52 }
 0x105   : > { %4203 = vmatpush3.bf16.msra.mxu1 %v4538_v57  ;;  %4182 = vmatprep.subr.bf16.mxu0 %v4539_v58  ;;  %v974_v57 = vrot.slane %v960_v53, %v4762_v42 }
 0x106   : > { %4204 = vmatprep.subr.bf16.mxu1 %v4540_v59 }
 0x107   : > { %v976_v58 = vcombine.high %v974_v57, %v974_v57 }
 0x108   : > { %4183 = vmatpush3.bf16.msra.mxu0 %v4541_v60 }
 0x109   : > { %4205 = vmatpush3.bf16.msra.mxu1 %v4542_v61  ;;  %4184 = vmatprep.subr.bf16.mxu0 %v4543_v62 }
 0x10a   : > { %4206 = vmatprep.subr.bf16.mxu1 %v4544_v63 }
 0x10c   : > { %4185 = vmatpush3.bf16.msra.mxu0 %v4545_v1 }
 0x10d   : > { %4207 = vmatpush3.bf16.msra.mxu1 %v4546_v4  ;;  %4214 = vmatprep.subr.bf16.mxu0 %v4548_v7 }
 0x10e   : > { %4236 = vmatprep.subr.bf16.mxu1 %v4549_v8 }
 0x10f   : > { %v3922_v15 = vpop.f32.mrf.mxu0  ;;  %3334 = vmatmul.mubr.bf16.vlgmr.msra.gmra.mxu0 %v950_v2 }
 0x110   : > { %v3944_v16 = vpop.f32.mrf.mxu1  ;;  %3374 = vmatmul.mubr.bf16.vlgmr.msra.gmra.mxu1 %v957_v6  ;;  %4215 = vmatpush3.bf16.msra.mxu0 %v4550_v10 }
 0x111   : > { %4237 = vmatpush3.bf16.msra.mxu1 %v4551_v11  ;;  %v3923_v19 = vpop.f32.mrf.mxu0  ;;  %4216 = vmatprep.subr.bf16.mxu0 %v4552_v12 }
 0x112   : > { %v3945_v20 = vpop.f32.mrf.mxu1  ;;  %4238 = vmatprep.subr.bf16.mxu1 %v4553_v13  ;;  %v3924_v22 = vadd.f32 %v3923_v19, %v3922_v15  ;;  %3413 = vmatprep.mubr.bf16.mxu0 %v975_v56 }
 0x113   : > { %v3946_v23 = vadd.f32 %v3945_v20, %v3944_v16  ;;  %v3925_v25 = vpop.f32.mrf.mxu0  ;;  %3453 = vmatprep.mubr.bf16.mxu1 %v976_v58 }
 0x114   : > { %v3947_v26 = vpop.f32.mrf.mxu1  ;;  %v2856_v28 = vadd.f32 %v3924_v22, %v5396_v47  ;;  %4217 = vmatpush3.bf16.msra.mxu0 %v4554_v14  ;;  %v4574_v47 = vld [vmem:[%s5569_s1 + $0x808] sm:$0xff]  }
 0x115   : > { %4239 = vmatpush3.bf16.msra.mxu1 %v4555_v17  ;;  %v3926_v30 = vpop.f32.mrf.mxu0  ;;  %4218 = vmatprep.subr.bf16.mxu0 %v4556_v18 }
 0x116   : > { %v3948_v31 = vpop.f32.mrf.mxu1  ;;  %4240 = vmatprep.subr.bf16.mxu1 %v4557_v21  ;;  %v2896_v33 = vadd.f32 %v3946_v23, %v2856_v28 }
 0x118   : > { %4219 = vmatpush3.bf16.msra.mxu0 %v4558_v24 }
 0x119   : > { %4241 = vmatpush3.bf16.msra.mxu1 %v4559_v27  ;;  %4220 = vmatprep.subr.bf16.mxu0 %v4560_v29 }
 0x11a   : > { %4242 = vmatprep.subr.bf16.mxu1 %v4561_v32 }
 0x11c   : > { %4221 = vmatpush3.bf16.msra.mxu0 %v4562_v34 }
 0x11d   : > { %4243 = vmatpush3.bf16.msra.mxu1 %v4563_v35  ;;  %4222 = vmatprep.subr.bf16.mxu0 %v4564_v36 }
 0x11e   : > { %4244 = vmatprep.subr.bf16.mxu1 %v4565_v37 }
 0x120   : > { %4223 = vmatpush3.bf16.msra.mxu0 %v4566_v38 }
 0x121   : > { %4245 = vmatpush3.bf16.msra.mxu1 %v4567_v39  ;;  %4224 = vmatprep.subr.bf16.mxu0 %v4568_v40 }
 0x122   : > { %4246 = vmatprep.subr.bf16.mxu1 %v4569_v41 }
 0x124   : > { %4225 = vmatpush3.bf16.msra.mxu0 %v4570_v43 }
 0x125   : > { %4247 = vmatpush3.bf16.msra.mxu1 %v4571_v44  ;;  %4226 = vmatprep.subr.bf16.mxu0 %v4572_v45 }
 0x126   : > { %4248 = vmatprep.subr.bf16.mxu1 %v4573_v46 }
 0x128   : > { %4227 = vmatpush3.bf16.msra.mxu0 %v4574_v47 }
 0x129   : > { %4249 = vmatpush3.bf16.msra.mxu1 %v4575_v48  ;;  %4228 = vmatprep.subr.bf16.mxu0 %v4576_v49 }
 0x12a   : > { %4250 = vmatprep.subr.bf16.mxu1 %v4577_v50 }
 0x12c   : > { %4229 = vmatpush3.bf16.msra.mxu0 %v4578_v54 }
 0x12d   : > { %4251 = vmatpush3.bf16.msra.mxu1 %v4579_v55 }
 0x12f   : > { %v3966_v59 = vpop.f32.mrf.mxu0  ;;  %3414 = vmatmul.mubr.bf16.vlgmr.msra.gmra.mxu0 %v967_v52 }
 0x130   : > { %v3988_v60 = vpop.f32.mrf.mxu1  ;;  %3454 = vmatmul.mubr.bf16.vlgmr.msra.gmra.mxu1 %v974_v57 }
 0x131   : > { %v3967_v61 = vpop.f32.mrf.mxu0 }
 0x132   : > { %v3989_v62 = vpop.f32.mrf.mxu1  ;;  %v3968_v63 = vadd.f32 %v3967_v61, %v3966_v59 }
 0x133   : > { %v3990_v0 = vadd.f32 %v3989_v62, %v3988_v60  ;;  %v3969_v1 = vpop.f32.mrf.mxu0 }
 0x134   : > { %v3991_v2 = vpop.f32.mrf.mxu1  ;;  %v2936_v3 = vadd.f32 %v3968_v63, %v2896_v33 }
 0x135   : > { %v3970_v4 = vpop.f32.mrf.mxu0 }
 0x136   : > { %v3992_v5 = vpop.f32.mrf.mxu1  ;;  %v2976_v6 = vadd.f32 %v3990_v0, %v2936_v3 }
 0x14f   : > { %v4010_v42 = vpop.f32.mrf.mxu0 }
 0x150   : > { %v4032_v7 = vpop.f32.mrf.mxu1 }
 0x151   : > { %v4011_v8 = vpop.f32.mrf.mxu0 }
 0x152   : > { %v4033_v9 = vpop.f32.mrf.mxu1  ;;  %v4012_v10 = vadd.f32 %v4011_v8, %v4010_v42 }
 0x153   : > { %v4034_v11 = vadd.f32 %v4033_v9, %v4032_v7  ;;  %v4013_v12 = vpop.f32.mrf.mxu0 }
 0x154   : > { %v4035_v13 = vpop.f32.mrf.mxu1  ;;  %v3016_v14 = vadd.f32 %v4012_v10, %v2976_v6 }
 0x155   : > { %v4014_v15 = vpop.f32.mrf.mxu0 }
 0x156   : > { %v4036_v16 = vpop.f32.mrf.mxu1  ;;  %v3056_v17 = vadd.f32 %v4034_v11, %v3016_v14 }
 0x16f   : > { %v4054_v18 = vpop.f32.mrf.mxu0 }
 0x170   : > { %v4076_v19 = vpop.f32.mrf.mxu1 }
 0x171   : > { %v4055_v20 = vpop.f32.mrf.mxu0 }
 0x172   : > { %v4077_v21 = vpop.f32.mrf.mxu1  ;;  %v4056_v22 = vadd.f32 %v4055_v20, %v4054_v18 }
 0x173   : > { %v4078_v23 = vadd.f32 %v4077_v21, %v4076_v19  ;;  %v4057_v24 = vpop.f32.mrf.mxu0 }
 0x174   : > { %v4079_v25 = vpop.f32.mrf.mxu1  ;;  %v3096_v26 = vadd.f32 %v4056_v22, %v3056_v17 }
 0x175   : > { %v4058_v27 = vpop.f32.mrf.mxu0 }
 0x176   : > { %v4080_v28 = vpop.f32.mrf.mxu1  ;;  %v3136_v29 = vadd.f32 %v4078_v23, %v3096_v26 }
 0x18f   : > { %v4098_v30 = vpop.f32.mrf.mxu0 }
 0x190   : > { %v4120_v31 = vpop.f32.mrf.mxu1 }
 0x191   : > { %v4099_v32 = vpop.f32.mrf.mxu0 }
 0x192   : > { %v4121_v33 = vpop.f32.mrf.mxu1  ;;  %v4100_v34 = vadd.f32 %v4099_v32, %v4098_v30 }
 0x193   : > { %v4122_v35 = vadd.f32 %v4121_v33, %v4120_v31  ;;  %v4101_v36 = vpop.f32.mrf.mxu0 }
 0x194   : > { %v4123_v37 = vpop.f32.mrf.mxu1  ;;  %v3176_v38 = vadd.f32 %v4100_v34, %v3136_v29 }
 0x195   : > { %v4102_v39 = vpop.f32.mrf.mxu0 }
 0x196   : > { %v4124_v40 = vpop.f32.mrf.mxu1  ;;  %v3216_v41 = vadd.f32 %v4122_v35, %v3176_v38 }
 0x1af   : > { %v4142_v43 = vpop.f32.mrf.mxu0 }
 0x1b0   : > { %v4164_v44 = vpop.f32.mrf.mxu1 }
 0x1b1   : > { %v4143_v45 = vpop.f32.mrf.mxu0 }
 0x1b2   : > { %v4165_v46 = vpop.f32.mrf.mxu1  ;;  %v4144_v59 = vadd.f32 %v4143_v45, %v4142_v43 }
 0x1b3   : > { %v4145_v47 = vpop.f32.mrf.mxu0  ;;  %v4166_v61 = vadd.f32 %v4165_v46, %v4164_v44 }
 0x1b4   : > { %v4167_v48 = vpop.f32.mrf.mxu1  ;;  %v3256_v60 = vadd.f32 %v4144_v59, %v3216_v41 }
 0x1b5   : > { %v4146_v49 = vpop.f32.mrf.mxu0 }
 0x1b6   : > { %v4168_v50 = vpop.f32.mrf.mxu1  ;;  %v3296_v63 = vadd.f32 %v4166_v61, %v3256_v60 }
 0x1cf   : > { %v4186_v51 = vpop.f32.mrf.mxu0 }
 0x1d0   : > { %v4208_v52 = vpop.f32.mrf.mxu1 }
 0x1d1   : > { %v4187_v53 = vpop.f32.mrf.mxu0 }
 0x1d2   : > { %v4209_v54 = vpop.f32.mrf.mxu1  ;;  %v4188_v62 = vadd.f32 %v4187_v53, %v4186_v51 }
 0x1d3   : > { %v4189_v55 = vpop.f32.mrf.mxu0  ;;  %v4210_v1 = vadd.f32 %v4209_v54, %v4208_v52 }
 0x1d4   : > { %v4211_v56 = vpop.f32.mrf.mxu1  ;;  %v3336_v0 = vadd.f32 %v4188_v62, %v3296_v63 }
 0x1d5   : > { %v4190_v57 = vpop.f32.mrf.mxu0 }
 0x1d6   : > { %v4212_v58 = vpop.f32.mrf.mxu1  ;;  %v3376_v6 = vadd.f32 %v4210_v1, %v3336_v0 }
 0x1ef   : > { %v4230_v2 = vpop.f32.mrf.mxu0 }
 0x1f0   : > { %v4252_v3 = vpop.f32.mrf.mxu1 }
 0x1f1   : > { %v4231_v4 = vpop.f32.mrf.mxu0 }
 0x1f2   : > { %v4253_v5 = vpop.f32.mrf.mxu1  ;;  %v4232_v42 = vadd.f32 %v4231_v4, %v4230_v2 }
 0x1f3   : > { %v4233_v7 = vpop.f32.mrf.mxu0  ;;  %v4254_v10 = vadd.f32 %v4253_v5, %v4252_v3 }
 0x1f4   : > { %v4255_v8 = vpop.f32.mrf.mxu1  ;;  %v3416_v9 = vadd.f32 %v4232_v42, %v3376_v6 }
 0x1f5   : > { %v4234_v11 = vpop.f32.mrf.mxu0 }
 0x1f6   : > { %v4256_v12 = vpop.f32.mrf.mxu1  ;;  %v3456_v13 = vadd.f32 %v4254_v10, %v3416_v9 }
 0x1f8   : > { %3462 = vst.msk [vmem:[%s221_s21] sm:$0xf] %vm3461_vm0, %v3456_v13 }
 0x1f9 PF: > { %s15_s16 = sadd.s32 1, %s4603_s16   ;;  %s5572_s14 = smov %s4599_s15 }
 0x1fa   : > { %p12_p5 = scmp.ge.s32.totalorder %s15_s16, 4   ;;  %s5573_s15 = smov %s5575_s2 }
 0x1fc   :  { %14 = sbr.rel (!%p12_p5) target bundleno = 3 (0x3), region = 68 }

</bundles_post_ra>
